<compile_context>
chip_gen: v5e
topology: v5e:2x2
jax: 0.10.0
libtpu: 0.0.40
codegen_flags: <defaults>
</compile_context>

<pallas_src>
import jax
import jax.numpy as jnp
from jax.experimental import pallas as pl
from jax.experimental.pallas import tpu as pltpu


def nfm_kernel(idx_ref, fv_ref, fow_ref, emb_tbl_ref,
               w1_ref, b1_ref, w2_ref, b2_ref, wout_row_ref, bias_ref,
               out_ref):
    idx = idx_ref[...]                       # (bn, F) int32
    fv = fv_ref[...]                         # (bn, F) f32
    tbl = emb_tbl_ref[...]                   # (K, E) f32  (VMEM-resident table)

    bn, F = fv.shape
    K, E = tbl.shape

    # Fused embedding gather + FM bilinear reduction.
    # For each field f:  e_f = fv[:, f] * emb_table[idx[:, f]]
    # implemented as a scaled one-hot (bn, K) row times the (K, E) table on the
    # MXU, so the gathered embeddings never round-trip through HBM.
    k_iota = jax.lax.broadcasted_iota(jnp.int32, (bn, K), 1)   # hoisted once

    sum_emb = jnp.zeros((bn, E), jnp.float32)
    sum_sq = jnp.zeros((bn, E), jnp.float32)
    for f in range(F):   # F is small and static; unrolled at trace time
        sel = jnp.where(idx[:, f:f + 1] == k_iota, fv[:, f:f + 1], 0.0)   # (bn, K)
        e_f = jnp.dot(sel, tbl, preferred_element_type=jnp.float32)       # (bn, E)
        sum_emb = sum_emb + e_f
        sum_sq = sum_sq + e_f * e_f

    # FM second-order term: 0.5 * ((sum_f e)^2 - sum_f e^2)
    y_second = 0.5 * (sum_emb * sum_emb - sum_sq)      # (bn, E)

    # First-order term: fow[idx] * fv  (fow gathered in the wrapper).
    y_first = fow_ref[...] * fv                        # (bn, F)

    # Deep MLP (dropout == identity at inference)
    h = jnp.maximum(
        jnp.dot(y_second, w1_ref[...], preferred_element_type=jnp.float32)
        + b1_ref[...], 0.0)
    h = jnp.maximum(
        jnp.dot(h, w2_ref[...], preferred_element_type=jnp.float32)
        + b2_ref[...], 0.0)

    # Output layer has width 1: use VPU mul + lane reduce instead of the MXU.
    y_deep = jnp.sum(h * wout_row_ref[...], axis=-1, keepdims=True)      # (bn, 1)

    # y_output = y_first (bn,F) + y_deep (bn,1) + (b_out + bias)  -> (bn, F)
    out_ref[...] = y_first + y_deep + bias_ref[0, 0]


def nfm_forward(feature_index, feature_value, params, *, block_n=128):
    emb_table, fow_table, w1, b1, w2, b2, wout, bout, bias = params

    N, F = feature_value.shape
    K, E = emb_table.shape
    H1 = w1.shape[1]
    H2 = w2.shape[1]

    # First-order weight gather is tiny (N*F floats): keep it in the wrapper.
    fow = jnp.take(fow_table, feature_index, axis=0)[..., 0]     # (N, F)

    # Fold output-layer bias and the global bias into a single SMEM scalar.
    bias_sum = (bout + bias).reshape(1, 1).astype(jnp.float32)   # (1, 1)
    wout_row = wout.reshape(1, H2)                               # (1, H2) == wout.T

    feature_index = feature_index.astype(jnp.int32)
    feature_value = feature_value.astype(jnp.float32)

    # Pad the batch so any N works (padded rows use index 0 / value 0, sliced off).
    pad = (-N) % block_n
    if pad:
        feature_index = jnp.pad(feature_index, ((0, pad), (0, 0)))
        feature_value = jnp.pad(feature_value, ((0, pad), (0, 0)))
        fow = jnp.pad(fow, ((0, pad), (0, 0)))
    Np = N + pad
    grid = (Np // block_n,)

    out = pl.pallas_call(
        nfm_kernel,
        out_shape=jax.ShapeDtypeStruct((Np, F), jnp.float32),
        grid_spec=pltpu.PrefetchScalarGridSpec(
            num_scalar_prefetch=0,
            grid=grid,
            in_specs=[
                pl.BlockSpec((block_n, F), lambda i: (i, 0)),    # feature_index
                pl.BlockSpec((block_n, F), lambda i: (i, 0)),    # feature_value
                pl.BlockSpec((block_n, F), lambda i: (i, 0)),    # first-order weights
                pl.BlockSpec((K, E), lambda i: (0, 0)),          # embedding table (resident)
                pl.BlockSpec((E, H1), lambda i: (0, 0)),         # W1
                pl.BlockSpec((1, H1), lambda i: (0, 0)),         # b1
                pl.BlockSpec((H1, H2), lambda i: (0, 0)),        # W2
                pl.BlockSpec((1, H2), lambda i: (0, 0)),         # b2
                pl.BlockSpec((1, H2), lambda i: (0, 0)),         # W_out (as a row)
                pl.BlockSpec(memory_space=pltpu.MemorySpace.SMEM),  # bout + bias scalar
            ],
            out_specs=pl.BlockSpec((block_n, F), lambda i: (i, 0)),
        ),
        compiler_params=pltpu.CompilerParams(
            dimension_semantics=("parallel",)),
    )(feature_index, feature_value, fow, emb_table,
      w1, b1, w2, b2, wout_row, bias_sum)

    return out[:N]


def nfm_reference(feature_index, feature_value, params):
    """Pure-JAX reference mirroring the PyTorch forward (eval mode)."""
    emb_table, fow_table, w1, b1, w2, b2, wout, bout, bias = params
    emb = jnp.take(emb_table, feature_index, axis=0)            # (N, F, E)
    fv3 = feature_value[:, :, None]                             # (N, F, 1)
    emb = emb * fv3
    fow = jnp.take(fow_table, feature_index, axis=0)            # (N, F, 1)
    y_first = jnp.sum(fow * fv3, axis=2)                        # (N, F)
    summed_sq = jnp.sum(emb, axis=1) ** 2
    sq_sum = jnp.sum(emb ** 2, axis=1)
    y_second = 0.5 * (summed_sq - sq_sum)                       # (N, E)
    h = jax.nn.relu(y_second @ w1 + b1)
    h = jax.nn.relu(h @ w2 + b2)
    y_deep = h @ wout + bout                                    # (N, 1)
    return y_first + y_deep + bias[0, 0]


if __name__ == "__main__":
    # Problem sizes (small, consistent with the module's __init__ signature)
    N = 256            # batch (2 grid steps at block_n=128 -> both v7x cores busy)
    F = 8              # field_num
    E = 32             # embedding_dims
    NUM_FEATURES = 64  # num_features
    H1, H2 = 32, 32    # deep_layers_output_num = [32, 32]

    key = jax.random.PRNGKey(0)
    ks = jax.random.split(key, 12)

    # Deterministic parameter init (synthetic, not a checkpoint load)
    emb_table = jax.random.normal(ks[0], (NUM_FEATURES, E), jnp.float32) * 0.1
    fow_table = jax.random.normal(ks[1], (NUM_FEATURES, 1), jnp.float32) * 0.1
    w1 = jax.random.normal(ks[2], (E, H1), jnp.float32) * 0.1
    b1 = jax.random.normal(ks[3], (1, H1), jnp.float32) * 0.1
    w2 = jax.random.normal(ks[4], (H1, H2), jnp.float32) * 0.1
    b2 = jax.random.normal(ks[5], (1, H2), jnp.float32) * 0.1
    wout = jax.random.normal(ks[6], (H2, 1), jnp.float32) * 0.1
    bout = jax.random.normal(ks[7], (1, 1), jnp.float32) * 0.1
    bias = jax.random.uniform(ks[8], (1, 1), jnp.float32)       # nn.Parameter(torch.rand((1,)))

    params = (emb_table, fow_table, w1, b1, w2, b2, wout, bout, bias)

    # Inputs
    feature_index = jax.random.randint(ks[9], (N, F), 0, NUM_FEATURES, dtype=jnp.int32)
    feature_value = jax.random.uniform(ks[10], (N, F), jnp.float32)
    label = jax.random.uniform(ks[11], (N, 1), jnp.float32)      # unused, as in PyTorch forward

    out = nfm_forward(feature_index, feature_value, params, block_n=128)
    out = jax.block_until_ready(out)

    ref = nfm_reference(feature_index, feature_value, params)
    assert out.shape == (N, F)
    assert jnp.allclose(out, ref, atol=1e-4, rtol=1e-4), "mismatch vs reference"

    print("KERNEL_OK")
</pallas_src>

<mosaic_0001>
module attributes {stable_mosaic.version = 11 : i64} {
  func.func @nfm_kernel(%arg0: i32, %arg1: memref<128x8xi32, #tpu.memory_space<vmem>>, %arg2: memref<128x8xf32, #tpu.memory_space<vmem>>, %arg3: memref<128x8xf32, #tpu.memory_space<vmem>>, %arg4: memref<64x32xf32, #tpu.memory_space<vmem>>, %arg5: memref<32x32xf32, #tpu.memory_space<vmem>>, %arg6: memref<1x32xf32, #tpu.memory_space<vmem>>, %arg7: memref<32x32xf32, #tpu.memory_space<vmem>>, %arg8: memref<1x32xf32, #tpu.memory_space<vmem>>, %arg9: memref<1x32xf32, #tpu.memory_space<vmem>>, %arg10: memref<1x1xf32, #tpu.memory_space<smem>>, %arg11: memref<128x8xf32, #tpu.memory_space<vmem>>) attributes {dimension_semantics = [#tpu.dimension_semantics<parallel>], iteration_bounds = array<i64: 2>, scalar_prefetch = 0 : i64, scratch_operands = 0 : i64, tpu.core_type = #tpu.core_type<tc>, window_params = [{transform_indices = @transform_0, window_bounds = array<i64: 128, 8>}, {transform_indices = @transform_1, window_bounds = array<i64: 128, 8>}, {transform_indices = @transform_2, window_bounds = array<i64: 128, 8>}, {pipeline_mode = #tpu.pipeline_mode<synchronous>, transform_indices = @transform_3, window_bounds = array<i64: 64, 32>}, {pipeline_mode = #tpu.pipeline_mode<synchronous>, transform_indices = @transform_4, window_bounds = array<i64: 32, 32>}, {pipeline_mode = #tpu.pipeline_mode<synchronous>, transform_indices = @transform_5, window_bounds = array<i64: 1, 32>}, {pipeline_mode = #tpu.pipeline_mode<synchronous>, transform_indices = @transform_6, window_bounds = array<i64: 32, 32>}, {pipeline_mode = #tpu.pipeline_mode<synchronous>, transform_indices = @transform_7, window_bounds = array<i64: 1, 32>}, {pipeline_mode = #tpu.pipeline_mode<synchronous>, transform_indices = @transform_8, window_bounds = array<i64: 1, 32>}, {transform_indices = @transform_9, window_bounds = array<i64: 1, 1>}, {transform_indices = @transform_10, window_bounds = array<i64: 128, 8>}]} {
    %c0 = arith.constant 0 : index
    %c0_0 = arith.constant 0 : index
    %0 = vector.load %arg1[%c0, %c0_0] : memref<128x8xi32, #tpu.memory_space<vmem>>, vector<128x8xi32>
    %c0_1 = arith.constant 0 : index
    %c0_2 = arith.constant 0 : index
    %1 = vector.load %arg2[%c0_1, %c0_2] : memref<128x8xf32, #tpu.memory_space<vmem>>, vector<128x8xf32>
    %c0_3 = arith.constant 0 : index
    %c0_4 = arith.constant 0 : index
    %2 = vector.load %arg4[%c0_3, %c0_4] : memref<64x32xf32, #tpu.memory_space<vmem>>, vector<64x32xf32>
    %3 = tpu.iota {dimensions = array<i32: 1>} : vector<128x64xi32>
    %cst = arith.constant 0.000000e+00 : f32
    %4 = vector.broadcast %cst : f32 to vector<128x32xf32>
    %cst_5 = arith.constant 0.000000e+00 : f32
    %5 = vector.broadcast %cst_5 : f32 to vector<128x32xf32>
    %6 = vector.extract_strided_slice %0 {offsets = [0, 0], sizes = [128, 1], strides = [1, 1]} : vector<128x8xi32> to vector<128x1xi32>
    %7 = vector.broadcast %6 : vector<128x1xi32> to vector<128x64xi32>
    %8 = arith.cmpi eq, %7, %3 : vector<128x64xi32>
    %9 = vector.extract_strided_slice %1 {offsets = [0, 0], sizes = [128, 1], strides = [1, 1]} : vector<128x8xf32> to vector<128x1xf32>
    %cst_6 = arith.constant 0.000000e+00 : f32
    %10 = vector.shape_cast %9 : vector<128x1xf32> to vector<128x1xf32>
    %11 = vector.broadcast %10 : vector<128x1xf32> to vector<128x64xf32>
    %12 = vector.broadcast %cst_6 : f32 to vector<128x64xf32>
    %13 = arith.select %8, %11, %12 : vector<128x64xi1>, vector<128x64xf32>
    %cst_7 = arith.constant dense<0.000000e+00> : vector<128x32xf32>
    %14 = tpu.matmul %13, %2, %cst_7 {dimension_numbers = #tpu.dot_dimension_numbers<[1], [0], [0], [1], [0, 0, 1, 1], [], []>} : vector<128x64xf32>, vector<64x32xf32>, vector<128x32xf32> -> vector<128x32xf32>
    %15 = arith.addf %4, %14 : vector<128x32xf32>
    %16 = arith.mulf %14, %14 : vector<128x32xf32>
    %17 = arith.addf %5, %16 : vector<128x32xf32>
    %18 = vector.extract_strided_slice %0 {offsets = [0, 1], sizes = [128, 1], strides = [1, 1]} : vector<128x8xi32> to vector<128x1xi32>
    %19 = vector.broadcast %18 : vector<128x1xi32> to vector<128x64xi32>
    %20 = arith.cmpi eq, %19, %3 : vector<128x64xi32>
    %21 = vector.extract_strided_slice %1 {offsets = [0, 1], sizes = [128, 1], strides = [1, 1]} : vector<128x8xf32> to vector<128x1xf32>
    %cst_8 = arith.constant 0.000000e+00 : f32
    %22 = vector.shape_cast %21 : vector<128x1xf32> to vector<128x1xf32>
    %23 = vector.broadcast %22 : vector<128x1xf32> to vector<128x64xf32>
    %24 = vector.broadcast %cst_8 : f32 to vector<128x64xf32>
    %25 = arith.select %20, %23, %24 : vector<128x64xi1>, vector<128x64xf32>
    %cst_9 = arith.constant dense<0.000000e+00> : vector<128x32xf32>
    %26 = tpu.matmul %25, %2, %cst_9 {dimension_numbers = #tpu.dot_dimension_numbers<[1], [0], [0], [1], [0, 0, 1, 1], [], []>} : vector<128x64xf32>, vector<64x32xf32>, vector<128x32xf32> -> vector<128x32xf32>
    %27 = arith.addf %15, %26 : vector<128x32xf32>
    %28 = arith.mulf %26, %26 : vector<128x32xf32>
    %29 = arith.addf %17, %28 : vector<128x32xf32>
    %30 = vector.extract_strided_slice %0 {offsets = [0, 2], sizes = [128, 1], strides = [1, 1]} : vector<128x8xi32> to vector<128x1xi32>
    %31 = vector.broadcast %30 : vector<128x1xi32> to vector<128x64xi32>
    %32 = arith.cmpi eq, %31, %3 : vector<128x64xi32>
    %33 = vector.extract_strided_slice %1 {offsets = [0, 2], sizes = [128, 1], strides = [1, 1]} : vector<128x8xf32> to vector<128x1xf32>
    %cst_10 = arith.constant 0.000000e+00 : f32
    %34 = vector.shape_cast %33 : vector<128x1xf32> to vector<128x1xf32>
    %35 = vector.broadcast %34 : vector<128x1xf32> to vector<128x64xf32>
    %36 = vector.broadcast %cst_10 : f32 to vector<128x64xf32>
    %37 = arith.select %32, %35, %36 : vector<128x64xi1>, vector<128x64xf32>
    %cst_11 = arith.constant dense<0.000000e+00> : vector<128x32xf32>
    %38 = tpu.matmul %37, %2, %cst_11 {dimension_numbers = #tpu.dot_dimension_numbers<[1], [0], [0], [1], [0, 0, 1, 1], [], []>} : vector<128x64xf32>, vector<64x32xf32>, vector<128x32xf32> -> vector<128x32xf32>
    %39 = arith.addf %27, %38 : vector<128x32xf32>
    %40 = arith.mulf %38, %38 : vector<128x32xf32>
    %41 = arith.addf %29, %40 : vector<128x32xf32>
    %42 = vector.extract_strided_slice %0 {offsets = [0, 3], sizes = [128, 1], strides = [1, 1]} : vector<128x8xi32> to vector<128x1xi32>
    %43 = vector.broadcast %42 : vector<128x1xi32> to vector<128x64xi32>
    %44 = arith.cmpi eq, %43, %3 : vector<128x64xi32>
    %45 = vector.extract_strided_slice %1 {offsets = [0, 3], sizes = [128, 1], strides = [1, 1]} : vector<128x8xf32> to vector<128x1xf32>
    %cst_12 = arith.constant 0.000000e+00 : f32
    %46 = vector.shape_cast %45 : vector<128x1xf32> to vector<128x1xf32>
    %47 = vector.broadcast %46 : vector<128x1xf32> to vector<128x64xf32>
    %48 = vector.broadcast %cst_12 : f32 to vector<128x64xf32>
    %49 = arith.select %44, %47, %48 : vector<128x64xi1>, vector<128x64xf32>
    %cst_13 = arith.constant dense<0.000000e+00> : vector<128x32xf32>
    %50 = tpu.matmul %49, %2, %cst_13 {dimension_numbers = #tpu.dot_dimension_numbers<[1], [0], [0], [1], [0, 0, 1, 1], [], []>} : vector<128x64xf32>, vector<64x32xf32>, vector<128x32xf32> -> vector<128x32xf32>
    %51 = arith.addf %39, %50 : vector<128x32xf32>
    %52 = arith.mulf %50, %50 : vector<128x32xf32>
    %53 = arith.addf %41, %52 : vector<128x32xf32>
    %54 = vector.extract_strided_slice %0 {offsets = [0, 4], sizes = [128, 1], strides = [1, 1]} : vector<128x8xi32> to vector<128x1xi32>
    %55 = vector.broadcast %54 : vector<128x1xi32> to vector<128x64xi32>
    %56 = arith.cmpi eq, %55, %3 : vector<128x64xi32>
    %57 = vector.extract_strided_slice %1 {offsets = [0, 4], sizes = [128, 1], strides = [1, 1]} : vector<128x8xf32> to vector<128x1xf32>
    %cst_14 = arith.constant 0.000000e+00 : f32
    %58 = vector.shape_cast %57 : vector<128x1xf32> to vector<128x1xf32>
    %59 = vector.broadcast %58 : vector<128x1xf32> to vector<128x64xf32>
    %60 = vector.broadcast %cst_14 : f32 to vector<128x64xf32>
    %61 = arith.select %56, %59, %60 : vector<128x64xi1>, vector<128x64xf32>
    %cst_15 = arith.constant dense<0.000000e+00> : vector<128x32xf32>
    %62 = tpu.matmul %61, %2, %cst_15 {dimension_numbers = #tpu.dot_dimension_numbers<[1], [0], [0], [1], [0, 0, 1, 1], [], []>} : vector<128x64xf32>, vector<64x32xf32>, vector<128x32xf32> -> vector<128x32xf32>
    %63 = arith.addf %51, %62 : vector<128x32xf32>
    %64 = arith.mulf %62, %62 : vector<128x32xf32>
    %65 = arith.addf %53, %64 : vector<128x32xf32>
    %66 = vector.extract_strided_slice %0 {offsets = [0, 5], sizes = [128, 1], strides = [1, 1]} : vector<128x8xi32> to vector<128x1xi32>
    %67 = vector.broadcast %66 : vector<128x1xi32> to vector<128x64xi32>
    %68 = arith.cmpi eq, %67, %3 : vector<128x64xi32>
    %69 = vector.extract_strided_slice %1 {offsets = [0, 5], sizes = [128, 1], strides = [1, 1]} : vector<128x8xf32> to vector<128x1xf32>
    %cst_16 = arith.constant 0.000000e+00 : f32
    %70 = vector.shape_cast %69 : vector<128x1xf32> to vector<128x1xf32>
    %71 = vector.broadcast %70 : vector<128x1xf32> to vector<128x64xf32>
    %72 = vector.broadcast %cst_16 : f32 to vector<128x64xf32>
    %73 = arith.select %68, %71, %72 : vector<128x64xi1>, vector<128x64xf32>
    %cst_17 = arith.constant dense<0.000000e+00> : vector<128x32xf32>
    %74 = tpu.matmul %73, %2, %cst_17 {dimension_numbers = #tpu.dot_dimension_numbers<[1], [0], [0], [1], [0, 0, 1, 1], [], []>} : vector<128x64xf32>, vector<64x32xf32>, vector<128x32xf32> -> vector<128x32xf32>
    %75 = arith.addf %63, %74 : vector<128x32xf32>
    %76 = arith.mulf %74, %74 : vector<128x32xf32>
    %77 = arith.addf %65, %76 : vector<128x32xf32>
    %78 = vector.extract_strided_slice %0 {offsets = [0, 6], sizes = [128, 1], strides = [1, 1]} : vector<128x8xi32> to vector<128x1xi32>
    %79 = vector.broadcast %78 : vector<128x1xi32> to vector<128x64xi32>
    %80 = arith.cmpi eq, %79, %3 : vector<128x64xi32>
    %81 = vector.extract_strided_slice %1 {offsets = [0, 6], sizes = [128, 1], strides = [1, 1]} : vector<128x8xf32> to vector<128x1xf32>
    %cst_18 = arith.constant 0.000000e+00 : f32
    %82 = vector.shape_cast %81 : vector<128x1xf32> to vector<128x1xf32>
    %83 = vector.broadcast %82 : vector<128x1xf32> to vector<128x64xf32>
    %84 = vector.broadcast %cst_18 : f32 to vector<128x64xf32>
    %85 = arith.select %80, %83, %84 : vector<128x64xi1>, vector<128x64xf32>
    %cst_19 = arith.constant dense<0.000000e+00> : vector<128x32xf32>
    %86 = tpu.matmul %85, %2, %cst_19 {dimension_numbers = #tpu.dot_dimension_numbers<[1], [0], [0], [1], [0, 0, 1, 1], [], []>} : vector<128x64xf32>, vector<64x32xf32>, vector<128x32xf32> -> vector<128x32xf32>
    %87 = arith.addf %75, %86 : vector<128x32xf32>
    %88 = arith.mulf %86, %86 : vector<128x32xf32>
    %89 = arith.addf %77, %88 : vector<128x32xf32>
    %90 = vector.extract_strided_slice %0 {offsets = [0, 7], sizes = [128, 1], strides = [1, 1]} : vector<128x8xi32> to vector<128x1xi32>
    %91 = vector.broadcast %90 : vector<128x1xi32> to vector<128x64xi32>
    %92 = arith.cmpi eq, %91, %3 : vector<128x64xi32>
    %93 = vector.extract_strided_slice %1 {offsets = [0, 7], sizes = [128, 1], strides = [1, 1]} : vector<128x8xf32> to vector<128x1xf32>
    %cst_20 = arith.constant 0.000000e+00 : f32
    %94 = vector.shape_cast %93 : vector<128x1xf32> to vector<128x1xf32>
    %95 = vector.broadcast %94 : vector<128x1xf32> to vector<128x64xf32>
    %96 = vector.broadcast %cst_20 : f32 to vector<128x64xf32>
    %97 = arith.select %92, %95, %96 : vector<128x64xi1>, vector<128x64xf32>
    %cst_21 = arith.constant dense<0.000000e+00> : vector<128x32xf32>
    %98 = tpu.matmul %97, %2, %cst_21 {dimension_numbers = #tpu.dot_dimension_numbers<[1], [0], [0], [1], [0, 0, 1, 1], [], []>} : vector<128x64xf32>, vector<64x32xf32>, vector<128x32xf32> -> vector<128x32xf32>
    %99 = arith.addf %87, %98 : vector<128x32xf32>
    %100 = arith.mulf %98, %98 : vector<128x32xf32>
    %101 = arith.addf %89, %100 : vector<128x32xf32>
    %102 = arith.mulf %99, %99 : vector<128x32xf32>
    %103 = arith.subf %102, %101 : vector<128x32xf32>
    %cst_22 = arith.constant 5.000000e-01 : f32
    %104 = vector.broadcast %cst_22 : f32 to vector<128x32xf32>
    %105 = arith.mulf %104, %103 : vector<128x32xf32>
    %c0_23 = arith.constant 0 : index
    %c0_24 = arith.constant 0 : index
    %106 = vector.load %arg3[%c0_23, %c0_24] : memref<128x8xf32, #tpu.memory_space<vmem>>, vector<128x8xf32>
    %107 = arith.mulf %106, %1 : vector<128x8xf32>
    %c0_25 = arith.constant 0 : index
    %c0_26 = arith.constant 0 : index
    %108 = vector.load %arg5[%c0_25, %c0_26] : memref<32x32xf32, #tpu.memory_space<vmem>>, vector<32x32xf32>
    %cst_27 = arith.constant dense<0.000000e+00> : vector<128x32xf32>
    %109 = tpu.matmul %105, %108, %cst_27 {dimension_numbers = #tpu.dot_dimension_numbers<[1], [0], [0], [1], [0, 0, 1, 1], [], []>} : vector<128x32xf32>, vector<32x32xf32>, vector<128x32xf32> -> vector<128x32xf32>
    %c0_28 = arith.constant 0 : index
    %c0_29 = arith.constant 0 : index
    %110 = vector.load %arg6[%c0_28, %c0_29] : memref<1x32xf32, #tpu.memory_space<vmem>>, vector<1x32xf32>
    %111 = vector.broadcast %110 : vector<1x32xf32> to vector<128x32xf32>
    %112 = arith.addf %109, %111 : vector<128x32xf32>
    %cst_30 = arith.constant 0.000000e+00 : f32
    %113 = vector.broadcast %cst_30 : f32 to vector<128x32xf32>
    %114 = arith.maximumf %112, %113 : vector<128x32xf32>
    %c0_31 = arith.constant 0 : index
    %c0_32 = arith.constant 0 : index
    %115 = vector.load %arg7[%c0_31, %c0_32] : memref<32x32xf32, #tpu.memory_space<vmem>>, vector<32x32xf32>
    %cst_33 = arith.constant dense<0.000000e+00> : vector<128x32xf32>
    %116 = tpu.matmul %114, %115, %cst_33 {dimension_numbers = #tpu.dot_dimension_numbers<[1], [0], [0], [1], [0, 0, 1, 1], [], []>} : vector<128x32xf32>, vector<32x32xf32>, vector<128x32xf32> -> vector<128x32xf32>
    %c0_34 = arith.constant 0 : index
    %c0_35 = arith.constant 0 : index
    %117 = vector.load %arg8[%c0_34, %c0_35] : memref<1x32xf32, #tpu.memory_space<vmem>>, vector<1x32xf32>
    %118 = vector.broadcast %117 : vector<1x32xf32> to vector<128x32xf32>
    %119 = arith.addf %116, %118 : vector<128x32xf32>
    %cst_36 = arith.constant 0.000000e+00 : f32
    %120 = vector.broadcast %cst_36 : f32 to vector<128x32xf32>
    %121 = arith.maximumf %119, %120 : vector<128x32xf32>
    %c0_37 = arith.constant 0 : index
    %c0_38 = arith.constant 0 : index
    %122 = vector.load %arg9[%c0_37, %c0_38] : memref<1x32xf32, #tpu.memory_space<vmem>>, vector<1x32xf32>
    %123 = vector.broadcast %122 : vector<1x32xf32> to vector<128x32xf32>
    %124 = arith.mulf %121, %123 : vector<128x32xf32>
    %cst_39 = arith.constant dense<0.000000e+00> : vector<128xf32>
    %125 = vector.multi_reduction <add>, %124, %cst_39 [1] : vector<128x32xf32> to vector<128xf32>
    %126 = vector.shape_cast %125 : vector<128xf32> to vector<128x1xf32>
    %127 = vector.broadcast %126 : vector<128x1xf32> to vector<128x8xf32>
    %128 = arith.addf %107, %127 : vector<128x8xf32>
    %c0_40 = arith.constant 0 : index
    %c0_41 = arith.constant 0 : index
    %129 = memref.load %arg10[%c0_40, %c0_41] : memref<1x1xf32, #tpu.memory_space<smem>>
    %130 = vector.broadcast %129 : f32 to vector<128x8xf32>
    %131 = arith.addf %128, %130 : vector<128x8xf32>
    %c0_42 = arith.constant 0 : index
    %c0_43 = arith.constant 0 : index
    %132 = vector.load %arg11[%c0_42, %c0_43] : memref<128x8xf32, #tpu.memory_space<vmem>>, vector<128x8xf32>
    tpu.vector_store %arg11[%c0_42, %c0_43], %131 {strides = array<i32>} : memref<128x8xf32, #tpu.memory_space<vmem>>, vector<128x8xf32>,
    return
  }
  func.func @transform_0(%arg0: i32) -> (i32, i32) {
    %c0_i32 = arith.constant 0 : i32
    %c0_i32_0 = arith.constant 0 : i32
    return %arg0, %c0_i32 : i32, i32
  }
  func.func @transform_1(%arg0: i32) -> (i32, i32) {
    %c0_i32 = arith.constant 0 : i32
    %c0_i32_0 = arith.constant 0 : i32
    return %arg0, %c0_i32 : i32, i32
  }
  func.func @transform_2(%arg0: i32) -> (i32, i32) {
    %c0_i32 = arith.constant 0 : i32
    %c0_i32_0 = arith.constant 0 : i32
    return %arg0, %c0_i32 : i32, i32
  }
  func.func @transform_3(%arg0: i32) -> (i32, i32) {
    %c0_i32 = arith.constant 0 : i32
    %c0_i32_0 = arith.constant 0 : i32
    %c0_i32_1 = arith.constant 0 : i32
    return %c0_i32, %c0_i32_0 : i32, i32
  }
  func.func @transform_4(%arg0: i32) -> (i32, i32) {
    %c0_i32 = arith.constant 0 : i32
    %c0_i32_0 = arith.constant 0 : i32
    %c0_i32_1 = arith.constant 0 : i32
    return %c0_i32, %c0_i32_0 : i32, i32
  }
  func.func @transform_5(%arg0: i32) -> (i32, i32) {
    %c0_i32 = arith.constant 0 : i32
    %c0_i32_0 = arith.constant 0 : i32
    %c0_i32_1 = arith.constant 0 : i32
    return %c0_i32, %c0_i32_0 : i32, i32
  }
  func.func @transform_6(%arg0: i32) -> (i32, i32) {
    %c0_i32 = arith.constant 0 : i32
    %c0_i32_0 = arith.constant 0 : i32
    %c0_i32_1 = arith.constant 0 : i32
    return %c0_i32, %c0_i32_0 : i32, i32
  }
  func.func @transform_7(%arg0: i32) -> (i32, i32) {
    %c0_i32 = arith.constant 0 : i32
    %c0_i32_0 = arith.constant 0 : i32
    %c0_i32_1 = arith.constant 0 : i32
    return %c0_i32, %c0_i32_0 : i32, i32
  }
  func.func @transform_8(%arg0: i32) -> (i32, i32) {
    %c0_i32 = arith.constant 0 : i32
    %c0_i32_0 = arith.constant 0 : i32
    %c0_i32_1 = arith.constant 0 : i32
    return %c0_i32, %c0_i32_0 : i32, i32
  }
  func.func @transform_9(%arg0: i32) -> (i32, i32) {
    %c0_i32 = arith.constant 0 : i32
    %c0_i32_0 = arith.constant 0 : i32
    %c0_i32_1 = arith.constant 0 : i32
    return %c0_i32, %c0_i32_0 : i32, i32
  }
  func.func @transform_10(%arg0: i32) -> (i32, i32) {
    %c0_i32 = arith.constant 0 : i32
    %c0_i32_0 = arith.constant 0 : i32
    return %arg0, %c0_i32 : i32, i32
  }
}

</mosaic_0001>

<bundles_post_ra>
// kernel: tpu_custom_call.1
= control target key start
LH: loop header
LB: loop body
LE: loop exit
PB: predicated region body
PF: predicated region fallthrough
CT: control target
= control target key end

     0   :  { %s3886_s15 = smov 0   ;;  %s5810_s0 = inlined_call_operand.vmem [shape: s32[256,8], index: 0, kind: input, shape index: {}]   ;;  %s5811_s1 = inlined_call_operand.vmem [shape: f32[256,8], index: 1, kind: input, shape index: {}]   ;;  %s5812_s2 = inlined_call_operand.vmem [shape: f32[256,8], index: 2, kind: input, shape index: {}]   ;;  %s5813_s3 = inlined_call_operand.vmem [shape: f32[64,32], index: 3, kind: input, shape index: {}]   ;;  %s5814_s4 = inlined_call_operand.vmem [shape: f32[32,32], index: 4, kind: input, shape index: {}]   ;;  %s5815_s5 = inlined_call_operand.vmem [shape: f32[1,32], index: 5, kind: input, shape index: {}]   ;;  %s5816_s6 = inlined_call_operand.vmem [shape: f32[32,32], index: 6, kind: input, shape index: {}]   ;;  %s5817_s7 = inlined_call_operand.vmem [shape: f32[1,32], index: 7, kind: input, shape index: {}]   ;;  %s5818_s8 = inlined_call_operand.vmem [shape: f32[1,32], index: 8, kind: input, shape index: {}]   ;;  %s5819_s9 = inlined_call_operand.<no memory space> [shape: f32[1,1], index: 9, kind: input, shape index: {}]   ;;  %s5820_s10 = inlined_call_operand.vmem [shape: f32[256,8], index: 10, kind: output, shape index: {}]  }
   0x1   :  { %15 = sst [smem:[#allocation2]] %s5819_s9 }
   0x2 LB: > { %s3461_s16 = sadd.s32 4294967295, %s3818_s15   ;;  %p3465_p0 = scmp.ge.s32.totalorder %s3818_s15, 1  ;;  %s3818_s15 = sphi %s3886_s15, %s21_s15  }
   0x3   : > { %p336_p1 = scmp.lt.s32.totalorder %s3818_s15, 3 }
   0x5   : > { %p337_p2 = pnand %p3465_p0, %p336_p1 }
   0x7   : > { %340 = sbr.rel (%p337_p2) target bundleno = 1418 (0x58a), region = 60 }
   0xc   : > { %s3466_s17 = sshll.u32 %s3461_s16, 4  ;;  %v3820_v0 = vmov 0   ;;  %v3821_v33 = vmov 1   ;;  %v4055_v37 = vld [vmem:[%s5813_s3 + $0x38] sm:$0xff]  ;;  %v4060_v38 = vld [vmem:[%s5813_s3 + $0x30] sm:$0xff]  ;;  %v4067_v39 = vld [vmem:[%s5813_s3 + $0x28] sm:$0xff]  ;;  %v448_v57 = vlaneseq }
   0xd   : > { %3670 = vset.pattern.permute.xlu2 %v3820_v0  ;;  %3669 = vset.pattern.permute.xlu1 %v3820_v0  ;;  %p385_p3 = scmp.lt.s32.totalorder %s3466_s17, 31  ;;  %v4088_v43 = vld [vmem:[%s5813_s3 + $0x20] sm:$0xff]  ;;  %v4096_v44 = vld [vmem:[%s5813_s3 + $0x18] sm:$0xff]  ;;  %v4102_v45 = vld [vmem:[%s5813_s3 + $0x10] sm:$0xff]  ;;  %vm610_vm1 = vcmask 523264   ;;  %s3346_s30 = sld [smem:[#allocation2]] }
   0xe   : > { %3668 = vset.pattern.permute.xlu0 %v3820_v0  ;;  %667 = vmatpush.msra.mxu0 %v4055_v37  ;;  %v4114_v46 = vld [vmem:[%s5813_s3 + $0x8] sm:$0xff]  ;;  %v4131_v50 = vld [vmem:[%s5813_s3] sm:$0xff]  ;;  %v4200_v61 = vand.u32 127, %v448_v57 }
   0xf   : > { %s5927_s17 = smov (!%p385_p3, %s3466_s17), 31  ;;  %3636 = vmatpush.msra.mxu2 %v4055_v37  ;;  %972 = vmatpush.msra.mxu1 %v4055_v37 }
  0x10   : > { %s3894_s9 = sshll.u32 %s5927_s17, 3  ;;  %3644 = vmatpush.msra.mxu3 %v4055_v37  ;;  %668 = vmatpush.msra.mxu0 %v4060_v38 }
  0x11   : > { %s3900_s20 = scalar_lea.vmem %s5810_s0, %s3894_s9  ;;  %s3966_s23 = scalar_lea.vmem %s5811_s1, %s3894_s9  ;;  %3637 = vmatpush.msra.mxu2 %v4060_v38  ;;  %973 = vmatpush.msra.mxu1 %v4060_v38 }
  0x12   : > { %v3903_v1 = vld [vmem:[%s3900_s20 + $0x20] sm:$0xff]  ;;  %v3906_v2 = vld [vmem:[%s3900_s20 + $0x10] sm:$0xff]  ;;  %v3915_v4 = vld [vmem:[%s3900_s20 + $0x28] sm:$0xff]  ;;  %3645 = vmatpush.msra.mxu3 %v4060_v38  ;;  %669 = vmatpush.msra.mxu0 %v4067_v39  ;;  %s5690_s29 = scalar_lea.vmem %s5812_s2, %s3894_s9  ;;  %s5704_s12 = scalar_lea.vmem %s5820_s10, %s3894_s9 }
  0x13   : > { %v3909_v3 = vld [vmem:[%s3900_s20] sm:$0xff]  ;;  %463 = vperm.xlu2 %3670, %v3903_v1   ;;  %457 = vperm.xlu1 %3669, %v3906_v2   ;;  %v3918_v5 = vld [vmem:[%s3900_s20 + $0x18] sm:$0xff]  ;;  %v3921_v6 = vld [vmem:[%s3900_s20 + $0x8] sm:$0xff] }
  0x14   : > { %5857 = vst [vmem:[#allocation3_spill] sm:$0xff] %v3909_v3  ;;  %451 = vperm.xlu0 %3668, %v3909_v3   ;;  %v3927_v7 = vld [vmem:[%s3900_s20 + $0x40] sm:$0xff]  ;;  %v3930_v8 = vld [vmem:[%s3900_s20 + $0x38] sm:$0xff]  ;;  %v3933_v9 = vld [vmem:[%s3900_s20 + $0x30] sm:$0xff]  ;;  %3638 = vmatpush.msra.mxu2 %v4067_v39 }
  0x15   : > { %v3939_v10 = vld [vmem:[%s3900_s20 + $0x58] sm:$0xff]  ;;  %v3942_v11 = vld [vmem:[%s3900_s20 + $0x50] sm:$0xff]  ;;  %v3945_v12 = vld [vmem:[%s3900_s20 + $0x48] sm:$0xff]  ;;  %974 = vmatpush.msra.mxu1 %v4067_v39  ;;  %670 = vmatpush.msra.mxu0 %v4088_v43 }
  0x16   : > { %v3951_v13 = vld [vmem:[%s3900_s20 + $0x70] sm:$0xff]  ;;  %v3954_v14 = vld [vmem:[%s3900_s20 + $0x68] sm:$0xff]  ;;  %v3957_v15 = vld [vmem:[%s3900_s20 + $0x60] sm:$0xff]  ;;  %3646 = vmatpush.msra.mxu3 %v4067_v39  ;;  %3639 = vmatpush.msra.mxu2 %v4088_v43 }
  0x17   : > { %v3969_v16 = vld [vmem:[%s3966_s23 + $0x8] sm:$0xff]  ;;  %v3972_v17 = vld [vmem:[%s3966_s23] sm:$0xff]  ;;  %v3975_v18 = vld [vmem:[%s3900_s20 + $0x78] sm:$0xff]  ;;  %975 = vmatpush.msra.mxu1 %v4088_v43  ;;  %671 = vmatpush.msra.mxu0 %v4096_v44 }
  0x18   : > { %v3981_v19 = vld [vmem:[%s3966_s23 + $0x20] sm:$0xff]  ;;  %v3984_v20 = vld [vmem:[%s3966_s23 + $0x18] sm:$0xff]  ;;  %v3987_v21 = vld [vmem:[%s3966_s23 + $0x10] sm:$0xff]  ;;  %3647 = vmatpush.msra.mxu3 %v4088_v43  ;;  %3640 = vmatpush.msra.mxu2 %v4096_v44 }
  0x19   : > { %v3993_v22 = vld [vmem:[%s3966_s23 + $0x38] sm:$0xff]  ;;  %v3996_v23 = vld [vmem:[%s3966_s23 + $0x30] sm:$0xff]  ;;  %v3999_v24 = vld [vmem:[%s3966_s23 + $0x28] sm:$0xff]  ;;  %976 = vmatpush.msra.mxu1 %v4096_v44  ;;  %672 = vmatpush.msra.mxu0 %v4102_v45 }
  0x1a   : > { %v4005_v25 = vld [vmem:[%s3966_s23 + $0x50] sm:$0xff]  ;;  %v4008_v26 = vld [vmem:[%s3966_s23 + $0x48] sm:$0xff]  ;;  %v4011_v27 = vld [vmem:[%s3966_s23 + $0x40] sm:$0xff]  ;;  %3648 = vmatpush.msra.mxu3 %v4096_v44  ;;  %3641 = vmatpush.msra.mxu2 %v4102_v45 }
  0x1b   : > { %466 = vperm.xlu2 %3670, %v3915_v4   ;;  %460 = vperm.xlu1 %3669, %v3918_v5   ;;  %5858 = vst [vmem:[#allocation4_spill] sm:$0xff] %v4005_v25  ;;  %v4017_v28 = vld [vmem:[%s3966_s23 + $0x68] sm:$0xff]  ;;  %v4020_v29 = vld [vmem:[%s3966_s23 + $0x60] sm:$0xff]  ;;  %v4023_v30 = vld [vmem:[%s3966_s23 + $0x58] sm:$0xff] }
  0x1c   : > { %454 = vperm.xlu0 %3668, %v3921_v6   ;;  %5859 = vst [vmem:[#allocation5_spill] sm:$0xff] %v4008_v26  ;;  %v4029_v31 = vld [vmem:[%s3966_s23 + $0x78] sm:$0xff]  ;;  %v4032_v32 = vld [vmem:[%s3966_s23 + $0x70] sm:$0xff]  ;;  %673 = vmatpush.msra.mxu0 %v4114_v46 }
  0x1d   : > { %5860 = vst [vmem:[#allocation6_spill] sm:$0xff] %v4017_v28  ;;  %3642 = vmatpush.msra.mxu2 %v4114_v46  ;;  %977 = vmatpush.msra.mxu1 %v4102_v45 }
  0x1e   : > { %5861 = vst [vmem:[#allocation7_spill] sm:$0xff] %v4020_v29  ;;  %3649 = vmatpush.msra.mxu3 %v4102_v45  ;;  %674 = vmatpush.msra.mxu0 %v4131_v50 }
  0x1f   : > { %5862 = vst [vmem:[#allocation8_spill] sm:$0xff] %v4032_v32  ;;  %3643 = vmatpush.msra.mxu2 %v4131_v50  ;;  %978 = vmatpush.msra.mxu1 %v4114_v46 }
  0x20   : > { %3650 = vmatpush.msra.mxu3 %v4114_v46  ;;  %1887 = vmatpush.msrb.mxu0 %v4055_v37 }
  0x21   : > { %1277 = vmatpush.msrb.mxu2 %v4055_v37  ;;  %979 = vmatpush.msra.mxu1 %v4131_v50 }
  0x22   : > { %3651 = vmatpush.msra.mxu3 %v4131_v50  ;;  %1888 = vmatpush.msrb.mxu0 %v4060_v38 }
  0x23   : > { %475 = vperm.xlu2 %3670, %v3927_v7   ;;  %472 = vperm.xlu1 %3669, %v3930_v8  }
  0x24   : > { %469 = vperm.xlu0 %3668, %v3933_v9   ;;  %1278 = vmatpush.msrb.mxu2 %v4060_v38 }
  0x25   : > { %1582 = vmatpush.msrb.mxu3 %v4055_v37  ;;  %2192 = vmatpush.msrb.mxu1 %v4055_v37 }
  0x26   : > { %1279 = vmatpush.msrb.mxu2 %v4067_v39  ;;  %1889 = vmatpush.msrb.mxu0 %v4067_v39 }
  0x27   : > { %1583 = vmatpush.msrb.mxu3 %v4060_v38  ;;  %2193 = vmatpush.msrb.mxu1 %v4060_v38 }
  0x28   : > { %1280 = vmatpush.msrb.mxu2 %v4088_v43  ;;  %1890 = vmatpush.msrb.mxu0 %v4088_v43 }
  0x29   : > { %1584 = vmatpush.msrb.mxu3 %v4067_v39  ;;  %2194 = vmatpush.msrb.mxu1 %v4067_v39 }
  0x2a   : > { %1281 = vmatpush.msrb.mxu2 %v4096_v44  ;;  %1891 = vmatpush.msrb.mxu0 %v4096_v44 }
  0x2b   : > { %484 = vperm.xlu2 %3670, %v3939_v10   ;;  %481 = vperm.xlu1 %3669, %v3942_v11  }
  0x2c   : > { %478 = vperm.xlu0 %3668, %v3945_v12   ;;  %1282 = vmatpush.msrb.mxu2 %v4102_v45 }
  0x2d   : > { %1585 = vmatpush.msrb.mxu3 %v4088_v43  ;;  %2195 = vmatpush.msrb.mxu1 %v4088_v43 }
  0x2e   : > { %1283 = vmatpush.msrb.mxu2 %v4114_v46  ;;  %1892 = vmatpush.msrb.mxu0 %v4102_v45 }
  0x2f   : > { %1586 = vmatpush.msrb.mxu3 %v4096_v44  ;;  %2196 = vmatpush.msrb.mxu1 %v4096_v44 }
  0x30   : > { %1284 = vmatpush.msrb.mxu2 %v4131_v50  ;;  %1893 = vmatpush.msrb.mxu0 %v4114_v46 }
  0x31   : > { %1587 = vmatpush.msrb.mxu3 %v4102_v45  ;;  %2197 = vmatpush.msrb.mxu1 %v4102_v45 }
  0x32   : > { %1894 = vmatpush.msrb.mxu0 %v4131_v50 }
  0x33   : > { %493 = vperm.xlu2 %3670, %v3951_v13   ;;  %490 = vperm.xlu1 %3669, %v3954_v14  }
  0x34   : > { %487 = vperm.xlu0 %3668, %v3957_v15   ;;  %1588 = vmatpush.msrb.mxu3 %v4114_v46 }
  0x35   : > { %2198 = vmatpush.msrb.mxu1 %v4114_v46 }
  0x36   : > { %1589 = vmatpush.msrb.mxu3 %v4131_v50 }
  0x37   : > { %2199 = vmatpush.msrb.mxu1 %v4131_v50 }
  0x3b   : > { %521 = vperm.xlu2 %3670, %v3969_v16   ;;  %516 = vperm.xlu1 %3669, %v3972_v17  }
  0x3c   : > { %496 = vperm.xlu0 %3668, %v3975_v18  }
  0x43   : > { %536 = vperm.xlu2 %3670, %v3981_v19   ;;  %531 = vperm.xlu1 %3669, %v3984_v20  }
  0x44   : > { %526 = vperm.xlu0 %3668, %v3987_v21  }
  0x4b   : > { %551 = vperm.xlu2 %3670, %v3993_v22   ;;  %546 = vperm.xlu1 %3669, %v3996_v23  }
  0x4c   : > { %541 = vperm.xlu0 %3668, %v3999_v24  }
  0x53   : > { %566 = vperm.xlu2 %3670, %v4005_v25   ;;  %561 = vperm.xlu1 %3669, %v4008_v26  }
  0x54   : > { %556 = vperm.xlu0 %3668, %v4011_v27  }
  0x5b   : > { %581 = vperm.xlu2 %3670, %v4017_v28   ;;  %576 = vperm.xlu1 %3669, %v4020_v29  }
  0x5c   : > { %571 = vperm.xlu0 %3668, %v4023_v30  }
  0x63   : > { %3671 = vset.pattern.permute.xlu2 %v3821_v33  ;;  %591 = vperm.xlu1 %3669, %v4029_v31  }
  0x64   : > { %586 = vperm.xlu0 %3668, %v4032_v32   ;;  %773 = vperm.xlu2 %3671, %v3909_v3  }
  0x6b   : > { %3673 = vset.pattern.permute.xlu1 %v3821_v33 }
  0x6c   : > { %3672 = vset.pattern.permute.xlu0 %v3821_v33  ;;  %779 = vperm.xlu1 %3673, %v3906_v2  }
  0x6d   : > { %782 = vperm.xlu2 %3671, %v3918_v5   ;;  %776 = vperm.xlu0 %3672, %v3921_v6   ;;  %v4040_v34 = vpop.permute.xlu2 %463 }
  0x6e   : > { %vm502_vm7 = vcmp.eq.s32.totalorder %v4040_v34, %v4200_v61 }
  0x74   : > { %785 = vperm.xlu1 %3673, %v3903_v1  }
  0x75   : > { %788 = vperm.xlu2 %3671, %v3915_v4   ;;  %791 = vperm.xlu0 %3672, %v3933_v9   ;;  %v4045_v35 = vpop.permute.xlu2 %466 }
  0x76   : > { %vm503_vm8 = vcmp.eq.s32.totalorder %v4045_v35, %v4200_v61 }
  0x7c   : > { %794 = vperm.xlu1 %3673, %v3930_v8  }
  0x7d   : > { %797 = vperm.xlu2 %3671, %v3927_v7   ;;  %800 = vperm.xlu0 %3672, %v3945_v12   ;;  %v4050_v36 = vpop.permute.xlu2 %475 }
  0x7e   : > { %vm506_vm5 = vcmp.eq.s32.totalorder %v4050_v36, %v4200_v61 }
  0x84   : > { %803 = vperm.xlu1 %3673, %v3942_v11  }
  0x85   : > { %806 = vperm.xlu2 %3671, %v3939_v10   ;;  %809 = vperm.xlu0 %3672, %v3957_v15   ;;  %v4079_v40 = vpop.permute.xlu2 %484  ;;  %v4081_v41 = vpop.permute.xlu1 %457 }
  0x86   : > { %v4083_v42 = vpop.permute.xlu0 %451  ;;  %vm500_vm3 = vcmp.eq.s32.totalorder %v4081_v41, %v4200_v61  ;;  %vm509_vm11 = vcmp.eq.s32.totalorder %v4079_v40, %v4200_v61 }
  0x87   : > { %vm498_vm0 = vcmp.eq.s32.totalorder %v4083_v42, %v4200_v61 }
  0x8c   : > { %812 = vperm.xlu1 %3673, %v3954_v14  }
  0x8d   : > { %815 = vperm.xlu2 %3671, %v3951_v13   ;;  %818 = vperm.xlu0 %3672, %v3975_v18   ;;  %v4121_v47 = vpop.permute.xlu2 %493  ;;  %v4123_v48 = vpop.permute.xlu1 %460 }
  0x8e   : > { %v4125_v49 = vpop.permute.xlu0 %454  ;;  %vm501_vm4 = vcmp.eq.s32.totalorder %v4123_v48, %v4200_v61  ;;  %vm512_vm15 = vcmp.eq.s32.totalorder %v4121_v47, %v4200_v61 }
  0x8f   : > { %vm499_vm2 = vcmp.eq.s32.totalorder %v4125_v49, %v4200_v61  ;;  %v3822_v49 = vmov 2  }
  0x94   : > { %837 = vperm.xlu1 %3673, %v3972_v17  }
  0x95   : > { %841 = vperm.xlu2 %3671, %v3969_v16   ;;  %845 = vperm.xlu0 %3672, %v3987_v21   ;;  %v4148_v51 = vpop.permute.xlu2 %521  ;;  %v4150_v52 = vpop.permute.xlu1 %472 }
  0x96   : > { %v4152_v53 = vpop.permute.xlu0 %469  ;;  %vm505_vm13 = vcmp.eq.s32.totalorder %v4150_v52, %v4200_v61 }
  0x97   : > { %vm504_vm10 = vcmp.eq.s32.totalorder %v4152_v53, %v4200_v61 }
  0x9c   : > { %849 = vperm.xlu1 %3673, %v3984_v20  }
  0x9d   : > { %853 = vperm.xlu2 %3671, %v3981_v19   ;;  %857 = vperm.xlu0 %3672, %v3999_v24   ;;  %v4170_v54 = vpop.permute.xlu2 %536  ;;  %v4172_v55 = vpop.permute.xlu1 %481 }
  0x9e   : > { %v4174_v56 = vpop.permute.xlu0 %478  ;;  %v598_v48 = vsel %vm502_vm7, %v4170_v54, 0.0  ;;  %vm508_vm9 = vcmp.eq.s32.totalorder %v4172_v55, %v4200_v61 }
  0x9f   : > { %vm507_vm6 = vcmp.eq.s32.totalorder %v4174_v56, %v4200_v61 }
  0xa4   : > { %861 = vperm.xlu1 %3673, %v3996_v23  }
  0xa5   : > { %865 = vperm.xlu2 %3671, %v3993_v22   ;;  %869 = vperm.xlu0 %3672, %v4011_v27   ;;  %v4191_v58 = vpop.permute.xlu2 %551  ;;  %v4193_v59 = vpop.permute.xlu1 %490 }
  0xa6   : > { %v4195_v60 = vpop.permute.xlu0 %487  ;;  %v601_v53 = vsel %vm505_vm13, %v4191_v58, 0.0  ;;  %vm511_vm14 = vcmp.eq.s32.totalorder %v4193_v59, %v4200_v61 }
  0xa7   : > { %vm510_vm12 = vcmp.eq.s32.totalorder %v4195_v60, %v4200_v61 }
  0xac   : > { %873 = vperm.xlu1 %3673, %v4008_v26   ;;  %v595_v26 = vsel %vm499_vm2, %v4148_v51, 0.0 }
  0xad   : > { %877 = vperm.xlu2 %3671, %v4005_v25   ;;  %881 = vperm.xlu0 %3672, %v4023_v30   ;;  %v4208_v62 = vpop.permute.xlu2 %566  ;;  %v517_v63 = vpop.permute.xlu1 %516 }
  0xae   : > { %v4210_v0 = vpop.permute.xlu0 %496  ;;  %v594_v33 = vsel %vm498_vm0, %v517_v63, 0.0  ;;  %v604_v35 = vsel %vm508_vm9, %v4208_v62, 0.0 }
  0xaf   : > { %3474 = vmatmul.msk.f32.vlgmr.msra.gmra.mxu0 %vm610_vm1, %v594_v33  ;;  %vm513_vm0 = vcmp.eq.s32.totalorder %v4210_v0, %v4200_v61  ;;  %v5864_v0 = vld [vmem:[#allocation4_spill] sm:$0xff] }
  0xb4   : > { %885 = vperm.xlu1 %3673, %v4020_v29  }
  0xb5   : > { %889 = vperm.xlu2 %3671, %v4017_v28   ;;  %893 = vperm.xlu0 %3672, %v4032_v32   ;;  %v4218_v42 = vpop.permute.xlu2 %581  ;;  %v532_v57 = vpop.permute.xlu1 %531 }
  0xb6   : > { %v527_v25 = vpop.permute.xlu0 %526  ;;  %v597_v51 = vsel %vm501_vm4, %v532_v57, 0.0 }
  0xb7   : > { %3475 = vmatmul.msk.f32.gmra.mxu0 %vm610_vm1, %v595_v26  ;;  %v596_v29 = vsel %vm500_vm3, %v527_v25, 0.0 }
  0xbc   : > { %897 = vperm.xlu1 %3673, %v4029_v31  }
  0xbd   : > { %3674 = vset.pattern.permute.xlu2 %v3822_v49  ;;  %3675 = vset.pattern.permute.xlu0 %v3822_v49  ;;  %v547_v63 = vpop.permute.xlu1 %546 }
  0xbe   : > { %1078 = vperm.xlu2 %3674, %v3909_v3   ;;  %1081 = vperm.xlu0 %3675, %v3921_v6   ;;  %v542_v33 = vpop.permute.xlu0 %541  ;;  %v4227_v28 = vpop.permute.xlu2 %773 }
  0xbf   : > { %3476 = vmatmul.msk.f32.gmra.mxu0 %vm610_vm1, %v596_v29  ;;  %vm820_vm2 = vcmp.eq.s32.totalorder %v4227_v28, %v4200_v61 }
  0xc4   : > { %3676 = vset.pattern.permute.xlu1 %v3822_v49  ;;  %v599_v49 = vsel %vm503_vm8, %v542_v33, 0.0  ;;  %v600_v33 = vsel %vm504_vm10, %v547_v63, 0.0 }
  0xc5   : > { %1084 = vperm.xlu1 %3676, %v3906_v2   ;;  %v562_v26 = vpop.permute.xlu1 %561 }
  0xc6   : > { %1087 = vperm.xlu2 %3674, %v3918_v5   ;;  %1096 = vperm.xlu0 %3675, %v3933_v9   ;;  %v557_v41 = vpop.permute.xlu0 %556  ;;  %v603_v56 = vsel %vm507_vm6, %v562_v26, 0.0 }
  0xc7   : > { %v4237_v3 = vpop.permute.xlu2 %782  ;;  %3477 = vmatmul.msk.f32.gmra.mxu0 %vm610_vm1, %v597_v51  ;;  %v602_v25 = vsel %vm506_vm5, %v557_v41, 0.0 }
  0xc8   : > { %3482 = vmatmul.msk.f32.vlgmr.msra.gmra.mxu2 %vm610_vm1, %v602_v25  ;;  %vm823_vm7 = vcmp.eq.s32.totalorder %v4237_v3, %v4200_v61 }
  0xc9   : > { %2497 = vmatpush.msra.mxu2 %v4055_v37 }
  0xcb   : > { %2498 = vmatpush.msra.mxu2 %v4060_v38 }
  0xcd   : > { %1090 = vperm.xlu1 %3676, %v3903_v1   ;;  %v577_v29 = vpop.permute.xlu1 %576  ;;  %2499 = vmatpush.msra.mxu2 %v4067_v39 }
  0xce   : > { %1093 = vperm.xlu2 %3674, %v3915_v4   ;;  %1105 = vperm.xlu0 %3675, %v3945_v12   ;;  %v572_v36 = vpop.permute.xlu0 %571  ;;  %v606_v60 = vsel %vm510_vm12, %v577_v29, 0.0 }
  0xcf   : > { %v4252_v57 = vpop.permute.xlu2 %788  ;;  %3478 = vmatmul.msk.f32.gmra.mxu0 %vm610_vm1, %v598_v48  ;;  %2500 = vmatpush.msra.mxu2 %v4088_v43  ;;  %v605_v51 = vsel %vm509_vm11, %v572_v36, 0.0  ;;  %v607_v48 = vsel %vm511_vm14, %v4218_v42, 0.0 }
  0xd0   : > { %3483 = vmatmul.msk.f32.gmra.mxu2 %vm610_vm1, %v603_v56  ;;  %vm825_vm10 = vcmp.eq.s32.totalorder %v4252_v57, %v4200_v61 }
  0xd1   : > { %2501 = vmatpush.msra.mxu2 %v4096_v44 }
  0xd3   : > { %2502 = vmatpush.msra.mxu2 %v4102_v45 }
  0xd5   : > { %1099 = vperm.xlu1 %3676, %v3930_v8   ;;  %v592_v34 = vpop.permute.xlu1 %591  ;;  %2503 = vmatpush.msra.mxu2 %v4114_v46 }
  0xd6   : > { %1102 = vperm.xlu2 %3674, %v3927_v7   ;;  %1114 = vperm.xlu0 %3675, %v3957_v15   ;;  %v587_v54 = vpop.permute.xlu0 %586 }
  0xd7   : > { %v4267_v26 = vpop.permute.xlu2 %797  ;;  %3479 = vmatmul.msk.f32.gmra.mxu0 %vm610_vm1, %v599_v49  ;;  %2504 = vmatpush.msra.mxu2 %v4131_v50  ;;  %v608_v49 = vsel %vm512_vm15, %v587_v54, 0.0  ;;  %v5863_v54 = vld [vmem:[#allocation5_spill] sm:$0xff] }
  0xd8   : > { %3484 = vmatmul.msk.f32.gmra.mxu2 %vm610_vm1, %v604_v35  ;;  %vm828_vm5 = vcmp.eq.s32.totalorder %v4267_v26, %v4200_v61 }
  0xdd   : > { %1108 = vperm.xlu1 %3676, %v3942_v11  }
  0xde   : > { %1111 = vperm.xlu2 %3674, %v3939_v10   ;;  %1123 = vperm.xlu0 %3675, %v3975_v18   ;;  %v4280_v55 = vpop.permute.xlu1 %779 }
  0xdf   : > { %v4282_v62 = vpop.permute.xlu2 %806  ;;  %v777_v41 = vpop.permute.xlu0 %776  ;;  %3480 = vmatmul.msk.f32.gmra.mxu0 %vm610_vm1, %v600_v33  ;;  %v609_v33 = vsel %vm513_vm0, %v592_v34, 0.0  ;;  %v5865_v34 = vld [vmem:[#allocation7_spill] sm:$0xff]  ;;  %vm822_vm4 = vcmp.eq.s32.totalorder %v4280_v55, %v4200_v61 }
  0xe0   : > { %3485 = vmatmul.msk.f32.gmra.mxu2 %vm610_vm1, %v605_v51  ;;  %vm821_vm3 = vcmp.eq.s32.totalorder %v777_v41, %v4200_v61  ;;  %vm831_vm11 = vcmp.eq.s32.totalorder %v4282_v62, %v4200_v61 }
  0xe5   : > { %1117 = vperm.xlu1 %3676, %v3954_v14  }
  0xe6   : > { %1120 = vperm.xlu2 %3674, %v3951_v13   ;;  %1150 = vperm.xlu0 %3675, %v3987_v21   ;;  %v4293_v40 = vpop.permute.xlu1 %785 }
  0xe7   : > { %v4296_v63 = vpop.permute.xlu2 %815  ;;  %v4298_v25 = vpop.permute.xlu0 %791  ;;  %3481 = vmatmul.msk.f32.gmra.mxu0 %vm610_vm1, %v601_v53  ;;  %vm824_vm8 = vcmp.eq.s32.totalorder %v4293_v40, %v4200_v61 }
  0xe8   : > { %3486 = vmatmul.msk.f32.gmra.mxu2 %vm610_vm1, %v606_v60  ;;  %vm826_vm12 = vcmp.eq.s32.totalorder %v4298_v25, %v4200_v61  ;;  %vm834_vm0 = vcmp.eq.s32.totalorder %v4296_v63, %v4200_v61 }
  0xed   : > { %1142 = vperm.xlu1 %3676, %v3972_v17  }
  0xee   : > { %1146 = vperm.xlu2 %3674, %v3969_v16   ;;  %1162 = vperm.xlu0 %3675, %v3999_v24   ;;  %v4307_v52 = vpop.permute.xlu1 %794 }
  0xef   : > { %v842_v58 = vpop.permute.xlu2 %841  ;;  %v4309_v36 = vpop.permute.xlu0 %800  ;;  %vm827_vm14 = vcmp.eq.s32.totalorder %v4307_v52, %v4200_v61 }
  0xf0   : > { %3487 = vmatmul.msk.f32.gmra.mxu2 %vm610_vm1, %v607_v48  ;;  %vm829_vm6 = vcmp.eq.s32.totalorder %v4309_v36, %v4200_v61 }
  0xf5   : > { %1154 = vperm.xlu1 %3676, %v3984_v20  }
  0xf6   : > { %1158 = vperm.xlu2 %3674, %v3981_v19   ;;  %1174 = vperm.xlu0 %3675, %v4011_v27   ;;  %v4318_v59 = vpop.permute.xlu1 %803 }
  0xf7   : > { %v4320_v29 = vpop.permute.xlu2 %853  ;;  %v4322_v56 = vpop.permute.xlu0 %809  ;;  %vm830_vm9 = vcmp.eq.s32.totalorder %v4318_v59, %v4200_v61 }
  0xf8   : > { %3488 = vmatmul.msk.f32.gmra.mxu2 %vm610_vm1, %v608_v49  ;;  %v5866_v49 = vld [vmem:[#allocation6_spill] sm:$0xff]  ;;  %vm832_vm13 = vcmp.eq.s32.totalorder %v4322_v56, %v4200_v61 }
  0xfd   : > { %1166 = vperm.xlu1 %3676, %v3996_v23  }
  0xfe   : > { %1170 = vperm.xlu2 %3674, %v3993_v22   ;;  %1186 = vperm.xlu0 %3675, %v4023_v30   ;;  %v4330_v47 = vpop.permute.xlu1 %812 }
  0xff   : > { %v4332_v42 = vpop.permute.xlu2 %865  ;;  %v4334_v35 = vpop.permute.xlu0 %818  ;;  %vm833_vm15 = vcmp.eq.s32.totalorder %v4330_v47, %v4200_v61 }
 0x100   : > { %3489 = vmatmul.msk.f32.gmra.mxu2 %vm610_vm1, %v609_v33  ;;  %v3823_v33 = vmov 3   ;;  %v907_v56 = vsel %vm827_vm14, %v4332_v42, 0.0 }
 0x105   : > { %1178 = vperm.xlu1 %3676, %v5863_v54  }
 0x106   : > { %1182 = vperm.xlu2 %3674, %v5864_v0   ;;  %1198 = vperm.xlu0 %3675, %v4032_v32   ;;  %v838_v51 = vpop.permute.xlu1 %837  ;;  %v901_v32 = vsel %vm821_vm3, %v842_v58, 0.0 }
 0x107   : > { %v878_v53 = vpop.permute.xlu2 %877  ;;  %v846_v60 = vpop.permute.xlu0 %845  ;;  %v900_v48 = vsel %vm820_vm2, %v838_v51, 0.0  ;;  %v5867_v51 = vld [vmem:[#allocation3_spill] sm:$0xff]  ;;  %vm835_vm2 = vcmp.eq.s32.totalorder %v4334_v35, %v4200_v61 }
 0x108   : > { %3490 = vmatmul.msk.f32.vlgmr.msra.gmra.mxu1 %vm610_vm1, %v900_v48 }
 0x10d   : > { %1190 = vperm.xlu1 %3676, %v5865_v34  }
 0x10e   : > { %1194 = vperm.xlu2 %3674, %v5866_v49   ;;  %3678 = vset.pattern.permute.xlu0 %v3823_v33  ;;  %v850_v54 = vpop.permute.xlu1 %849  ;;  %v902_v49 = vsel %vm822_vm4, %v846_v60, 0.0 }
 0x10f   : > { %v4346_v28 = vpop.permute.xlu2 %889  ;;  %1386 = vperm.xlu0 %3678, %v3921_v6   ;;  %v858_v0 = vpop.permute.xlu0 %857 }
 0x110   : > { %3491 = vmatmul.msk.f32.gmra.mxu1 %vm610_vm1, %v901_v32  ;;  %v913_v52 = vsel %vm833_vm15, %v4346_v28, 0.0 }
 0x115   : > { %1202 = vperm.xlu1 %3676, %v4029_v31  }
 0x116   : > { %3677 = vset.pattern.permute.xlu2 %v3823_v33  ;;  %v862_v41 = vpop.permute.xlu1 %861 }
 0x117   : > { %1383 = vperm.xlu2 %3677, %v5867_v51   ;;  %1401 = vperm.xlu0 %3678, %v3933_v9   ;;  %v870_v48 = vpop.permute.xlu0 %869  ;;  %v906_v62 = vsel %vm826_vm12, %v862_v41, 0.0 }
 0x118   : > { %v4357_v34 = vpop.permute.xlu2 %1078  ;;  %3492 = vmatmul.msk.f32.gmra.mxu1 %vm610_vm1, %v902_v49  ;;  %v908_v32 = vsel %vm828_vm5, %v870_v48, 0.0 }
 0x119   : > { %3498 = vmatmul.msk.f32.vlgmr.msra.gmra.mxu3 %vm610_vm1, %v908_v32  ;;  %v5868_v32 = vld [vmem:[#allocation8_spill] sm:$0xff]  ;;  %vm1125_vm3 = vcmp.eq.s32.totalorder %v4357_v34, %v4200_v61 }
 0x11a   : > { %2802 = vmatpush.msra.mxu3 %v4055_v37  ;;  %v903_v37 = vsel %vm823_vm7, %v850_v54, 0.0 }
 0x11c   : > { %2803 = vmatpush.msra.mxu3 %v4060_v38 }
 0x11d   : > { %3679 = vset.pattern.permute.xlu1 %v3823_v33 }
 0x11e   : > { %1389 = vperm.xlu1 %3679, %v3906_v2   ;;  %v874_v26 = vpop.permute.xlu1 %873  ;;  %2804 = vmatpush.msra.mxu3 %v4067_v39  ;;  %v904_v39 = vsel %vm824_vm8, %v4320_v29, 0.0 }
 0x11f   : > { %1392 = vperm.xlu2 %3677, %v3918_v5   ;;  %1410 = vperm.xlu0 %3678, %v3945_v12   ;;  %v882_v55 = vpop.permute.xlu0 %881  ;;  %v909_v58 = vsel %vm829_vm6, %v874_v26, 0.0 }
 0x120   : > { %v4371_v60 = vpop.permute.xlu2 %1087  ;;  %3493 = vmatmul.msk.f32.gmra.mxu1 %vm610_vm1, %v903_v37  ;;  %2805 = vmatpush.msra.mxu3 %v4088_v43  ;;  %v5869_v37 = vld [vmem:[#allocation5_spill] sm:$0xff] }
 0x121   : > { %3499 = vmatmul.msk.f32.gmra.mxu3 %vm610_vm1, %v909_v58  ;;  %v5870_v58 = vld [vmem:[#allocation4_spill] sm:$0xff]  ;;  %vm1128_vm6 = vcmp.eq.s32.totalorder %v4371_v60, %v4200_v61 }
 0x122   : > { %2806 = vmatpush.msra.mxu3 %v4096_v44  ;;  %v910_v44 = vsel %vm830_vm9, %v878_v53, 0.0 }
 0x124   : > { %2807 = vmatpush.msra.mxu3 %v4102_v45 }
 0x126   : > { %1395 = vperm.xlu1 %3679, %v3903_v1   ;;  %v886_v3 = vpop.permute.xlu1 %885  ;;  %2808 = vmatpush.msra.mxu3 %v4114_v46  ;;  %v905_v46 = vsel %vm825_vm10, %v858_v0, 0.0 }
 0x127   : > { %1398 = vperm.xlu2 %3677, %v3915_v4   ;;  %1419 = vperm.xlu0 %3678, %v3957_v15   ;;  %v894_v38 = vpop.permute.xlu0 %893  ;;  %v912_v54 = vsel %vm832_vm13, %v886_v3, 0.0  ;;  %v3824_v3 = vmov 4  }
 0x128   : > { %v4387_v43 = vpop.permute.xlu2 %1093  ;;  %3494 = vmatmul.msk.f32.gmra.mxu1 %vm610_vm1, %v904_v39  ;;  %2809 = vmatpush.msra.mxu3 %v4131_v50  ;;  %v911_v50 = vsel %vm831_vm11, %v882_v55, 0.0  ;;  %v914_v33 = vsel %vm834_vm0, %v894_v38, 0.0 }
 0x129   : > { %3500 = vmatmul.msk.f32.gmra.mxu3 %vm610_vm1, %v910_v44  ;;  %vm1130_vm8 = vcmp.eq.s32.totalorder %v4387_v43, %v4200_v61 }
 0x12e   : > { %1404 = vperm.xlu1 %3679, %v3930_v8   ;;  %v898_v45 = vpop.permute.xlu1 %897 }
 0x12f   : > { %1407 = vperm.xlu2 %3677, %v3927_v7   ;;  %1428 = vperm.xlu0 %3678, %v3975_v18   ;;  %v915_v48 = vsel %vm835_vm2, %v898_v45, 0.0 }
 0x130   : > { %v4399_v40 = vpop.permute.xlu2 %1102  ;;  %v4401_v36 = vpop.permute.xlu0 %1081  ;;  %3495 = vmatmul.msk.f32.gmra.mxu1 %vm610_vm1, %v905_v46  ;;  %v5871_v46 = vld [vmem:[#allocation7_spill] sm:$0xff] }
 0x131   : > { %3501 = vmatmul.msk.f32.gmra.mxu3 %vm610_vm1, %v911_v50  ;;  %vm1126_vm4 = vcmp.eq.s32.totalorder %v4401_v36, %v4200_v61  ;;  %v5872_v50 = vld [vmem:[#allocation6_spill] sm:$0xff]  ;;  %vm1133_vm11 = vcmp.eq.s32.totalorder %v4399_v40, %v4200_v61 }
 0x136   : > { %1413 = vperm.xlu1 %3679, %v3942_v11  }
 0x137   : > { %1416 = vperm.xlu2 %3677, %v3939_v10   ;;  %1455 = vperm.xlu0 %3678, %v3987_v21   ;;  %v4412_v57 = vpop.permute.xlu1 %1084 }
 0x138   : > { %v4414_v59 = vpop.permute.xlu2 %1111  ;;  %v4416_v29 = vpop.permute.xlu0 %1096  ;;  %3496 = vmatmul.msk.f32.gmra.mxu1 %vm610_vm1, %v906_v62  ;;  %vm1127_vm5 = vcmp.eq.s32.totalorder %v4412_v57, %v4200_v61 }
 0x139   : > { %3502 = vmatmul.msk.f32.gmra.mxu3 %vm610_vm1, %v912_v54  ;;  %vm1131_vm9 = vcmp.eq.s32.totalorder %v4416_v29, %v4200_v61  ;;  %vm1136_vm14 = vcmp.eq.s32.totalorder %v4414_v59, %v4200_v61 }
 0x13e   : > { %1422 = vperm.xlu1 %3679, %v3954_v14  }
 0x13f   : > { %1425 = vperm.xlu2 %3677, %v3951_v13   ;;  %1467 = vperm.xlu0 %3678, %v3999_v24   ;;  %v4427_v25 = vpop.permute.xlu1 %1090 }
 0x140   : > { %v4430_v0 = vpop.permute.xlu2 %1120  ;;  %v4432_v53 = vpop.permute.xlu0 %1105  ;;  %3497 = vmatmul.msk.f32.gmra.mxu1 %vm610_vm1, %v907_v56  ;;  %vm1129_vm7 = vcmp.eq.s32.totalorder %v4427_v25, %v4200_v61 }
 0x141   : > { %3503 = vmatmul.msk.f32.gmra.mxu3 %vm610_vm1, %v913_v52  ;;  %vm1134_vm12 = vcmp.eq.s32.totalorder %v4432_v53, %v4200_v61 }
 0x146   : > { %1447 = vperm.xlu1 %3679, %v3972_v17  }
 0x147   : > { %1451 = vperm.xlu2 %3677, %v3969_v16   ;;  %1479 = vperm.xlu0 %3678, %v4011_v27   ;;  %v4442_v47 = vpop.permute.xlu1 %1099 }
 0x148   : > { %v1147_v42 = vpop.permute.xlu2 %1146  ;;  %v4444_v49 = vpop.permute.xlu0 %1114  ;;  %vm1132_vm10 = vcmp.eq.s32.totalorder %v4442_v47, %v4200_v61 }
 0x149   : > { %3504 = vmatmul.msk.f32.gmra.mxu3 %vm610_vm1, %v914_v33  ;;  %v1206_v56 = vsel %vm1126_vm4, %v1147_v42, 0.0  ;;  %vm1137_vm0 = vcmp.eq.s32.totalorder %v4444_v49, %v4200_v61 }
 0x14e   : > { %1459 = vperm.xlu1 %3679, %v3984_v20  }
 0x14f   : > { %1463 = vperm.xlu2 %3677, %v3981_v19   ;;  %1491 = vperm.xlu0 %3678, %v4023_v30   ;;  %v4452_v63 = vpop.permute.xlu1 %1108 }
 0x150   : > { %v1159_v28 = vpop.permute.xlu2 %1158  ;;  %v4454_v41 = vpop.permute.xlu0 %1123  ;;  %vm1135_vm13 = vcmp.eq.s32.totalorder %v4452_v63, %v4200_v61 }
 0x151   : > { %3505 = vmatmul.msk.f32.gmra.mxu3 %vm610_vm1, %v915_v48 }
 0x156   : > { %1471 = vperm.xlu1 %3679, %v3996_v23  }
 0x157   : > { %1475 = vperm.xlu2 %3677, %v3993_v22   ;;  %1503 = vperm.xlu0 %3678, %v5868_v32   ;;  %v4460_v35 = vpop.permute.xlu1 %1117 }
 0x158   : > { %v4462_v26 = vpop.permute.xlu2 %1170  ;;  %v1151_v55 = vpop.permute.xlu0 %1150 }
 0x159   : > { %v1207_v52 = vsel %vm1127_vm5, %v1151_v55, 0.0  ;;  %vm1139_vm5 = vcmp.eq.s32.totalorder %v4430_v0, %v4200_v61  ;;  %v4663_v0 = vld [vmem:[%s3966_s23 + $0x10] sm:$0xff] }
 0x15e   : > { %1483 = vperm.xlu1 %3679, %v5869_v37  }
 0x15f   : > { %1487 = vperm.xlu2 %3677, %v5870_v58   ;;  %3681 = vset.pattern.permute.xlu0 %v3824_v3  ;;  %v1143_v38 = vpop.permute.xlu1 %1142 }
 0x160   : > { %v1205_v39 = vsel %vm1125_vm3, %v1143_v38, 0.0  ;;  %v4468_v44 = vpop.permute.xlu2 %1182  ;;  %1691 = vperm.xlu0 %3681, %v3921_v6   ;;  %v1163_v45 = vpop.permute.xlu0 %1162  ;;  %vm1138_vm3 = vcmp.eq.s32.totalorder %v4460_v35, %v4200_v61 }
 0x161   : > { %3506 = vmatmul.msk.f32.vlgmr.msrb.gmra.mxu2 %vm610_vm1, %v1205_v39  ;;  %v1215_v53 = vsel %vm1135_vm13, %v4468_v44, 0.0  ;;  %v4620_v39 = vld [vmem:[%s3900_s20 + $0x8] sm:$0xff] }
 0x166   : > { %1495 = vperm.xlu1 %3679, %v5871_v46  }
 0x167   : > { %1499 = vperm.xlu2 %3677, %v5872_v50   ;;  %v1155_v34 = vpop.permute.xlu1 %1154 }
 0x168   : > { %v4476_v62 = vpop.permute.xlu2 %1194  ;;  %1706 = vperm.xlu0 %3681, %v3933_v9   ;;  %v4479_v54 = vpop.permute.xlu0 %1174 }
 0x169   : > { %3507 = vmatmul.msk.f32.gmra.mxu2 %vm610_vm1, %v1206_v56  ;;  %v4653_v56 = vld [vmem:[%s3900_s20 + $0x10] sm:$0xff] }
 0x16e   : > { %1507 = vperm.xlu1 %3679, %v4029_v31  }
 0x16f   : > { %3680 = vset.pattern.permute.xlu2 %v3824_v3  ;;  %v1167_v6 = vpop.permute.xlu1 %1166 }
 0x170   : > { %1688 = vperm.xlu2 %3680, %v5867_v51   ;;  %1715 = vperm.xlu0 %3681, %v3945_v12   ;;  %v4487_v36 = vpop.permute.xlu0 %1186  ;;  %v1208_v12 = vsel %vm1128_vm6, %v1155_v34, 0.0 }
 0x171   : > { %v4489_v9 = vpop.permute.xlu2 %1383  ;;  %3508 = vmatmul.msk.f32.gmra.mxu2 %vm610_vm1, %v1207_v52 }
 0x172   : > { %vm1430_vm15 = vcmp.eq.s32.totalorder %v4489_v9, %v4200_v61 }
 0x176   : > { %3682 = vset.pattern.permute.xlu1 %v3824_v3  ;;  %v5833_v3 = vmov 5  }
 0x177   : > { %1694 = vperm.xlu1 %3682, %v3906_v2   ;;  %v1179_v57 = vpop.permute.xlu1 %1178  ;;  %v1209_v2 = vsel %vm1129_vm7, %v1159_v28, 0.0  ;;  %v4583_v28 = vld [vmem:[%s3900_s20 + $0x18] sm:$0xff]  ;;  %vm1140_vm7 = vcmp.eq.s32.totalorder %v4454_v41, %v4200_v61  ;;  %v4684_v41 = vld [vmem:[%s3966_s23 + $0x28] sm:$0xff] }
 0x178   : > { %1697 = vperm.xlu2 %3680, %v3918_v5   ;;  %1724 = vperm.xlu0 %3681, %v3957_v15   ;;  %v4497_v51 = vpop.permute.xlu0 %1198 }
 0x179   : > { %v4499_v42 = vpop.permute.xlu2 %1392  ;;  %3509 = vmatmul.msk.f32.gmra.mxu2 %vm610_vm1, %v1208_v12 }
 0x17a   : > { %vm1433_vm6 = vcmp.eq.s32.totalorder %v4499_v42, %v4200_v61  ;;  %v5838_v42 = vmov 6  }
 0x17f   : > { %1700 = vperm.xlu1 %3682, %v3903_v1   ;;  %v4505_v60 = vpop.permute.xlu1 %1190  ;;  %v1210_v1 = vsel %vm1130_vm8, %v1163_v45, 0.0  ;;  %v1218_v45 = vsel %vm1138_vm3, %v4476_v62, 0.0  ;;  %v1219_v62 = vsel %vm1139_vm5, %v4497_v51, 0.0 }
 0x180   : > { %1703 = vperm.xlu2 %3680, %v3915_v4   ;;  %1733 = vperm.xlu0 %3681, %v3975_v18  }
 0x181   : > { %v4509_v5 = vpop.permute.xlu2 %1398  ;;  %v4511_v15 = vpop.permute.xlu0 %1386  ;;  %3510 = vmatmul.msk.f32.gmra.mxu2 %vm610_vm1, %v1209_v2 }
 0x182   : > { %vm1431_vm2 = vcmp.eq.s32.totalorder %v4511_v15, %v4200_v61 }
 0x187   : > { %1709 = vperm.xlu1 %3682, %v3930_v8   ;;  %v4517_v25 = vpop.permute.xlu1 %1202 }
 0x188   : > { %1712 = vperm.xlu2 %3680, %v3927_v7   ;;  %1760 = vperm.xlu0 %3681, %v3987_v21   ;;  %v1211_v7 = vsel %vm1131_vm9, %v1167_v6, 0.0  ;;  %v1220_v12 = vsel %vm1140_vm7, %v4517_v25, 0.0  ;;  %vm1435_vm9 = vcmp.eq.s32.totalorder %v4509_v5, %v4200_v61 }
 0x189   : > { %v4521_v4 = vpop.permute.xlu2 %1407  ;;  %v4523_v18 = vpop.permute.xlu0 %1401  ;;  %3511 = vmatmul.msk.f32.gmra.mxu2 %vm610_vm1, %v1210_v1 }
 0x18f   : > { %1718 = vperm.xlu1 %3682, %v3942_v11   ;;  %v1212_v11 = vsel %vm1132_vm10, %v4462_v26, 0.0  ;;  %v4599_v26 = vld [vmem:[%s3900_s20 + $0x20] sm:$0xff]  ;;  %vm1436_vm10 = vcmp.eq.s32.totalorder %v4523_v18, %v4200_v61 }
 0x190   : > { %1721 = vperm.xlu2 %3680, %v3939_v10   ;;  %1772 = vperm.xlu0 %3681, %v3999_v24   ;;  %v4531_v8 = vpop.permute.xlu1 %1389 }
 0x191   : > { %v4533_v21 = vpop.permute.xlu2 %1416  ;;  %v4535_v43 = vpop.permute.xlu0 %1410  ;;  %3512 = vmatmul.msk.f32.gmra.mxu2 %vm610_vm1, %v1211_v7  ;;  %vm1432_vm4 = vcmp.eq.s32.totalorder %v4531_v8, %v4200_v61 }
 0x192   : > { %vm1439_vm13 = vcmp.eq.s32.totalorder %v4535_v43, %v4200_v61 }
 0x197   : > { %1727 = vperm.xlu1 %3682, %v3954_v14   ;;  %v1213_v14 = vsel %vm1133_vm11, %v4479_v54, 0.0  ;;  %v4644_v54 = vpop.f32.mrf.mxu2 }
 0x198   : > { %1730 = vperm.xlu2 %3680, %v3951_v13   ;;  %1784 = vperm.xlu0 %3681, %v4011_v27   ;;  %v4543_v10 = vpop.permute.xlu1 %1395 }
 0x199   : > { %v4546_v24 = vpop.permute.xlu2 %1425  ;;  %v4548_v29 = vpop.permute.xlu0 %1419  ;;  %3513 = vmatmul.msk.f32.gmra.mxu2 %vm610_vm1, %v1212_v11  ;;  %vm1434_vm8 = vcmp.eq.s32.totalorder %v4543_v10, %v4200_v61  ;;  %v4703_v10 = vld [vmem:[%s3900_s20 + $0x30] sm:$0xff] }
 0x19a   : > { %vm1442_vm3 = vcmp.eq.s32.totalorder %v4548_v29, %v4200_v61 }
 0x19c   : > { %v4729_v18 = vpop.f32.mrf.mxu3 }
 0x19f   : > { %1752 = vperm.xlu1 %3682, %v3972_v17   ;;  %v1214_v17 = vsel %vm1134_vm12, %v1179_v57, 0.0  ;;  %v4671_v57 = vpop.f32.mrf.mxu2  ;;  %vm1438_vm12 = vcmp.eq.s32.totalorder %v4521_v4, %v4200_v61 }
 0x1a0   : > { %1756 = vperm.xlu2 %3680, %v3969_v16   ;;  %1796 = vperm.xlu0 %3681, %v4023_v30   ;;  %v4556_v13 = vpop.permute.xlu1 %1404 }
 0x1a1   : > { %v1452_v27 = vpop.permute.xlu2 %1451  ;;  %v4559_v47 = vpop.permute.xlu0 %1428  ;;  %3514 = vmatmul.msk.f32.gmra.mxu2 %vm610_vm1, %v1213_v14  ;;  %v3773_v14 = vld [vmem:[%s3966_s23] sm:$0xff]  ;;  %vm1437_vm11 = vcmp.eq.s32.totalorder %v4556_v13, %v4200_v61 }
 0x1a2   : > { %v1511_v49 = vsel %vm1431_vm2, %v1452_v27, 0.0 }
 0x1a7   : > { %1764 = vperm.xlu1 %3682, %v3984_v20   ;;  %v5835_v20 = vmov 7   ;;  %v4694_v1 = vpop.f32.mrf.mxu2 }
 0x1a8   : > { %1768 = vperm.xlu2 %3680, %v3981_v19   ;;  %1808 = vperm.xlu0 %3681, %v5868_v32   ;;  %v4567_v16 = vpop.permute.xlu1 %1413 }
 0x1a9   : > { %v4569_v30 = vpop.permute.xlu2 %1463  ;;  %v1456_v40 = vpop.permute.xlu0 %1455  ;;  %3515 = vmatmul.msk.f32.gmra.mxu2 %vm610_vm1, %v1214_v17  ;;  %v4718_v17 = vld [vmem:[%s3966_s23 + $0x48] sm:$0xff] }
 0x1aa   : > { %v1514_v15 = vsel %vm1434_vm8, %v4569_v30, 0.0 }
 0x1af   : > { %1776 = vperm.xlu1 %3682, %v3996_v23   ;;  %v1216_v23 = vsel %vm1136_vm14, %v4487_v36, 0.0  ;;  %vm1440_vm14 = vcmp.eq.s32.totalorder %v4567_v16, %v4200_v61  ;;  %v3777_v16 = vld [vmem:[%s3966_s23 + $0x18] sm:$0xff] }
 0x1b0   : > { %1780 = vperm.xlu2 %3680, %v3993_v22   ;;  %3698 = vset.pattern.permute.xlu0 %v5835_v20  ;;  %v4577_v19 = vpop.permute.xlu1 %1422 }
 0x1b1   : > { %v4580_v33 = vpop.permute.xlu2 %1475  ;;  %2612 = vperm.xlu0 %3698, %v4583_v28   ;;  %v4586_v48 = vpop.permute.xlu0 %1467  ;;  %3516 = vmatmul.msk.f32.gmra.mxu2 %vm610_vm1, %v1215_v53  ;;  %vm1443_vm7 = vcmp.eq.s32.totalorder %v4577_v19, %v4200_v61 }
 0x1b2   : > { %v1515_v8 = vsel %vm1435_vm9, %v4586_v48, 0.0  ;;  %v4724_v53 = vpop.f32.mrf.mxu2  ;;  %vm1444_vm9 = vcmp.eq.s32.totalorder %v4546_v24, %v4200_v61 }
 0x1b7   : > { %1788 = vperm.xlu1 %3682, %v5869_v37   ;;  %v1217_v37 = vsel %vm1137_vm0, %v4505_v60, 0.0 }
 0x1b8   : > { %1792 = vperm.xlu2 %3680, %v5870_v58   ;;  %v1448_v22 = vpop.permute.xlu1 %1447 }
 0x1b9   : > { %v1510_v63 = vsel %vm1430_vm15, %v1448_v22, 0.0  ;;  %v4596_v32 = vpop.permute.xlu2 %1487  ;;  %2615 = vperm.xlu0 %3698, %v4599_v26   ;;  %v4602_v55 = vpop.permute.xlu0 %1479  ;;  %3517 = vmatmul.msk.f32.gmra.mxu2 %vm610_vm1, %v1216_v23  ;;  %v4738_v23 = vld [vmem:[%s3900_s20 + $0x50] sm:$0xff]  ;;  %vm1441_vm15 = vcmp.eq.s32.totalorder %v4533_v21, %v4200_v61  ;;  %v4818_v21 = vld [vmem:[%s3966_s23 + $0x38] sm:$0xff] }
 0x1ba   : > { %3522 = vmatmul.msk.f32.vlgmr.msrb.gmra.mxu3 %vm610_vm1, %v1510_v63  ;;  %v4748_v13 = vpop.f32.mrf.mxu2 }
 0x1bf   : > { %1800 = vperm.xlu1 %3682, %v5871_v46   ;;  %v1512_v46 = vsel %vm1432_vm4, %v1456_v40, 0.0 }
 0x1c0   : > { %1804 = vperm.xlu2 %3680, %v5872_v50   ;;  %v1460_v59 = vpop.permute.xlu1 %1459  ;;  %v3767_v50 = vld [vmem:[%s3900_s20] sm:$0xff] }
 0x1c1   : > { %v4613_v58 = vpop.permute.xlu2 %1499  ;;  %3703 = vset.pattern.permute.xlu0 %v5833_v3  ;;  %v4616_v38 = vpop.permute.xlu0 %1491  ;;  %3518 = vmatmul.msk.f32.gmra.mxu2 %vm610_vm1, %v1217_v37  ;;  %v1513_v36 = vsel %vm1433_vm6, %v1460_v59, 0.0  ;;  %v1517_v59 = vsel %vm1437_vm11, %v4580_v33, 0.0 }
 0x1c2   : > { %1996 = vperm.xlu0 %3703, %v4620_v39   ;;  %3523 = vmatmul.msk.f32.gmra.mxu3 %vm610_vm1, %v1511_v49  ;;  %v4751_v37 = vpop.f32.mrf.mxu3  ;;  %v4766_v4 = vpop.f32.mrf.mxu2 }
 0x1c7   : > { %1812 = vperm.xlu1 %3682, %v4029_v31   ;;  %v4640_v31 = vld [vmem:[%s3966_s23 + $0x8] sm:$0xff] }
 0x1c8   : > { %3683 = vset.pattern.permute.xlu2 %v5833_v3  ;;  %v4630_v44 = vpop.permute.xlu1 %1471 }
 0x1c9   : > { %1993 = vperm.xlu2 %3683, %v3767_v50   ;;  %v4634_v34 = vpop.permute.xlu0 %1503  ;;  %3519 = vmatmul.msk.f32.gmra.mxu2 %vm610_vm1, %v1218_v45  ;;  %v1516_v40 = vsel %vm1436_vm10, %v4630_v44, 0.0  ;;  %v1518_v44 = vsel %vm1438_vm12, %v4602_v55, 0.0  ;;  %vm1445_vm12 = vcmp.eq.s32.totalorder %v4559_v47, %v4200_v61 }
 0x1ca   : > { %v4637_v35 = vpop.permute.xlu2 %1688  ;;  %2061 = vperm.xlu0 %3703, %v4640_v31   ;;  %3524 = vmatmul.msk.f32.gmra.mxu3 %vm610_vm1, %v1512_v46  ;;  %v4770_v55 = vpop.f32.mrf.mxu3 }
 0x1cb   : > { %v4783_v43 = vpop.f32.mrf.mxu2  ;;  %vm1735_vm0 = vcmp.eq.s32.totalorder %v4637_v35, %v4200_v61 }
 0x1cf   : > { %3684 = vset.pattern.permute.xlu1 %v5833_v3 }
 0x1d0   : > { %1999 = vperm.xlu1 %3684, %v4653_v56   ;;  %v4656_v6 = vpop.permute.xlu1 %1483 }
 0x1d1   : > { %2002 = vperm.xlu2 %3683, %v4583_v28   ;;  %3520 = vmatmul.msk.f32.gmra.mxu2 %vm610_vm1, %v1219_v62  ;;  %v1519_v62 = vsel %vm1439_vm13, %v4656_v6, 0.0 }
 0x1d2   : > { %v4660_v52 = vpop.permute.xlu2 %1697  ;;  %2065 = vperm.xlu0 %3703, %v4663_v0   ;;  %v4666_v9 = vpop.permute.xlu0 %1691  ;;  %3525 = vmatmul.msk.f32.gmra.mxu3 %vm610_vm1, %v1513_v36 }
 0x1d3   : > { %vm1736_vm4 = vcmp.eq.s32.totalorder %v4666_v9, %v4200_v61  ;;  %vm1738_vm10 = vcmp.eq.s32.totalorder %v4660_v52, %v4200_v61 }
 0x1d8   : > { %2005 = vperm.xlu1 %3684, %v4599_v26   ;;  %v4674_v51 = vpop.permute.xlu1 %1495 }
 0x1d9   : > { %3685 = vset.pattern.permute.xlu2 %v5838_v42  ;;  %3521 = vmatmul.msk.f32.gmra.mxu2 %vm610_vm1, %v1220_v12  ;;  %v1520_v12 = vsel %vm1440_vm14, %v4596_v32, 0.0  ;;  %v1522_v29 = vsel %vm1442_vm3, %v4674_v51, 0.0 }
 0x1da   : > { %2298 = vperm.xlu2 %3685, %v3767_v50   ;;  %v4681_v60 = vpop.permute.xlu2 %1703  ;;  %2077 = vperm.xlu0 %3703, %v4684_v41   ;;  %v4687_v2 = vpop.permute.xlu0 %1706 }
 0x1db   : > { %3526 = vmatmul.msk.f32.gmra.mxu3 %vm610_vm1, %v1514_v15  ;;  %v4797_v15 = vpop.f32.mrf.mxu3 }
 0x1e0   : > { %3686 = vset.pattern.permute.xlu1 %v5835_v20  ;;  %v4692_v25 = vpop.permute.xlu1 %1507 }
 0x1e1   : > { %2603 = vperm.xlu1 %3686, %v3767_v50  }
 0x1e2   : > { %3687 = vset.pattern.permute.xlu2 %v5835_v20  ;;  %v4700_v7 = vpop.permute.xlu2 %1712  ;;  %2011 = vperm.xlu0 %3703, %v4703_v10   ;;  %v4706_v11 = vpop.permute.xlu0 %1715 }
 0x1e3   : > { %2667 = vperm.xlu2 %3687, %v3773_v14   ;;  %3527 = vmatmul.msk.f32.gmra.mxu3 %vm610_vm1, %v1515_v8  ;;  %v4821_v35 = vpop.f32.mrf.mxu3  ;;  %vm1743_vm3 = vcmp.eq.s32.totalorder %v4700_v7, %v4200_v61 }
 0x1e9   : > { %v4712_v5 = vpop.permute.xlu1 %1694  ;;  %3688 = vset.pattern.permute.xlu1 %v5833_v3 }
 0x1ea   : > { %v4715_v27 = vpop.permute.xlu2 %1721  ;;  %2093 = vperm.xlu0 %3703, %v4718_v17   ;;  %v4721_v30 = vpop.permute.xlu0 %1724  ;;  %2057 = vperm.xlu1 %3688, %v3773_v14   ;;  %vm1737_vm8 = vcmp.eq.s32.totalorder %v4712_v5, %v4200_v61  ;;  %v4866_v5 = vld [vmem:[%s3966_s23 + $0x58] sm:$0xff] }
 0x1eb   : > { %3689 = vset.pattern.permute.xlu2 %v5838_v42  ;;  %3528 = vmatmul.msk.f32.gmra.mxu3 %vm610_vm1, %v1516_v40  ;;  %vm1747_vm11 = vcmp.eq.s32.totalorder %v4721_v30, %v4200_v61  ;;  %v1525_v30 = vsel %vm1445_vm12, %v4692_v25, 0.0 }
 0x1ec   : > { %2301 = vperm.xlu2 %3689, %v4620_v39  }
 0x1f1   : > { %v4733_v48 = vpop.permute.xlu1 %1700 }
 0x1f2   : > { %v4735_v22 = vpop.permute.xlu2 %1730  ;;  %2023 = vperm.xlu0 %3703, %v4738_v23   ;;  %v4741_v63 = vpop.permute.xlu0 %1733  ;;  %3690 = vset.pattern.permute.xlu1 %v5835_v20  ;;  %vm1739_vm13 = vcmp.eq.s32.totalorder %v4733_v48, %v4200_v61  ;;  %v4918_v48 = vld [vmem:[%s3966_s23 + $0x40] sm:$0xff] }
 0x1f3   : > { %3529 = vmatmul.msk.f32.gmra.mxu3 %vm610_vm1, %v1517_v59  ;;  %2606 = vperm.xlu1 %3690, %v4620_v39   ;;  %v4815_v59 = vpop.f32.mrf.mxu2  ;;  %vm1749_vm5 = vcmp.eq.s32.totalorder %v4735_v22, %v4200_v61  ;;  %v4845_v22 = vpop.f32.mrf.mxu3  ;;  %vm1750_vm14 = vcmp.eq.s32.totalorder %v4741_v63, %v4200_v61 }
 0x1f4   : > { %3691 = vset.pattern.permute.xlu2 %v5835_v20  ;;  %5873 = vst [vmem:[#allocation3_spill] sm:$0xff] %v4815_v59 }
 0x1f5   : > { %2671 = vperm.xlu2 %3691, %v4640_v31  }
 0x1f9   : > { %v4755_v49 = vpop.permute.xlu1 %1709 }
 0x1fa   : > { %v1757_v33 = vpop.permute.xlu2 %1756  ;;  %3732 = vset.pattern.permute.xlu0 %v5838_v42  ;;  %v4759_v45 = vpop.permute.xlu0 %1760 }
 0x1fb   : > { %2362 = vperm.xlu0 %3732, %v3773_v14   ;;  %3530 = vmatmul.msk.f32.gmra.mxu3 %vm610_vm1, %v1518_v44  ;;  %v1816_v44 = vsel %vm1736_vm4, %v1757_v33, 0.0  ;;  %v1817_v33 = vsel %vm1737_vm8, %v4759_v45, 0.0  ;;  %v1524_v45 = vsel %vm1444_vm9, %v4634_v34, 0.0 }
 0x1fc   : > { %3692 = vset.pattern.permute.xlu1 %v5838_v42 }
 0x1fd   : > { %2304 = vperm.xlu1 %3692, %v4653_v56   ;;  %3693 = vset.pattern.permute.xlu2 %v5838_v42 }
 0x1fe   : > { %2370 = vperm.xlu2 %3693, %v4663_v0  }
 0x201   : > { %v1719_v39 = vpop.permute.xlu1 %1718 }
 0x202   : > { %v4772_v46 = vpop.permute.xlu2 %1768  ;;  %v4774_v50 = vpop.permute.xlu0 %1772  ;;  %vm1745_vm2 = vcmp.eq.s32.totalorder %v1719_v39, %v4200_v61 }
 0x203   : > { %2366 = vperm.xlu0 %3732, %v4640_v31   ;;  %3531 = vmatmul.msk.f32.gmra.mxu3 %vm610_vm1, %v1519_v62 }
 0x205   : > { %3694 = vset.pattern.permute.xlu1 %v5835_v20 }
 0x206   : > { %2609 = vperm.xlu1 %3694, %v4653_v56   ;;  %3695 = vset.pattern.permute.xlu2 %v5835_v20  ;;  %v4794_v56 = vld [vmem:[%s3900_s20 + $0x28] sm:$0xff] }
 0x207   : > { %2675 = vperm.xlu2 %3695, %v4663_v0   ;;  %v1521_v0 = vsel %vm1441_vm15, %v4616_v38, 0.0  ;;  %vm1740_vm15 = vcmp.eq.s32.totalorder %v4681_v60, %v4200_v61  ;;  %v4945_v60 = vpop.f32.mrf.mxu0 }
 0x209   : > { %v1728_v36 = vpop.permute.xlu1 %1727 }
 0x20a   : > { %v4787_v6 = vpop.permute.xlu2 %1780  ;;  %v4789_v31 = vpop.permute.xlu0 %1784  ;;  %vm1748_vm6 = vcmp.eq.s32.totalorder %v1728_v36, %v4200_v61  ;;  %v3780_v36 = vld [vmem:[%s3966_s23 + $0x20] sm:$0xff] }
 0x20b   : > { %3532 = vmatmul.msk.f32.gmra.mxu3 %vm610_vm1, %v1520_v12  ;;  %2313 = vperm.xlu0 %3732, %v4794_v56  }
 0x20e   : > { %3696 = vset.pattern.permute.xlu1 %v5838_v42 }
 0x20f   : > { %2307 = vperm.xlu1 %3696, %v4583_v28   ;;  %3697 = vset.pattern.permute.xlu2 %v5838_v42 }
 0x210   : > { %2374 = vperm.xlu2 %3697, %v3777_v16  }
 0x211   : > { %v1753_v32 = vpop.permute.xlu1 %1752 }
 0x212   : > { %v1815_v8 = vsel %vm1735_vm0, %v1753_v32, 0.0  ;;  %v1793_v14 = vpop.permute.xlu2 %1792  ;;  %v4809_v40 = vpop.permute.xlu0 %1796  ;;  %v4842_v32 = vld [vmem:[%s3900_s20 + $0x40] sm:$0xff]  ;;  %vm1741_vm0 = vcmp.eq.s32.totalorder %v4687_v2, %v4200_v61 }
 0x213   : > { %v4811_v28 = vsel %vm1745_vm2, %v1793_v14, 0.0  ;;  %3533 = vmatmul.msk.f32.gmra.mxu3 %vm610_vm1, %v1521_v0  ;;  %3538 = vmatmul.msk.f32.vlgmr.msrb.gmra.mxu0 %vm610_vm1, %v1815_v8  ;;  %v1523_v0 = vsel %vm1443_vm7, %v4613_v58, 0.0  ;;  %v4877_v14 = vpop.f32.mrf.mxu3  ;;  %vm1742_vm2 = vcmp.eq.s32.totalorder %v4755_v49, %v4200_v61 }
 0x214   : > { %2390 = vperm.xlu0 %3732, %v4818_v21  }
 0x217   : > { %3699 = vset.pattern.permute.xlu1 %v5835_v20 }
 0x218   : > { %2679 = vperm.xlu1 %3699, %v3777_v16   ;;  %3700 = vset.pattern.permute.xlu2 %v5833_v3 }
 0x219   : > { %2069 = vperm.xlu2 %3700, %v3777_v16   ;;  %v1765_v38 = vpop.permute.xlu1 %1764  ;;  %v4839_v16 = vpop.f32.mrf.mxu2 }
 0x21a   : > { %v1805_v39 = vpop.permute.xlu2 %1804  ;;  %v1809_v62 = vpop.permute.xlu0 %1808 }
 0x21b   : > { %v4833_v9 = vsel %vm1748_vm6, %v1805_v39, 0.0  ;;  %v4835_v12 = vsel %vm1749_vm5, %v1809_v62, 0.0  ;;  %3534 = vmatmul.msk.f32.gmra.mxu3 %vm610_vm1, %v1522_v29  ;;  %3539 = vmatmul.msk.f32.gmra.mxu0 %vm610_vm1, %v1816_v44  ;;  %v1818_v44 = vsel %vm1738_vm10, %v1765_v38, 0.0  ;;  %v4889_v62 = vld [vmem:[%s3900_s20 + $0x60] sm:$0xff]  ;;  %v1819_v29 = vsel %vm1739_vm13, %v4772_v46, 0.0 }
 0x21c   : > { %2322 = vperm.xlu0 %3732, %v4842_v32   ;;  %vm1744_vm5 = vcmp.eq.s32.totalorder %v4706_v11, %v4200_v61  ;;  %vm1746_vm10 = vcmp.eq.s32.totalorder %v4715_v27, %v4200_v61 }
 0x220   : > { %3701 = vset.pattern.permute.xlu1 %v5838_v42 }
 0x221   : > { %2310 = vperm.xlu1 %3701, %v4599_v26   ;;  %3702 = vset.pattern.permute.xlu2 %v5838_v42  ;;  %v4854_v51 = vpop.permute.xlu1 %1776  ;;  %v4869_v26 = vpop.f32.mrf.mxu2 }
 0x222   : > { %2378 = vperm.xlu2 %3702, %v3780_v36   ;;  %5874 = vst [vmem:[#allocation8_spill] sm:$0xff] %v4869_v26 }
 0x223   : > { %3535 = vmatmul.msk.f32.gmra.mxu3 %vm610_vm1, %v1523_v0  ;;  %3540 = vmatmul.msk.f32.gmra.mxu0 %vm610_vm1, %v1817_v33  ;;  %v4861_v19 = vpop.permute.xlu0 %2612  ;;  %v4863_v8 = vpop.permute.xlu2 %1993 }
 0x224   : > { %2406 = vperm.xlu0 %3732, %v4866_v5   ;;  %v4911_v33 = vpop.f32.mrf.mxu3  ;;  %vm2040_vm6 = vcmp.eq.s32.totalorder %v4863_v8, %v4200_v61 }
 0x225   : > { %5876 = vst [vmem:[#allocation4_spill] sm:$0xff] %v4911_v33 }
 0x229   : > { %3704 = vset.pattern.permute.xlu1 %v5835_v20  ;;  %v4874_v58 = vpop.permute.xlu1 %1788  ;;  %v4896_v34 = vpop.f32.mrf.mxu2 }
 0x22a   : > { %2683 = vperm.xlu1 %3704, %v3780_v36   ;;  %3705 = vset.pattern.permute.xlu2 %v5833_v3  ;;  %5875 = vst [vmem:[#allocation5_spill] sm:$0xff] %v4896_v34 }
 0x22b   : > { %2073 = vperm.xlu2 %3705, %v3780_v36   ;;  %3536 = vmatmul.msk.f32.gmra.mxu3 %vm610_vm1, %v1524_v45  ;;  %v4883_v39 = vpop.permute.xlu0 %2615  ;;  %v4885_v24 = vpop.permute.xlu2 %2002  ;;  %v1820_v45 = vsel %vm1740_vm15, %v4774_v50, 0.0 }
 0x22c   : > { %3541 = vmatmul.msk.f32.gmra.mxu0 %vm610_vm1, %v1818_v44  ;;  %2334 = vperm.xlu0 %3732, %v4889_v62   ;;  %vm2043_vm12 = vcmp.eq.s32.totalorder %v4885_v24, %v4200_v61  ;;  %v1053_v24 = vmul.f32 %v4729_v18, %v4729_v18 }
 0x231   : > { %v1801_v52 = vpop.permute.xlu1 %1800  ;;  %v4923_v46 = vpop.f32.mrf.mxu2 }
 0x232   : > { %v4898_v38 = vsel %vm1747_vm11, %v1801_v52, 0.0  ;;  %3706 = vset.pattern.permute.xlu1 %v5838_v42  ;;  %5877 = vst [vmem:[#allocation7_spill] sm:$0xff] %v4923_v46  ;;  %v4984_v46 = vld [vmem:[%s3900_s20 + $0x68] sm:$0xff] }
 0x233   : > { %2382 = vperm.xlu1 %3706, %v4684_v41   ;;  %3707 = vset.pattern.permute.xlu2 %v5835_v20 }
 0x234   : > { %3537 = vmatmul.msk.f32.gmra.mxu3 %vm610_vm1, %v1525_v30  ;;  %2618 = vperm.xlu2 %3707, %v4794_v56   ;;  %v4909_v47 = vpop.permute.xlu0 %1996  ;;  %v4914_v36 = vpop.permute.xlu2 %2298  ;;  %v4940_v30 = vld [vmem:[%s3900_s20 + $0x48] sm:$0xff] }
 0x235   : > { %3542 = vmatmul.msk.f32.gmra.mxu0 %vm610_vm1, %v1819_v29  ;;  %3739 = vset.pattern.permute.xlu0 %v5835_v20  ;;  %vm2041_vm7 = vcmp.eq.s32.totalorder %v4909_v47, %v4200_v61  ;;  %vm2345_vm11 = vcmp.eq.s32.totalorder %v4914_v36, %v4200_v61 }
 0x236   : > { %2699 = vperm.xlu0 %3739, %v4918_v48  }
 0x239   : > { %v1813_v25 = vpop.permute.xlu1 %1812  ;;  %v4949_v50 = vpop.f32.mrf.mxu2 }
 0x23a   : > { %v4925_v0 = vsel %vm1750_vm14, %v1813_v25, 0.0  ;;  %5878 = vst [vmem:[#allocation6_spill] sm:$0xff] %v4949_v50 }
 0x23b   : > { %3708 = vset.pattern.permute.xlu1 %v5835_v20  ;;  %v1822_v20 = vsel %vm1742_vm2, %v4787_v6, 0.0  ;;  %v1823_v6 = vsel %vm1743_vm3, %v4789_v31, 0.0  ;;  %v5886_v31 = vmov 6   ;;  %vm2653_vm3 = vcmp.eq.s32.totalorder %v4861_v19, %v4200_v61 }
 0x23c   : > { %2687 = vperm.xlu1 %3708, %v4684_v41   ;;  %3709 = vset.pattern.permute.xlu2 %v5833_v3  ;;  %v4933_v44 = vpop.permute.xlu0 %2061 }
 0x23d   : > { %3543 = vmatmul.msk.f32.gmra.mxu0 %vm610_vm1, %v1820_v45  ;;  %2008 = vperm.xlu2 %3709, %v4794_v56   ;;  %v4937_v63 = vpop.f32.mrf.mxu3  ;;  %v2668_v52 = vpop.permute.xlu2 %2667  ;;  %v1821_v56 = vsel %vm1741_vm0, %v4854_v51, 0.0  ;;  %v4963_v45 = vld [vmem:[%s3966_s23 + $0x60] sm:$0xff]  ;;  %v3786_v51 = vld [vmem:[%s3966_s23 + $0x30] sm:$0xff] }
 0x23e   : > { %2630 = vperm.xlu0 %3739, %v4940_v30  }
 0x241   : > { %v4980_v50 = vpop.f32.mrf.mxu2 }
 0x242   : > { %v4947_v41 = vpop.permute.xlu1 %1999  ;;  %5882 = vst [vmem:[#allocation11_spill] sm:$0xff] %v4980_v50 }
 0x243   : > { %vm2042_vm9 = vcmp.eq.s32.totalorder %v4947_v41, %v4200_v61 }
 0x244   : > { %3710 = vset.pattern.permute.xlu1 %v5838_v42  ;;  %v4953_v29 = vpop.permute.xlu0 %2065 }
 0x245   : > { %3544 = vmatmul.msk.f32.gmra.mxu0 %vm610_vm1, %v1821_v56  ;;  %2316 = vperm.xlu1 %3710, %v4703_v10   ;;  %v4957_v25 = vpop.f32.mrf.mxu3  ;;  %v4971_v56 = vpop.f32.mrf.mxu0  ;;  %v2122_v41 = vsel %vm2042_vm9, %v4953_v29, 0.0 }
 0x246   : > { %5879 = vst [vmem:[#allocation9_spill] sm:$0xff] %v4957_v25  ;;  %3711 = vset.pattern.permute.xlu2 %v5838_v42  ;;  %v4960_v2 = vpop.permute.xlu2 %2301  ;;  %2715 = vperm.xlu0 %3739, %v4963_v45   ;;  %v5880_v42 = vmov 7   ;;  %v5884_v25 = vmov 5  }
 0x247   : > { %2386 = vperm.xlu2 %3711, %v3786_v51   ;;  %vm2346_vm13 = vcmp.eq.s32.totalorder %v4960_v2, %v4200_v61  ;;  %v748_v2 = vmul.f32 %v4644_v54, %v4644_v54 }
 0x249   : > { %v5002_v7 = vpop.f32.mrf.mxu2 }
 0x24a   : > { %v4967_v3 = vpop.permute.xlu1 %2005  ;;  %5885 = vst [vmem:[#allocation13_spill] sm:$0xff] %v5002_v7 }
 0x24b   : > { %vm2044_vm2 = vcmp.eq.s32.totalorder %v4967_v3, %v4200_v61 }
 0x24c   : > { %v4974_v59 = vpop.permute.xlu0 %2077 }
 0x24d   : > { %3545 = vmatmul.msk.f32.gmra.mxu0 %vm610_vm1, %v1822_v20  ;;  %3712 = vset.pattern.permute.xlu1 %v5880_v42  ;;  %v4978_v33 = vpop.f32.mrf.mxu3  ;;  %v4997_v34 = vpop.f32.mrf.mxu0 }
 0x24e   : > { %5881 = vst [vmem:[#allocation10_spill] sm:$0xff] %v4978_v33  ;;  %2621 = vperm.xlu1 %3712, %v4703_v10   ;;  %2642 = vperm.xlu0 %3739, %v4984_v46  }
 0x24f   : > { %3713 = vset.pattern.permute.xlu2 %v5880_v42  ;;  %v2672_v49 = vpop.permute.xlu2 %2671 }
 0x250   : > { %2691 = vperm.xlu2 %3713, %v3786_v51  }
 0x253   : > { %v2604_v20 = vpop.permute.xlu1 %2603 }
 0x254   : > { %vm2650_vm4 = vcmp.eq.s32.totalorder %v2604_v20, %v4200_v61  ;;  %v4992_v50 = vpop.permute.xlu0 %2011 }
 0x255   : > { %v2730_v10 = vsel %vm2650_vm4, %v2668_v52, 0.0  ;;  %3546 = vmatmul.msk.f32.gmra.mxu0 %vm610_vm1, %v1823_v6  ;;  %v4995_v33 = vpop.f32.mrf.mxu3  ;;  %v5008_v52 = vld [vmem:[%s3966_s23 + $0x68] sm:$0xff]  ;;  %v3789_v6 = vld [vmem:[%s3900_s20 + $0x38] sm:$0xff]  ;;  %v5024_v11 = vpop.f32.mrf.mxu0 }
 0x256   : > { %5883 = vst [vmem:[#allocation12_spill] sm:$0xff] %v4995_v33  ;;  %3714 = vset.pattern.permute.xlu1 %v5884_v25  ;;  %3586 = vmatmul.msk.f32.vlgmr.msra.gmra.mxu3 %vm610_vm1, %v2730_v10 }
 0x257   : > { %2081 = vperm.xlu1 %3714, %v3786_v51   ;;  %3748 = vset.pattern.permute.xlu0 %v5884_v25  ;;  %v1824_v51 = vsel %vm1744_vm5, %v4874_v58, 0.0  ;;  %5888 = vst [vmem:[#allocation15_spill] sm:$0xff] %v5024_v11  ;;  %v5029_v58 = vld [vmem:[%s3900_s20 + $0x70] sm:$0xff] }
 0x258   : > { %3715 = vset.pattern.permute.xlu2 %v5886_v31  ;;  %v5005_v20 = vpop.permute.xlu2 %2370  ;;  %2109 = vperm.xlu0 %3748, %v5008_v52  }
 0x259   : > { %2319 = vperm.xlu2 %3715, %v3789_v6  }
 0x25c   : > { %v2058_v10 = vpop.permute.xlu1 %2057  ;;  %v5018_v33 = vpop.permute.xlu0 %2093 }
 0x25d   : > { %3547 = vmatmul.msk.f32.gmra.mxu0 %vm610_vm1, %v1824_v51  ;;  %v2120_v7 = vsel %vm2040_vm6, %v2058_v10, 0.0  ;;  %v5033_v51 = vpop.f32.mrf.mxu2  ;;  %vm2654_vm6 = vcmp.eq.s32.totalorder %v4883_v39, %v4200_v61 }
 0x25e   : > { %v5020_v26 = vpop.f32.mrf.mxu3  ;;  %3554 = vmatmul.msk.f32.vlgmr.msrb.gmra.mxu1 %vm610_vm1, %v2120_v7  ;;  %5889 = vst [vmem:[#allocation16_spill] sm:$0xff] %v5033_v51  ;;  %v2121_v7 = vsel %vm2041_vm7, %v4933_v44, 0.0  ;;  %v5048_v44 = vpop.f32.mrf.mxu0 }
 0x25f   : > { %5887 = vst [vmem:[#allocation14_spill] sm:$0xff] %v5020_v26  ;;  %3716 = vset.pattern.permute.xlu1 %v5880_v42 }
 0x260   : > { %2624 = vperm.xlu1 %3716, %v3789_v6   ;;  %2035 = vperm.xlu0 %3748, %v5029_v58  }
 0x261   : > { %3717 = vset.pattern.permute.xlu2 %v5880_v42  ;;  %v2676_v8 = vpop.permute.xlu2 %2675 }
 0x262   : > { %2695 = vperm.xlu2 %3717, %v4818_v21  }
 0x264   : > { %v5039_v10 = vpop.permute.xlu0 %2023 }
 0x265   : > { %3548 = vmatmul.msk.f32.gmra.mxu0 %vm610_vm1, %v4811_v28  ;;  %v2607_v47 = vpop.permute.xlu1 %2606 }
 0x266   : > { %vm2651_vm8 = vcmp.eq.s32.totalorder %v2607_v47, %v4200_v61  ;;  %v5042_v26 = vpop.f32.mrf.mxu3  ;;  %3555 = vmatmul.msk.f32.gmra.mxu1 %vm610_vm1, %v2121_v7  ;;  %v5056_v47 = vld [vmem:[%s3966_s23 + $0x78] sm:$0xff] }
 0x267   : > { %5890 = vst [vmem:[#allocation17_spill] sm:$0xff] %v5042_v26  ;;  %v2731_v11 = vsel %vm2651_vm8, %v2672_v49, 0.0  ;;  %v1826_v49 = vsel %vm1746_vm10, %v4809_v40, 0.0  ;;  %v5075_v40 = vpop.f32.mrf.mxu0 }
 0x268   : > { %3718 = vset.pattern.permute.xlu1 %v5884_v25  ;;  %3587 = vmatmul.msk.f32.gmra.mxu3 %vm610_vm1, %v2731_v11 }
 0x269   : > { %2014 = vperm.xlu1 %3718, %v3789_v6   ;;  %3755 = vset.pattern.permute.xlu0 %v5886_v31  ;;  %v1310_v6 = vpop.f32.mrf.mxu2 }
 0x26a   : > { %3719 = vset.pattern.permute.xlu2 %v5884_v25  ;;  %v5053_v28 = vpop.permute.xlu2 %2374  ;;  %2422 = vperm.xlu0 %3755, %v5056_v47  }
 0x26b   : > { %2085 = vperm.xlu2 %3719, %v4818_v21  }
 0x26d   : > { %3549 = vmatmul.msk.f32.gmra.mxu0 %vm610_vm1, %v1826_v49  ;;  %v2363_v11 = vpop.permute.xlu0 %2362 }
 0x26e   : > { %v2425_v7 = vsel %vm2345_vm11, %v2363_v11, 0.0  ;;  %v5067_v51 = vpop.f32.mrf.mxu3  ;;  %3556 = vmatmul.msk.f32.gmra.mxu1 %vm610_vm1, %v2122_v41 }
 0x26f   : > { %v2305_v26 = vpop.permute.xlu1 %2304  ;;  %3570 = vmatmul.msk.f32.vlgmr.msra.gmra.mxu2 %vm610_vm1, %v2425_v7 }
 0x270   : > { %vm2347_vm15 = vcmp.eq.s32.totalorder %v2305_v26, %v4200_v61 }
 0x271   : > { %3720 = vset.pattern.permute.xlu1 %v5886_v31  ;;  %v1313_v29 = vpop.f32.mrf.mxu2 }
 0x272   : > { %2394 = vperm.xlu1 %3720, %v4918_v48   ;;  %3760 = vset.pattern.permute.xlu0 %v5880_v42 }
 0x273   : > { %3721 = vset.pattern.permute.xlu2 %v5880_v42  ;;  %v2070_v27 = vpop.permute.xlu2 %2069 }
 0x274   : > { %2627 = vperm.xlu2 %3721, %v4842_v32   ;;  %v2123_v21 = vsel %vm2043_vm12, %v2070_v27, 0.0  ;;  %v1358_v27 = vmul.f32 %v1310_v6, %v1310_v6  ;;  %vm2046_vm12 = vcmp.eq.s32.totalorder %v4992_v50, %v4200_v61 }
 0x275   : > { %3550 = vmatmul.msk.f32.gmra.mxu0 %vm610_vm1, %v4898_v38  ;;  %v2367_v36 = vpop.permute.xlu0 %2366  ;;  %v1037_v38 = vadd.f32 %v4729_v18, %v4644_v54  ;;  %v2427_v54 = vsel %vm2347_vm15, %v5005_v20, 0.0  ;;  %v1038_v20 = vadd.f32 %v4751_v37, %v4671_v57 }
 0x276   : > { %v2426_v49 = vsel %vm2346_vm13, %v2367_v36, 0.0  ;;  %v5084_v41 = vpop.f32.mrf.mxu3  ;;  %3557 = vmatmul.msk.f32.gmra.mxu1 %vm610_vm1, %v2123_v21  ;;  %v1069_v36 = vadd.f32 %v1053_v24, %v748_v2  ;;  %v1359_v2 = vmul.f32 %v1313_v29, %v1313_v29 }
 0x277   : > { %3571 = vmatmul.msk.f32.gmra.mxu2 %vm610_vm1, %v2426_v49  ;;  %v1342_v49 = vadd.f32 %v1310_v6, %v1037_v38  ;;  %v1054_v6 = vmul.f32 %v4751_v37, %v4751_v37 }
 0x278   : > { %v2610_v11 = vpop.permute.xlu1 %2609  ;;  %v1374_v26 = vadd.f32 %v1358_v27, %v1069_v36  ;;  %v1343_v27 = vadd.f32 %v1313_v29, %v1038_v20 }
 0x279   : > { %vm2652_vm14 = vcmp.eq.s32.totalorder %v2610_v11, %v4200_v61 }
 0x27a   : > { %v2732_v7 = vsel %vm2652_vm14, %v2676_v8, 0.0  ;;  %3722 = vset.pattern.permute.xlu1 %v5884_v25  ;;  %v5105_v8 = vpop.f32.mrf.mxu0 }
 0x27b   : > { %2017 = vperm.xlu1 %3722, %v4842_v32   ;;  %3588 = vmatmul.msk.f32.gmra.mxu3 %vm610_vm1, %v2732_v7  ;;  %v1316_v7 = vpop.f32.mrf.mxu2 }
 0x27c   : > { %3723 = vset.pattern.permute.xlu2 %v5884_v25  ;;  %v5100_v21 = vpop.permute.xlu2 %2378 }
 0x27d   : > { %2089 = vperm.xlu2 %3723, %v4918_v48   ;;  %3551 = vmatmul.msk.f32.gmra.mxu0 %vm610_vm1, %v4833_v9  ;;  %v749_v9 = vmul.f32 %v4671_v57, %v4671_v57 }
 0x27e   : > { %v1615_v18 = vpop.f32.mrf.mxu3 }
 0x27f   : > { %v5108_v32 = vadd.f32 %v1615_v18, %v1342_v49  ;;  %v1663_v11 = vmul.f32 %v1615_v18, %v1615_v18  ;;  %3572 = vmatmul.msk.f32.gmra.mxu2 %vm610_vm1, %v2427_v54  ;;  %v1070_v38 = vadd.f32 %v1054_v6, %v749_v9  ;;  %v750_v6 = vmul.f32 %v4694_v1, %v4694_v1 }
 0x280   : > { %v1360_v9 = vmul.f32 %v1316_v7, %v1316_v7 }
 0x281   : > { %5891 = vst [vmem:[#allocation18_spill] sm:$0xff] %v5108_v32  ;;  %v5113_v24 = vadd.f32 %v1663_v11, %v1374_v26  ;;  %v2308_v48 = vpop.permute.xlu1 %2307  ;;  %v1375_v54 = vadd.f32 %v1359_v2, %v1070_v38 }
 0x282   : > { %vm2348_vm0 = vcmp.eq.s32.totalorder %v2308_v48, %v4200_v61  ;;  %v5133_v3 = vpop.f32.mrf.mxu0  ;;  %v1039_v48 = vadd.f32 %v4770_v55, %v4694_v1 }
 0x283   : > { %5892 = vst [vmem:[#allocation19_spill] sm:$0xff] %v5113_v24  ;;  %3724 = vset.pattern.permute.xlu1 %v5886_v31  ;;  %v2428_v57 = vsel %vm2348_vm0, %v5053_v28, 0.0  ;;  %v1319_v29 = vpop.f32.mrf.mxu2 }
 0x284   : > { %2325 = vperm.xlu1 %3724, %v4940_v30   ;;  %v1344_v2 = vadd.f32 %v1316_v7, %v1039_v48  ;;  %v1056_v7 = vmul.f32 %v4797_v15, %v4797_v15 }
 0x285   : > { %3725 = vset.pattern.permute.xlu2 %v5886_v31  ;;  %3552 = vmatmul.msk.f32.gmra.mxu0 %vm610_vm1, %v4835_v12  ;;  %v2074_v36 = vpop.permute.xlu2 %2073  ;;  %v1055_v12 = vmul.f32 %v4770_v55, %v4770_v55 }
 0x286   : > { %2398 = vperm.xlu2 %3725, %v4718_v17   ;;  %v2124_v37 = vsel %vm2044_vm2, %v2074_v36, 0.0  ;;  %v1618_v49 = vpop.f32.mrf.mxu3 }
 0x287   : > { %v5129_v18 = vadd.f32 %v1618_v49, %v1343_v27  ;;  %v1664_v26 = vmul.f32 %v1618_v49, %v1618_v49  ;;  %3558 = vmatmul.msk.f32.gmra.mxu1 %vm610_vm1, %v2124_v37  ;;  %3573 = vmatmul.msk.f32.gmra.mxu2 %vm610_vm1, %v2428_v57  ;;  %v1071_v19 = vadd.f32 %v1055_v12, %v750_v6 }
 0x288   : > { %v1361_v49 = vmul.f32 %v1319_v29, %v1319_v29 }
 0x289   : > { %5893 = vst [vmem:[#allocation20_spill] sm:$0xff] %v5129_v18  ;;  %v5139_v28 = vadd.f32 %v1664_v26, %v1375_v54  ;;  %v1376_v36 = vadd.f32 %v1360_v9, %v1071_v19  ;;  %v1057_v19 = vmul.f32 %v4821_v35, %v4821_v35 }
 0x28a   : > { %v2680_v11 = vpop.permute.xlu1 %2679 }
 0x28b   : > { %5894 = vst [vmem:[#allocation21_spill] sm:$0xff] %v5139_v28  ;;  %v2733_v20 = vsel %vm2653_vm3, %v2680_v11, 0.0 }
 0x28c   : > { %3726 = vset.pattern.permute.xlu1 %v5880_v42  ;;  %3589 = vmatmul.msk.f32.gmra.mxu3 %vm610_vm1, %v2733_v20  ;;  %v3792_v20 = vld [vmem:[%s3966_s23 + $0x50] sm:$0xff] }
 0x28d   : > { %3553 = vmatmul.msk.f32.gmra.mxu0 %vm610_vm1, %v4925_v0  ;;  %2703 = vperm.xlu1 %3726, %v4718_v17   ;;  %v751_v17 = vmul.f32 %v4724_v53, %v4724_v53  ;;  %v1040_v0 = vadd.f32 %v4797_v15, %v4724_v53 }
 0x28e   : > { %3727 = vset.pattern.permute.xlu2 %v5884_v25  ;;  %v1621_v38 = vpop.f32.mrf.mxu3  ;;  %v5151_v27 = vpop.permute.xlu2 %2618 }
 0x28f   : > { %2020 = vperm.xlu2 %3727, %v4940_v30   ;;  %v5154_v1 = vadd.f32 %v1621_v38, %v1344_v2  ;;  %v1665_v55 = vmul.f32 %v1621_v38, %v1621_v38  ;;  %v1322_v30 = vpop.f32.mrf.mxu2  ;;  %v1072_v26 = vadd.f32 %v1056_v7, %v751_v17  ;;  %v1345_v12 = vadd.f32 %v1319_v29, %v1040_v0 }
 0x290   : > { %v5156_v57 = vpop.f32.mrf.mxu0  ;;  %v1362_v7 = vmul.f32 %v1322_v30, %v1322_v30  ;;  %vm2655_vm8 = vcmp.eq.s32.totalorder %v5151_v27, %v4200_v61 }
 0x291   : > { %v5160_v37 = vadd.f32 %v1665_v55, %v1376_v36  ;;  %v1377_v48 = vadd.f32 %v1361_v49, %v1072_v26  ;;  %v752_v36 = vmul.f32 %v4748_v13, %v4748_v13  ;;  %v1041_v55 = vadd.f32 %v4821_v35, %v4748_v13  ;;  %v2314_v35 = vpop.permute.xlu0 %2313 }
 0x292   : > { %vm2350_vm7 = vcmp.eq.s32.totalorder %v2314_v35, %v4200_v61  ;;  %v754_v35 = vmul.f32 %v4783_v43, %v4783_v43 }
 0x293   : > { %v2311_v54 = vpop.permute.xlu1 %2310  ;;  %v1073_v0 = vadd.f32 %v1057_v19, %v752_v36  ;;  %v1346_v49 = vadd.f32 %v1322_v30, %v1041_v55  ;;  %v1058_v30 = vmul.f32 %v4845_v22, %v4845_v22 }
 0x294   : > { %vm2349_vm4 = vcmp.eq.s32.totalorder %v2311_v54, %v4200_v61 }
 0x295   : > { %v2429_v11 = vsel %vm2349_vm4, %v5100_v21, 0.0  ;;  %3728 = vset.pattern.permute.xlu1 %v5886_v31  ;;  %v5178_v21 = vpop.f32.mrf.mxu1  ;;  %v1378_v39 = vadd.f32 %v1362_v7, %v1073_v0 }
 0x296   : > { %2328 = vperm.xlu1 %3728, %v4738_v23   ;;  %v1624_v6 = vpop.f32.mrf.mxu3  ;;  %3574 = vmatmul.msk.f32.gmra.mxu2 %vm610_vm1, %v2429_v11 }
 0x297   : > { %3729 = vset.pattern.permute.xlu2 %v5886_v31  ;;  %v5172_v53 = vadd.f32 %v1624_v6, %v1345_v12  ;;  %v1666_v15 = vmul.f32 %v1624_v6, %v1624_v6  ;;  %v2009_v9 = vpop.permute.xlu2 %2008  ;;  %v1325_v26 = vpop.f32.mrf.mxu2 }
 0x298   : > { %2402 = vperm.xlu2 %3729, %v3792_v20   ;;  %vm2045_vm5 = vcmp.eq.s32.totalorder %v2009_v9, %v4200_v61  ;;  %v5176_v29 = vpop.f32.mrf.mxu0  ;;  %v1363_v19 = vmul.f32 %v1325_v26, %v1325_v26 }
 0x299   : > { %v5182_v2 = vadd.f32 %v1666_v15, %v1377_v48  ;;  %v2125_v38 = vsel %vm2045_vm5, %v4974_v59, 0.0  ;;  %v753_v15 = vmul.f32 %v4766_v4, %v4766_v4  ;;  %vm2995_vm5 = vcmask 261120  }
 0x29a   : > { %3559 = vmatmul.msk.f32.gmra.mxu1 %vm610_vm1, %v2125_v38 }
 0x29b   : > { %v1074_v38 = vadd.f32 %v1058_v30, %v753_v15  ;;  %v1043_v30 = vadd.f32 %v4877_v14, %v4783_v43 }
 0x29c   : > { %v2684_v17 = vpop.permute.xlu1 %2683 }
 0x29d   : > { %v2734_v54 = vsel %vm2654_vm6, %v2684_v17, 0.0  ;;  %v5206_v9 = vpop.f32.mrf.mxu1  ;;  %v1379_v0 = vadd.f32 %v1363_v19, %v1074_v38 }
 0x29e   : > { %3730 = vset.pattern.permute.xlu1 %v5880_v42  ;;  %v1627_v59 = vpop.f32.mrf.mxu3  ;;  %3590 = vmatmul.msk.f32.gmra.mxu3 %vm610_vm1, %v2734_v54 }
 0x29f   : > { %v5194_v12 = vadd.f32 %v1627_v59, %v1346_v49  ;;  %v1667_v11 = vmul.f32 %v1627_v59, %v1627_v59  ;;  %2633 = vperm.xlu1 %3730, %v4738_v23   ;;  %v1042_v23 = vadd.f32 %v4845_v22, %v4766_v4  ;;  %v1328_v59 = vpop.f32.mrf.mxu2  ;;  %v1059_v4 = vmul.f32 %v4877_v14, %v4877_v14 }
 0x2a0   : > { %3731 = vset.pattern.permute.xlu2 %v5880_v42  ;;  %v5198_v13 = vpop.f32.mrf.mxu0  ;;  %v1364_v15 = vmul.f32 %v1328_v59, %v1328_v59  ;;  %v1348_v19 = vadd.f32 %v1328_v59, %v1043_v30 }
 0x2a1   : > { %v5202_v6 = vadd.f32 %v1667_v11, %v1378_v39  ;;  %2707 = vperm.xlu2 %3731, %v3792_v20   ;;  %v2387_v48 = vpop.permute.xlu2 %2386  ;;  %v1347_v36 = vadd.f32 %v1325_v26, %v1042_v23  ;;  %v3793_v39 = vld [vmem:[%s3900_s20 + $0x58] sm:$0xff]  ;;  %v1075_v23 = vadd.f32 %v1059_v4, %v754_v35 }
 0x2a5   : > { %v2383_v55 = vpop.permute.xlu1 %2382 }
 0x2a6   : > { %v2430_v7 = vsel %vm2350_vm7, %v2383_v55, 0.0  ;;  %v1630_v17 = vpop.f32.mrf.mxu3  ;;  %v1380_v55 = vadd.f32 %v1364_v15, %v1075_v23 }
 0x2a7   : > { %v5211_v49 = vadd.f32 %v1630_v17, %v1347_v36  ;;  %v1668_v54 = vmul.f32 %v1630_v17, %v1630_v17  ;;  %3733 = vset.pattern.permute.xlu1 %v5884_v25  ;;  %3575 = vmatmul.msk.f32.gmra.mxu2 %vm610_vm1, %v2430_v7 }
 0x2a8   : > { %2097 = vperm.xlu1 %3733, %v3792_v20   ;;  %v5227_v20 = vpop.f32.mrf.mxu1 }
 0x2a9   : > { %v5217_v22 = vadd.f32 %v1668_v54, %v1379_v0  ;;  %3734 = vset.pattern.permute.xlu2 %v5886_v31  ;;  %v5220_v26 = vpop.f32.mrf.mxu0  ;;  %v2391_v54 = vpop.permute.xlu0 %2390 }
 0x2aa   : > { %2331 = vperm.xlu2 %3734, %v3793_v39   ;;  %v2692_v11 = vpop.permute.xlu2 %2691 }
 0x2ae   : > { %v2688_v38 = vpop.permute.xlu1 %2687  ;;  %v1633_v36 = vpop.f32.mrf.mxu3 }
 0x2af   : > { %v2735_v7 = vsel %vm2655_vm8, %v2688_v38, 0.0  ;;  %v5231_v17 = vadd.f32 %v1633_v36, %v1348_v19  ;;  %v1669_v0 = vmul.f32 %v1633_v36, %v1633_v36 }
 0x2b0   : > { %3735 = vset.pattern.permute.xlu1 %v5880_v42  ;;  %3591 = vmatmul.msk.f32.gmra.mxu3 %vm610_vm1, %v2735_v7  ;;  %v5241_v59 = vpop.f32.mrf.mxu1 }
 0x2b1   : > { %v5235_v43 = vadd.f32 %v1669_v0, %v1380_v55  ;;  %2636 = vperm.xlu1 %3735, %v3793_v39   ;;  %v5245_v30 = vpop.permute.xlu0 %2322 }
 0x2b2   : > { %v5237_v14 = vpop.f32.mrf.mxu0  ;;  %3736 = vset.pattern.permute.xlu2 %v5880_v42  ;;  %vm2353_vm0 = vcmp.eq.s32.totalorder %v5245_v30, %v4200_v61  ;;  %v1350_v30 = vmul.f32 %v4839_v16, %v4839_v16 }
 0x2b3   : > { %v2320_v27 = vpop.permute.xlu2 %2319  ;;  %2711 = vperm.xlu2 %3736, %v4866_v5  }
 0x2b4   : > { %vm2352_vm10 = vcmp.eq.s32.totalorder %v2320_v27, %v4200_v61 }
 0x2b5   : > { %v2432_v19 = vsel %vm2352_vm10, %v2391_v54, 0.0  ;;  %vm2050_vm10 = vcmp.eq.s32.totalorder %v5039_v10, %v4200_v61 }
 0x2b7   : > { %v2317_v4 = vpop.permute.xlu1 %2316 }
 0x2b8   : > { %vm2351_vm9 = vcmp.eq.s32.totalorder %v2317_v4, %v4200_v61  ;;  %v5253_v36 = vpop.f32.mrf.mxu1 }
 0x2b9   : > { %v2431_v35 = vsel %vm2351_vm9, %v2387_v48, 0.0  ;;  %3737 = vset.pattern.permute.xlu1 %v5884_v25 }
 0x2ba   : > { %v5247_v15 = vpop.f32.mrf.mxu0  ;;  %2026 = vperm.xlu1 %3737, %v3793_v39   ;;  %3576 = vmatmul.msk.f32.gmra.mxu2 %vm610_vm1, %v2431_v35  ;;  %v5262_v39 = vpop.permute.xlu0 %2406 }
 0x2bb   : > { %3738 = vset.pattern.permute.xlu2 %v5884_v25 }
 0x2bc   : > { %v2696_v23 = vpop.permute.xlu2 %2695  ;;  %2101 = vperm.xlu2 %3738, %v4866_v5  }
 0x2c0   : > { %v2622_v38 = vpop.permute.xlu1 %2621  ;;  %v5270_v54 = vpop.f32.mrf.mxu1 }
 0x2c1   : > { %vm2656_vm11 = vcmp.eq.s32.totalorder %v2622_v38, %v4200_v61 }
 0x2c2   : > { %v2736_v48 = vsel %vm2656_vm11, %v2692_v11, 0.0  ;;  %v5256_v55 = vpop.f32.mrf.mxu0  ;;  %3740 = vset.pattern.permute.xlu1 %v5886_v31  ;;  %3577 = vmatmul.msk.f32.gmra.mxu2 %vm610_vm1, %v2432_v19  ;;  %v5276_v27 = vpop.permute.xlu0 %2334 }
 0x2c3   : > { %2410 = vperm.xlu1 %3740, %v4963_v45   ;;  %3592 = vmatmul.msk.f32.gmra.mxu3 %vm610_vm1, %v2736_v48  ;;  %v2989_v48 = vld [vmem:[%s5814_s4 + $0x10] sm:$0xff] }
 0x2c4   : > { %3741 = vset.pattern.permute.xlu2 %v5880_v42 }
 0x2c5   : > { %v2086_v5 = vpop.permute.xlu2 %2085  ;;  %2639 = vperm.xlu2 %3741, %v4889_v62  }
 0x2c8   : > { %v5283_v38 = vpop.f32.mrf.mxu1 }
 0x2c9   : > { %v2082_v11 = vpop.permute.xlu1 %2081 }
 0x2ca   : > { %v2126_v7 = vsel %vm2046_vm12, %v2082_v11, 0.0  ;;  %v5268_v0 = vpop.f32.mrf.mxu0 }
 0x2cb   : > { %3742 = vset.pattern.permute.xlu1 %v5884_v25  ;;  %3560 = vmatmul.msk.f32.gmra.mxu1 %vm610_vm1, %v2126_v7 }
 0x2cc   : > { %2029 = vperm.xlu1 %3742, %v4889_v62   ;;  %v2990_v62 = vld [vmem:[%s5814_s4 + $0x18] sm:$0xff] }
 0x2cd   : > { %3743 = vset.pattern.permute.xlu2 %v5884_v25  ;;  %3056 = vmatpush.msra.mxu0 %v2990_v62 }
 0x2ce   : > { %v2628_v4 = vpop.permute.xlu2 %2627  ;;  %2105 = vperm.xlu2 %3743, %v4963_v45  }
 0x2cf   : > { %vm2658_vm14 = vcmp.eq.s32.totalorder %v2628_v4, %v4200_v61  ;;  %3057 = vmatpush.msra.mxu0 %v2989_v48  ;;  %v2987_v4 = vld [vmem:[%s5814_s4] sm:$0xff] }
 0x2d2   : > { %v5279_v50 = vpop.f32.mrf.mxu0  ;;  %v2625_v35 = vpop.permute.xlu1 %2624 }
 0x2d3   : > { %vm2657_vm13 = vcmp.eq.s32.totalorder %v2625_v35, %v4200_v61  ;;  %v2988_v35 = vld [vmem:[%s5814_s4 + $0x8] sm:$0xff] }
 0x2d4   : > { %v2737_v19 = vsel %vm2657_vm13, %v2696_v23, 0.0  ;;  %3744 = vset.pattern.permute.xlu1 %v5886_v31  ;;  %v2700_v23 = vpop.permute.xlu0 %2699  ;;  %3058 = vmatpush.msra.mxu0 %v2988_v35 }
 0x2d5   : > { %2337 = vperm.xlu1 %3744, %v4984_v46   ;;  %3593 = vmatmul.msk.f32.gmra.mxu3 %vm610_vm1, %v2737_v19  ;;  %v2738_v7 = vsel %vm2658_vm14, %v2700_v23, 0.0  ;;  %v5309_v23 = vpop.f32.mrf.mxu1  ;;  %vm2357_vm14 = vcmp.eq.s32.totalorder %v5276_v27, %v4200_v61 }
 0x2d6   : > { %3745 = vset.pattern.permute.xlu2 %v5886_v31  ;;  %3059 = vmatpush.msra.mxu0 %v2987_v4  ;;  %v1045_v4 = vmul.f32 %v5178_v21, %v5178_v21 }
 0x2d7   : > { %v2090_v45 = vpop.permute.xlu2 %2089  ;;  %2414 = vperm.xlu2 %3745, %v5008_v52  }
 0x2da   : > { %v5296_v11 = vpop.f32.mrf.mxu0 }
 0x2db   : > { %5895 = vst [vmem:[#allocation22_spill] sm:$0xff] %v5296_v11  ;;  %v2015_v19 = vpop.permute.xlu1 %2014 }
 0x2dc   : > { %vm2047_vm15 = vcmp.eq.s32.totalorder %v2015_v19, %v4200_v61 }
 0x2dd   : > { %v2127_v62 = vsel %vm2047_vm15, %v2086_v5, 0.0  ;;  %3746 = vset.pattern.permute.xlu1 %v5880_v42  ;;  %3594 = vmatmul.msk.f32.gmra.mxu3 %vm610_vm1, %v2738_v7 }
 0x2de   : > { %2719 = vperm.xlu1 %3746, %v5008_v52   ;;  %3561 = vmatmul.msk.f32.gmra.mxu1 %vm610_vm1, %v2127_v62 }
 0x2df   : > { %3747 = vset.pattern.permute.xlu2 %v5884_v25 }
 0x2e0   : > { %2032 = vperm.xlu2 %3747, %v4984_v46   ;;  %v5313_v48 = vpop.permute.xlu2 %2398  ;;  %v2201_v46 = vpop.f32.mrf.mxu1 }
 0x2e2   : > { %v1926_v5 = vpop.f32.mrf.mxu0 }
 0x2e3   : > { %v5318_v7 = vadd.f32 %v1926_v5, %v5154_v1  ;;  %v1970_v52 = vmul.f32 %v1926_v5, %v1926_v5  ;;  %v740_v1 = vmul.f32 %v4945_v60, %v4945_v60  ;;  %v5335_v5 = vpop.f32.mrf.mxu3 }
 0x2e4   : > { %v2395_v35 = vpop.permute.xlu1 %2394  ;;  %5898 = vst [vmem:[#allocation25_spill] sm:$0xff] %v5335_v5  ;;  %v1960_v5 = vmul.f32 %v5156_v57, %v5156_v57 }
 0x2e5   : > { %5896 = vst [vmem:[#allocation23_spill] sm:$0xff] %v5318_v7  ;;  %v5321_v19 = vadd.f32 %v1970_v52, %v5160_v37  ;;  %v2433_v62 = vsel %vm2353_vm0, %v2395_v35, 0.0  ;;  %v1029_v37 = vadd.f32 %v5178_v21, %v4945_v60  ;;  %v5338_v52 = vld [vmem:[%s3966_s23 + $0x70] sm:$0xff]  ;;  %v1061_v35 = vadd.f32 %v1045_v4, %v740_v1 }
 0x2e6   : > { %3749 = vset.pattern.permute.xlu1 %v5886_v31  ;;  %3578 = vmatmul.msk.f32.gmra.mxu2 %vm610_vm1, %v2433_v62  ;;  %v1655_v62 = vmul.f32 %v4937_v63, %v4937_v63 }
 0x2e7   : > { %5897 = vst [vmem:[#allocation24_spill] sm:$0xff] %v5321_v19  ;;  %2340 = vperm.xlu1 %3749, %v5029_v58   ;;  %v5343_v19 = vpop.f32.mrf.mxu2  ;;  %v1334_v28 = vadd.f32 %v4839_v16, %v1029_v37  ;;  %v1366_v21 = vadd.f32 %v1350_v30, %v1061_v35  ;;  %v2265_v16 = vmul.f32 %v2201_v46, %v2201_v46 }
 0x2e8   : > { %3750 = vset.pattern.permute.xlu2 %v5886_v31  ;;  %5899 = vst [vmem:[#allocation26_spill] sm:$0xff] %v5343_v19  ;;  %v1046_v19 = vmul.f32 %v5206_v9, %v5206_v9  ;;  %v741_v30 = vmul.f32 %v4971_v56, %v4971_v56 }
 0x2e9   : > { %2418 = vperm.xlu2 %3750, %v5338_v52   ;;  %v2021_v18 = vpop.permute.xlu2 %2020  ;;  %v1639_v24 = vadd.f32 %v4937_v63, %v1334_v28  ;;  %v1671_v32 = vadd.f32 %v1655_v62, %v1366_v21  ;;  %v1030_v63 = vadd.f32 %v5206_v9, %v4971_v56 }
 0x2ea   : > { %v1929_v7 = vpop.f32.mrf.mxu0  ;;  %vm2049_vm3 = vcmp.eq.s32.totalorder %v2021_v18, %v4200_v61 }
 0x2eb   : > { %v5347_v11 = vadd.f32 %v1929_v7, %v5172_v53  ;;  %v1971_v60 = vmul.f32 %v1929_v7, %v1929_v7  ;;  %v1944_v53 = vadd.f32 %v5156_v57, %v1639_v24  ;;  %v1976_v28 = vadd.f32 %v1960_v5, %v1671_v32  ;;  %v2811_v37 = vpop.f32.mrf.mxu3  ;;  %v2204_v24 = vpop.f32.mrf.mxu1 }
 0x2ec   : > { %v1062_v57 = vadd.f32 %v1046_v19, %v741_v30  ;;  %v1047_v19 = vmul.f32 %v5227_v20, %v5227_v20  ;;  %v2875_v30 = vmul.f32 %v2811_v37, %v2811_v37 }
 0x2ed   : > { %v5353_v4 = vadd.f32 %v1971_v60, %v5182_v2  ;;  %v2018_v1 = vpop.permute.xlu1 %2017  ;;  %v742_v2 = vmul.f32 %v4997_v34, %v4997_v34  ;;  %v2249_v35 = vadd.f32 %v2201_v46, %v1944_v53  ;;  %v2281_v56 = vadd.f32 %v2265_v16, %v1976_v28  ;;  %v5902_v53 = vld [vmem:[#allocation9_spill] sm:$0xff] }
 0x2ee   : > { %vm2048_vm2 = vcmp.eq.s32.totalorder %v2018_v1, %v4200_v61  ;;  %v1656_v16 = vmul.f32 %v5902_v53, %v5902_v53 }
 0x2ef   : > { %v2128_v7 = vsel %vm2048_vm2, %v2090_v45, 0.0  ;;  %3751 = vset.pattern.permute.xlu1 %v5880_v42  ;;  %v5900_v45 = vld [vmem:[#allocation8_spill] sm:$0xff] }
 0x2f0   : > { %2645 = vperm.xlu1 %3751, %v5029_v58   ;;  %3562 = vmatmul.msk.f32.gmra.mxu1 %vm610_vm1, %v2128_v7  ;;  %v1335_v62 = vadd.f32 %v5900_v45, %v1030_v63  ;;  %v1351_v60 = vmul.f32 %v5900_v45, %v5900_v45 }
 0x2f1   : > { %3752 = vset.pattern.permute.xlu2 %v5880_v42 }
 0x2f2   : > { %v1932_v32 = vpop.f32.mrf.mxu0  ;;  %v2506_v9 = vpop.f32.mrf.mxu2  ;;  %2723 = vperm.xlu2 %3752, %v5338_v52   ;;  %v1640_v7 = vadd.f32 %v5902_v53, %v1335_v62  ;;  %v1367_v45 = vadd.f32 %v1351_v60, %v1062_v57  ;;  %v1961_v62 = vmul.f32 %v5176_v29, %v5176_v29  ;;  %v2129_v53 = vsel %vm2049_vm3, %v5018_v33, 0.0 }
 0x2f3   : > { %v5374_v58 = vadd.f32 %v1932_v32, %v5194_v12  ;;  %v1972_v5 = vmul.f32 %v1932_v32, %v1932_v32  ;;  %v2554_v21 = vadd.f32 %v2506_v9, %v2249_v35  ;;  %v2570_v46 = vmul.f32 %v2506_v9, %v2506_v9  ;;  %v5376_v1 = vpop.permute.xlu2 %2402  ;;  %v2814_v57 = vpop.f32.mrf.mxu3 }
 0x2f4   : > { %v1031_v35 = vadd.f32 %v5227_v20, %v4997_v34  ;;  %v1945_v32 = vadd.f32 %v5176_v29, %v1640_v7  ;;  %v1063_v20 = vadd.f32 %v1047_v19, %v742_v2  ;;  %v2631_v33 = vpop.permute.xlu0 %2630  ;;  %v2207_v2 = vpop.f32.mrf.mxu1 }
 0x2f5   : > { %5901 = vst [vmem:[#allocation8_spill] sm:$0xff] %v5374_v58  ;;  %v5385_v63 = vadd.f32 %v1972_v5, %v5202_v6  ;;  %v2586_v12 = vadd.f32 %v2570_v46, %v2281_v56  ;;  %v2859_v28 = vadd.f32 %v2811_v37, %v2554_v21  ;;  %v5903_v6 = vld [vmem:[#allocation5_spill] sm:$0xff]  ;;  %v1672_v37 = vadd.f32 %v1656_v16, %v1367_v45  ;;  %v5904_v46 = vld [vmem:[#allocation10_spill] sm:$0xff] }
 0x2f6   : > { %v2326_v9 = vpop.permute.xlu1 %2325  ;;  %v1352_v56 = vmul.f32 %v5903_v6, %v5903_v6  ;;  %v2266_v5 = vmul.f32 %v2204_v24, %v2204_v24  ;;  %v2250_v29 = vadd.f32 %v2204_v24, %v1945_v32  ;;  %v1336_v21 = vadd.f32 %v5903_v6, %v1031_v35 }
 0x2f7   : > { %v2891_v58 = vadd.f32 %v2875_v30, %v2586_v12  ;;  %v2907_v18 = vmul.f32 %v2859_v28, %v2859_v28  ;;  %vm2354_vm4 = vcmp.eq.s32.totalorder %v2326_v9, %v4200_v61  ;;  %v1657_v7 = vmul.f32 %v5904_v46, %v5904_v46  ;;  %v5411_v28 = vld [vmem:[%s3900_s20 + $0x78] sm:$0xff] }
 0x2f8   : > { %v2434_v34 = vsel %vm2354_vm4, %v5313_v48, 0.0  ;;  %3753 = vset.pattern.permute.xlu1 %v5884_v25  ;;  %3563 = vmatmul.msk.f32.gmra.mxu1 %vm610_vm1, %v2129_v53  ;;  %v1977_v48 = vadd.f32 %v1961_v62, %v1672_v37  ;;  %v1368_v35 = vadd.f32 %v1352_v56, %v1063_v20  ;;  %v1962_v45 = vmul.f32 %v5198_v13, %v5198_v13 }
 0x2f9   : > { %v2923_v60 = vsub.f32 %v2907_v18, %v2891_v58  ;;  %2113 = vperm.xlu1 %3753, %v5338_v52   ;;  %3579 = vmatmul.msk.f32.gmra.mxu2 %vm610_vm1, %v2434_v34  ;;  %vm2659_vm6 = vcmp.eq.s32.totalorder %v2631_v33, %v4200_v61  ;;  %v2267_v18 = vmul.f32 %v2207_v2, %v2207_v2 }
 0x2fa   : > { %v1935_v16 = vpop.f32.mrf.mxu0  ;;  %v2509_v30 = vpop.f32.mrf.mxu2  ;;  %3754 = vset.pattern.permute.xlu2 %v5886_v31  ;;  %v2282_v32 = vadd.f32 %v2266_v5, %v1977_v48  ;;  %v1641_v31 = vadd.f32 %v5904_v46, %v1336_v21  ;;  %v1673_v53 = vadd.f32 %v1657_v7, %v1368_v35  ;;  %v2876_v6 = vmul.f32 %v2814_v57, %v2814_v57  ;;  %v5906_v35 = vld [vmem:[#allocation7_spill] sm:$0xff] }
 0x2fb   : > { %v2939_v24 = vmul.f32 0.5, %v2923_v60  ;;  %v5406_v58 = vadd.f32 %v1935_v16, %v5211_v49  ;;  %v1973_v52 = vmul.f32 %v1935_v16, %v1935_v16  ;;  %v2555_v19 = vadd.f32 %v2509_v30, %v2250_v29  ;;  %v5408_v12 = vpop.permute.xlu2 %2707  ;;  %2343 = vperm.xlu2 %3754, %v5411_v28  }
 0x2fc   : > { %v2571_v62 = vmul.f32 %v2509_v30, %v2509_v30  ;;  %v1946_v56 = vadd.f32 %v5198_v13, %v1641_v31  ;;  %v1978_v5 = vadd.f32 %v1962_v45, %v1673_v53  ;;  %v1353_v45 = vmul.f32 %v5906_v35, %v5906_v35 }
 0x2fd   : > { %v5418_v9 = vadd.f32 %v1973_v52, %v5217_v22  ;;  %v2860_v49 = vadd.f32 %v2814_v57, %v2555_v19  ;;  %3602 = vmatmul.msk.f32.vlgmr.msra.gmra.mxu0 %vm2995_vm5, %v2939_v24  ;;  %v1048_v22 = vmul.f32 %v5241_v59, %v5241_v59  ;;  %v5905_v24 = vld [vmem:[#allocation15_spill] sm:$0xff] }
 0x2fe   : > { %v2587_v37 = vadd.f32 %v2571_v62, %v2282_v32  ;;  %v2251_v21 = vadd.f32 %v2207_v2, %v1946_v56  ;;  %v2817_v46 = vpop.f32.mrf.mxu3  ;;  %v2283_v33 = vadd.f32 %v2267_v18, %v1978_v5  ;;  %v743_v52 = vmul.f32 %v5905_v24, %v5905_v24 }
 0x2ff   : > { %v2908_v34 = vmul.f32 %v2860_v49, %v2860_v49  ;;  %v2704_v20 = vpop.permute.xlu1 %2703  ;;  %v1032_v19 = vadd.f32 %v5241_v59, %v5905_v24  ;;  %v2877_v62 = vmul.f32 %v2817_v46, %v2817_v46  ;;  %v2210_v59 = vpop.f32.mrf.mxu1 }
 0x300   : > { %v2892_v29 = vadd.f32 %v2876_v6, %v2587_v37  ;;  %v2739_v60 = vsel %vm2659_vm6, %v2704_v20, 0.0  ;;  %v5907_v6 = vld [vmem:[#allocation12_spill] sm:$0xff] }
 0x301   : > { %3756 = vset.pattern.permute.xlu1 %v5880_v42  ;;  %3595 = vmatmul.msk.f32.gmra.mxu3 %vm610_vm1, %v2739_v60  ;;  %v1337_v18 = vadd.f32 %v5906_v35, %v1032_v19  ;;  %v1658_v37 = vmul.f32 %v5907_v6, %v5907_v6 }
 0x302   : > { %v2924_v7 = vsub.f32 %v2908_v34, %v2892_v29  ;;  %v1938_v57 = vpop.f32.mrf.mxu0  ;;  %2648 = vperm.xlu1 %3756, %v5411_v28   ;;  %v2512_v13 = vpop.f32.mrf.mxu2 }
 0x303   : > { %v5429_v48 = vadd.f32 %v1938_v57, %v5231_v17  ;;  %v1974_v16 = vmul.f32 %v1938_v57, %v1938_v57  ;;  %v2556_v30 = vadd.f32 %v2512_v13, %v2251_v21  ;;  %v2572_v2 = vmul.f32 %v2512_v13, %v2512_v13  ;;  %3757 = vset.pattern.permute.xlu2 %v5880_v42 }
 0x304   : > { %v2940_v32 = vmul.f32 0.5, %v2924_v7  ;;  %2727 = vperm.xlu2 %3757, %v5056_v47   ;;  %v2332_v53 = vpop.permute.xlu2 %2331  ;;  %v1064_v42 = vadd.f32 %v1048_v22, %v743_v52  ;;  %v1642_v5 = vadd.f32 %v5907_v6, %v1337_v18  ;;  %v2268_v22 = vmul.f32 %v2210_v59, %v2210_v59 }
 0x305   : > { %v5440_v17 = vadd.f32 %v1974_v16, %v5235_v43  ;;  %v2588_v31 = vadd.f32 %v2572_v2, %v2283_v33  ;;  %v2861_v49 = vadd.f32 %v2817_v46, %v2556_v30  ;;  %v1963_v43 = vmul.f32 %v5220_v26, %v5220_v26 }
 0x306   : > { %3603 = vmatmul.msk.f32.gmra.mxu0 %vm2995_vm5, %v2940_v32  ;;  %v1369_v20 = vadd.f32 %v1353_v45, %v1064_v42  ;;  %v1947_v46 = vadd.f32 %v5220_v26, %v1642_v5  ;;  %vm2356_vm8 = vcmp.eq.s32.totalorder %v2332_v53, %v4200_v61  ;;  %v5908_v53 = vld [vmem:[#allocation6_spill] sm:$0xff] }
 0x307   : > { %v2893_v56 = vadd.f32 %v2877_v62, %v2588_v31  ;;  %v2909_v34 = vmul.f32 %v2861_v49, %v2861_v49  ;;  %v2436_v45 = vsel %vm2356_vm8, %v5262_v39, 0.0  ;;  %v744_v49 = vmul.f32 %v5048_v44, %v5048_v44 }
 0x308   : > { %v2329_v29 = vpop.permute.xlu1 %2328  ;;  %v1674_v21 = vadd.f32 %v1658_v37, %v1369_v20  ;;  %v2252_v16 = vadd.f32 %v2210_v59, %v1947_v46  ;;  %v1033_v39 = vadd.f32 %v5253_v36, %v5048_v44  ;;  %v1354_v42 = vmul.f32 %v5908_v53, %v5908_v53  ;;  %v5909_v59 = vld [vmem:[#allocation14_spill] sm:$0xff] }
 0x309   : > { %v2925_v60 = vsub.f32 %v2909_v34, %v2893_v56  ;;  %vm2355_vm7 = vcmp.eq.s32.totalorder %v2329_v29, %v4200_v61  ;;  %v1659_v56 = vmul.f32 %v5909_v59, %v5909_v59  ;;  %v2213_v34 = vpop.f32.mrf.mxu1  ;;  %v1964_v44 = vmul.f32 %v5237_v14, %v5237_v14 }
 0x30a   : > { %v2435_v33 = vsel %vm2355_vm7, %v5376_v1, 0.0  ;;  %3758 = vset.pattern.permute.xlu1 %v5884_v25  ;;  %v2515_v7 = vpop.f32.mrf.mxu2  ;;  %v1979_v13 = vadd.f32 %v1963_v43, %v1674_v21  ;;  %v1338_v37 = vadd.f32 %v5908_v53, %v1033_v39  ;;  %v2269_v46 = vmul.f32 %v2213_v34, %v2213_v34  ;;  %v5911_v39 = vld [vmem:[#allocation17_spill] sm:$0xff] }
 0x30b   : > { %v2941_v57 = vmul.f32 0.5, %v2925_v60  ;;  %2038 = vperm.xlu1 %3758, %v5411_v28   ;;  %3580 = vmatmul.msk.f32.gmra.mxu2 %vm610_vm1, %v2435_v33  ;;  %v2573_v30 = vmul.f32 %v2515_v7, %v2515_v7  ;;  %v2557_v24 = vadd.f32 %v2515_v7, %v2252_v16  ;;  %v1660_v53 = vmul.f32 %v5911_v39, %v5911_v39 }
 0x30c   : > { %3759 = vset.pattern.permute.xlu2 %v5884_v25  ;;  %v2284_v26 = vadd.f32 %v2268_v22, %v1979_v13  ;;  %v1643_v5 = vadd.f32 %v5909_v59, %v1338_v37 }
 0x30d   : > { %v2712_v2 = vpop.permute.xlu2 %2711  ;;  %2117 = vperm.xlu2 %3759, %v5056_v47   ;;  %v1049_v47 = vmul.f32 %v5253_v36, %v5253_v36 }
 0x30e   : > { %3604 = vmatmul.msk.f32.gmra.mxu0 %vm2995_vm5, %v2941_v57  ;;  %v2589_v52 = vadd.f32 %v2573_v30, %v2284_v26  ;;  %v1948_v21 = vadd.f32 %v5237_v14, %v1643_v5  ;;  %v1050_v14 = vmul.f32 %v5270_v54, %v5270_v54 }
 0x30f   : > { %v2820_v1 = vpop.f32.mrf.mxu3 }
 0x310   : > { %v2862_v19 = vadd.f32 %v2820_v1, %v2557_v24  ;;  %v2878_v28 = vmul.f32 %v2820_v1, %v2820_v1  ;;  %v2253_v33 = vadd.f32 %v2213_v34, %v1948_v21 }
 0x311   : > { %v2634_v35 = vpop.permute.xlu1 %2633 }
 0x312   : > { %v2894_v32 = vadd.f32 %v2878_v28, %v2589_v52  ;;  %v2910_v62 = vmul.f32 %v2862_v19, %v2862_v19  ;;  %vm2660_vm9 = vcmp.eq.s32.totalorder %v2634_v35, %v4200_v61 }
 0x313   : > { %v2740_v25 = vsel %vm2660_vm9, %v5408_v12, 0.0  ;;  %3581 = vmatmul.msk.f32.gmra.mxu2 %vm610_vm1, %v2436_v45  ;;  %v1065_v12 = vadd.f32 %v1049_v47, %v744_v49  ;;  %v745_v45 = vmul.f32 %v5075_v40, %v5075_v40 }
 0x314   : > { %v2926_v31 = vsub.f32 %v2910_v62, %v2894_v32  ;;  %3596 = vmatmul.msk.f32.gmra.mxu3 %vm610_vm1, %v2740_v25  ;;  %v1034_v32 = vadd.f32 %v5270_v54, %v5075_v40  ;;  %v5910_v62 = vld [vmem:[#allocation11_spill] sm:$0xff]  ;;  %v1965_v54 = vmul.f32 %v5247_v15, %v5247_v15 }
 0x315   : > { %v1370_v20 = vadd.f32 %v1354_v42, %v1065_v12  ;;  %v1355_v25 = vmul.f32 %v5910_v62, %v5910_v62 }
 0x316   : > { %v2942_v18 = vmul.f32 0.5, %v2926_v31  ;;  %v2102_v6 = vpop.permute.xlu2 %2101  ;;  %v2716_v31 = vpop.permute.xlu0 %2715  ;;  %v1339_v49 = vadd.f32 %v5910_v62, %v1034_v32  ;;  %v1661_v62 = vmul.f32 %v5067_v51, %v5067_v51 }
 0x317   : > { %v1675_v60 = vadd.f32 %v1659_v56, %v1370_v20  ;;  %v2216_v42 = vpop.f32.mrf.mxu1 }
 0x318   : > { %3605 = vmatmul.msk.f32.gmra.mxu0 %vm2995_vm5, %v2942_v18  ;;  %v1644_v40 = vadd.f32 %v5911_v39, %v1339_v49  ;;  %v2270_v5 = vmul.f32 %v2216_v42, %v2216_v42 }
 0x319   : > { %v2518_v43 = vpop.f32.mrf.mxu2  ;;  %v1980_v22 = vadd.f32 %v1964_v44, %v1675_v60 }
 0x31a   : > { %v2098_v36 = vpop.permute.xlu1 %2097  ;;  %v2574_v7 = vmul.f32 %v2518_v43, %v2518_v43  ;;  %v2558_v13 = vadd.f32 %v2518_v43, %v2253_v33  ;;  %v1949_v20 = vadd.f32 %v5247_v15, %v1644_v40 }
 0x31b   : > { %v2130_v29 = vsel %vm2050_vm10, %v2098_v36, 0.0  ;;  %v2285_v57 = vadd.f32 %v2269_v46, %v1980_v22 }
 0x31c   : > { %3564 = vmatmul.msk.f32.gmra.mxu1 %vm610_vm1, %v2130_v29  ;;  %v2254_v43 = vadd.f32 %v2216_v42, %v1949_v20 }
 0x31d   : > { %v2590_v10 = vadd.f32 %v2574_v7, %v2285_v57 }
 0x31f   : > { %v2640_v30 = vpop.permute.xlu2 %2639 }
 0x320   : > { %vm2662_vm12 = vcmp.eq.s32.totalorder %v2640_v30, %v4200_v61 }
 0x321   : > { %v2823_v16 = vpop.f32.mrf.mxu3  ;;  %v2742_v12 = vsel %vm2662_vm12, %v2716_v31, 0.0 }
 0x322   : > { %v2863_v26 = vadd.f32 %v2823_v16, %v2558_v13  ;;  %v2879_v24 = vmul.f32 %v2823_v16, %v2823_v16 }
 0x323   : > { %v2637_v1 = vpop.permute.xlu1 %2636 }
 0x324   : > { %v2895_v52 = vadd.f32 %v2879_v24, %v2590_v10  ;;  %v2911_v19 = vmul.f32 %v2863_v26, %v2863_v26  ;;  %vm2661_vm11 = vcmp.eq.s32.totalorder %v2637_v1, %v4200_v61  ;;  %v2643_v10 = vpop.permute.xlu0 %2642  ;;  %v1051_v1 = vmul.f32 %v5283_v38, %v5283_v38 }
 0x325   : > { %v2741_v28 = vsel %vm2661_vm11, %v2712_v2, 0.0  ;;  %v1066_v2 = vadd.f32 %v1050_v14, %v745_v45  ;;  %v5912_v14 = vld [vmem:[#allocation13_spill] sm:$0xff]  ;;  %vm2663_vm3 = vcmp.eq.s32.totalorder %v2643_v10, %v4200_v61 }
 0x326   : > { %v2927_v35 = vsub.f32 %v2911_v19, %v2895_v52  ;;  %3597 = vmatmul.msk.f32.gmra.mxu3 %vm610_vm1, %v2741_v28  ;;  %v746_v19 = vmul.f32 %v5105_v8, %v5105_v8  ;;  %v1035_v28 = vadd.f32 %v5283_v38, %v5105_v8  ;;  %v1966_v8 = vmul.f32 %v5256_v55, %v5256_v55 }
 0x327   : > { %v1371_v37 = vadd.f32 %v1355_v25, %v1066_v2 }
 0x328   : > { %v2943_v47 = vmul.f32 0.5, %v2927_v35  ;;  %v2106_v18 = vpop.permute.xlu2 %2105  ;;  %v1356_v35 = vmul.f32 %v5912_v14, %v5912_v14  ;;  %v1067_v45 = vadd.f32 %v1051_v1, %v746_v19  ;;  %v1340_v32 = vadd.f32 %v5912_v14, %v1035_v28 }
 0x329   : > { %v1676_v34 = vadd.f32 %v1660_v53, %v1371_v37 }
 0x32a   : > { %3606 = vmatmul.msk.f32.gmra.mxu0 %vm2995_vm5, %v2943_v47  ;;  %v2521_v56 = vpop.f32.mrf.mxu2  ;;  %v1372_v47 = vadd.f32 %v1356_v35, %v1067_v45  ;;  %v1645_v31 = vadd.f32 %v5067_v51, %v1340_v32 }
 0x32b   : > { %v1981_v36 = vadd.f32 %v1965_v54, %v1676_v34  ;;  %v2575_v29 = vmul.f32 %v2521_v56, %v2521_v56  ;;  %v2559_v21 = vadd.f32 %v2521_v56, %v2254_v43 }
 0x32c   : > { %v2027_v59 = vpop.permute.xlu1 %2026  ;;  %v2110_v25 = vpop.permute.xlu0 %2109  ;;  %v1677_v2 = vadd.f32 %v1661_v62, %v1372_v47  ;;  %v1950_v49 = vadd.f32 %v5256_v55, %v1645_v31 }
 0x32d   : > { %vm2051_vm13 = vcmp.eq.s32.totalorder %v2027_v59, %v4200_v61  ;;  %v2286_v60 = vadd.f32 %v2270_v5, %v1981_v36 }
 0x32e   : > { %v2131_v44 = vsel %vm2051_vm13, %v2102_v6, 0.0  ;;  %3598 = vmatmul.msk.f32.gmra.mxu3 %vm610_vm1, %v2742_v12  ;;  %v1982_v12 = vadd.f32 %v1966_v8, %v1677_v2 }
 0x32f   : > { %3565 = vmatmul.msk.f32.gmra.mxu1 %vm610_vm1, %v2131_v44  ;;  %v2591_v22 = vadd.f32 %v2575_v29, %v2286_v60 }
 0x331   : > { %v2415_v15 = vpop.permute.xlu2 %2414 }
 0x333   : > { %v2826_v46 = vpop.f32.mrf.mxu3 }
 0x334   : > { %v2864_v33 = vadd.f32 %v2826_v46, %v2559_v21  ;;  %v2880_v7 = vmul.f32 %v2826_v46, %v2826_v46  ;;  %v1052_v46 = vmul.f32 %v5309_v23, %v5309_v23 }
 0x335   : > { %v2411_v57 = vpop.permute.xlu1 %2410 }
 0x336   : > { %v2896_v13 = vadd.f32 %v2880_v7, %v2591_v22  ;;  %v2912_v6 = vmul.f32 %v2864_v33, %v2864_v33  ;;  %v2437_v16 = vsel %vm2357_vm14, %v2411_v57, 0.0  ;;  %v747_v33 = vmul.f32 %v5133_v3, %v5133_v3  ;;  %v5913_v57 = vld [vmem:[#allocation16_spill] sm:$0xff] }
 0x337   : > { %3582 = vmatmul.msk.f32.gmra.mxu2 %vm610_vm1, %v2437_v16  ;;  %v1036_v7 = vadd.f32 %v5309_v23, %v5133_v3 }
 0x338   : > { %v2928_v30 = vsub.f32 %v2912_v6, %v2896_v13  ;;  %v2036_v13 = vpop.permute.xlu0 %2035  ;;  %v1068_v6 = vadd.f32 %v1052_v46, %v747_v33 }
 0x339   : > { %v1341_v16 = vadd.f32 %v5913_v57, %v1036_v7  ;;  %vm2054_vm8 = vcmp.eq.s32.totalorder %v2036_v13, %v4200_v61  ;;  %v5574_v13 = vpop.f32.mrf.mxu0 }
 0x33a   : > { %v2944_v26 = vmul.f32 0.5, %v2928_v30  ;;  %v2033_v52 = vpop.permute.xlu2 %2032  ;;  %v1662_v30 = vmul.f32 %v5084_v41, %v5084_v41 }
 0x33b   : > { %vm2053_vm0 = vcmp.eq.s32.totalorder %v2033_v52, %v4200_v61 }
 0x33c   : > { %3607 = vmatmul.msk.f32.gmra.mxu0 %vm2995_vm5, %v2944_v26  ;;  %v2133_v38 = vsel %vm2053_vm0, %v2110_v25, 0.0  ;;  %v1646_v26 = vadd.f32 %v5084_v41, %v1341_v16 }
 0x33d   : > { %v2524_v42 = vpop.f32.mrf.mxu2 }
 0x33e   : > { %v2030_v24 = vpop.permute.xlu1 %2029  ;;  %v2576_v59 = vmul.f32 %v2524_v42, %v2524_v42  ;;  %v1951_v23 = vadd.f32 %v5268_v0, %v1646_v26 }
 0x33f   : > { %vm2052_vm15 = vcmp.eq.s32.totalorder %v2030_v24, %v4200_v61  ;;  %v1967_v24 = vmul.f32 %v5268_v0, %v5268_v0 }
 0x340   : > { %v2132_v27 = vsel %vm2052_vm15, %v2106_v18, 0.0  ;;  %v2423_v47 = vpop.permute.xlu0 %2422 }
 0x341   : > { %3566 = vmatmul.msk.f32.gmra.mxu1 %vm610_vm1, %v2132_v27 }
 0x343   : > { %v2419_v53 = vpop.permute.xlu2 %2418 }
 0x345   : > { %v2527_v52 = vpop.f32.mrf.mxu2 }
 0x346   : > { %v2829_v51 = vpop.f32.mrf.mxu3  ;;  %v2577_v41 = vmul.f32 %v2527_v52, %v2527_v52 }
 0x347   : > { %v2338_v39 = vpop.permute.xlu1 %2337  ;;  %v2881_v20 = vmul.f32 %v2829_v51, %v2829_v51 }
 0x348   : > { %vm2358_vm2 = vcmp.eq.s32.totalorder %v2338_v39, %v4200_v61  ;;  %v2219_v18 = vpop.f32.mrf.mxu1 }
 0x349   : > { %v2438_v37 = vsel %vm2358_vm2, %v2415_v15, 0.0  ;;  %v2255_v40 = vadd.f32 %v2219_v18, %v1950_v49  ;;  %v2271_v54 = vmul.f32 %v2219_v18, %v2219_v18  ;;  %3567 = vmatmul.msk.f32.gmra.mxu1 %vm610_vm1, %v2133_v38  ;;  %v1357_v15 = vmul.f32 %v5913_v57, %v5913_v57  ;;  %v3128_v38 = vld [vmem:[%s5816_s6 + $0x18] sm:$0xff] }
 0x34a   : > { %3583 = vmatmul.msk.f32.gmra.mxu2 %vm610_vm1, %v2438_v37  ;;  %3193 = vmatpush.msra.mxu1 %v3128_v38  ;;  %v3126_v37 = vld [vmem:[%s5816_s6 + $0x8] sm:$0xff] }
 0x34b   : > { %v2287_v56 = vadd.f32 %v2271_v54, %v1982_v12  ;;  %v2560_v34 = vadd.f32 %v2524_v42, %v2255_v40  ;;  %v1373_v10 = vadd.f32 %v1357_v15, %v1068_v6  ;;  %v3127_v42 = vld [vmem:[%s5816_s6 + $0x10] sm:$0xff]  ;;  %v3125_v54 = vld [vmem:[%s5816_s6] sm:$0xff] }
 0x34c   : > { %v2724_v21 = vpop.permute.xlu2 %2723  ;;  %3194 = vmatpush.msra.mxu1 %v3127_v42 }
 0x34d   : > { %v2592_v55 = vadd.f32 %v2576_v59, %v2287_v56  ;;  %v2865_v5 = vadd.f32 %v2829_v51, %v2560_v34  ;;  %v1678_v3 = vadd.f32 %v1662_v30, %v1373_v10  ;;  %v1968_v51 = vmul.f32 %v5279_v50, %v5279_v50  ;;  %v5914_v56 = vld [vmem:[#allocation18_spill] sm:$0xff] }
 0x34e   : > { %3195 = vmatpush.msra.mxu1 %v3126_v37  ;;  %v1952_v34 = vadd.f32 %v5279_v50, %v5914_v56 }
 0x34f   : > { %v2897_v44 = vadd.f32 %v2881_v20, %v2592_v55  ;;  %v2913_v36 = vmul.f32 %v2865_v5, %v2865_v5  ;;  %v1983_v14 = vadd.f32 %v1967_v24, %v1678_v3 }
 0x350   : > { %v2720_v43 = vpop.permute.xlu1 %2719  ;;  %3196 = vmatpush.msra.mxu1 %v3125_v54 }
 0x351   : > { %v2743_v29 = vsel %vm2663_vm3, %v2720_v43, 0.0  ;;  %v2929_v60 = vsub.f32 %v2913_v36, %v2897_v44  ;;  %v5915_v44 = vld [vmem:[#allocation19_spill] sm:$0xff] }
 0x352   : > { %3599 = vmatmul.msk.f32.gmra.mxu3 %vm610_vm1, %v2743_v29  ;;  %v1984_v36 = vadd.f32 %v1968_v51, %v5915_v44  ;;  %v5919_v44 = vld [vmem:[#allocation23_spill] sm:$0xff] }
 0x353   : > { %v2945_v22 = vmul.f32 0.5, %v2929_v60 }
 0x355   : > { %3608 = vmatmul.msk.f32.gmra.mxu0 %vm2995_vm5, %v2945_v22  ;;  %v2344_v28 = vpop.permute.xlu2 %2343 }
 0x356   : > { %vm2360_vm6 = vcmp.eq.s32.totalorder %v2344_v28, %v4200_v61 }
 0x357   : > { %v2440_v2 = vsel %vm2360_vm6, %v2423_v47, 0.0 }
 0x358   : > { %v2832_v32 = vpop.f32.mrf.mxu3 }
 0x359   : > { %v2341_v1 = vpop.permute.xlu1 %2340  ;;  %v2882_v31 = vmul.f32 %v2832_v32, %v2832_v32 }
 0x35a   : > { %vm2359_vm4 = vcmp.eq.s32.totalorder %v2341_v1, %v4200_v61 }
 0x35b   : > { %v2439_v27 = vsel %vm2359_vm4, %v2419_v53, 0.0  ;;  %v2222_v19 = vpop.f32.mrf.mxu1 }
 0x35c   : > { %v2256_v35 = vadd.f32 %v2222_v19, %v1951_v23  ;;  %v2272_v45 = vmul.f32 %v2222_v19, %v2222_v19  ;;  %3584 = vmatmul.msk.f32.gmra.mxu2 %vm610_vm1, %v2439_v27  ;;  %v5916_v23 = vld [vmem:[#allocation22_spill] sm:$0xff]  ;;  %v5584_v19 = vld [vmem:[%s5815_s5] ss:$0 sm:$0xff] }
 0x35e   : > { %v2288_v62 = vadd.f32 %v2272_v45, %v1983_v14  ;;  %v2561_v25 = vadd.f32 %v2527_v52, %v2256_v35  ;;  %v2728_v15 = vpop.permute.xlu2 %2727  ;;  %v1969_v52 = vmul.f32 %v5916_v23, %v5916_v23  ;;  %v5917_v14 = vld [vmem:[#allocation20_spill] sm:$0xff] }
 0x35f   : > { %v1953_v35 = vadd.f32 %v5916_v23, %v5917_v14 }
 0x360   : > { %v2593_v0 = vadd.f32 %v2577_v41, %v2288_v62  ;;  %v2866_v8 = vadd.f32 %v2832_v32, %v2561_v25  ;;  %v2835_v60 = vpop.f32.mrf.mxu3  ;;  %v5918_v41 = vld [vmem:[#allocation21_spill] sm:$0xff] }
 0x361   : > { %v2883_v33 = vmul.f32 %v2835_v60, %v2835_v60  ;;  %v1985_v62 = vadd.f32 %v1969_v52, %v5918_v41 }
 0x362   : > { %v2898_v49 = vadd.f32 %v2882_v31, %v2593_v0  ;;  %v2914_v39 = vmul.f32 %v2866_v8, %v2866_v8  ;;  %v2646_v53 = vpop.permute.xlu1 %2645 }
 0x363   : > { %vm2664_vm7 = vcmp.eq.s32.totalorder %v2646_v53, %v4200_v61 }
 0x364   : > { %v2744_v18 = vsel %vm2664_vm7, %v2724_v21, 0.0  ;;  %v2930_v12 = vsub.f32 %v2914_v39, %v2898_v49  ;;  %3585 = vmatmul.msk.f32.gmra.mxu2 %vm610_vm1, %v2440_v2 }
 0x365   : > { %3600 = vmatmul.msk.f32.gmra.mxu3 %vm610_vm1, %v2744_v18 }
 0x366   : > { %v2946_v40 = vmul.f32 0.5, %v2930_v12 }
 0x367   : > { %v2118_v3 = vpop.permute.xlu2 %2117 }
 0x368   : > { %3609 = vmatmul.msk.f32.gmra.mxu0 %vm2995_vm5, %v2946_v40 }
 0x369   : > { %v2530_v55 = vpop.f32.mrf.mxu2 }
 0x36a   : > { %v2578_v21 = vmul.f32 %v2530_v55, %v2530_v55 }
 0x36b   : > { %v2114_v59 = vpop.permute.xlu1 %2113 }
 0x36c   : > { %v2134_v20 = vsel %vm2054_vm8, %v2114_v59, 0.0 }
 0x36d   : > { %v2225_v5 = vpop.f32.mrf.mxu1  ;;  %3568 = vmatmul.msk.f32.gmra.mxu1 %vm610_vm1, %v2134_v20 }
 0x36e   : > { %v2257_v43 = vadd.f32 %v2225_v5, %v1952_v34  ;;  %v2273_v29 = vmul.f32 %v2225_v5, %v2225_v5 }
 0x370   : > { %v2289_v46 = vadd.f32 %v2273_v29, %v1984_v36  ;;  %v2562_v22 = vadd.f32 %v2530_v55, %v2257_v43 }
 0x372   : > { %v2594_v7 = vadd.f32 %v2578_v21, %v2289_v46  ;;  %v2867_v57 = vadd.f32 %v2835_v60, %v2562_v22  ;;  %v5920_v21 = vld [vmem:[#allocation24_spill] sm:$0xff] }
 0x374   : > { %v2899_v50 = vadd.f32 %v2883_v33, %v2594_v7  ;;  %v2915_v6 = vmul.f32 %v2867_v57, %v2867_v57  ;;  %v2649_v16 = vpop.permute.xlu1 %2648 }
 0x375   : > { %vm2665_vm9 = vcmp.eq.s32.totalorder %v2649_v16, %v4200_v61  ;;  %v2228_v1 = vpop.f32.mrf.mxu1 }
 0x376   : > { %v2745_v30 = vsel %vm2665_vm9, %v2728_v15, 0.0  ;;  %v2931_v10 = vsub.f32 %v2915_v6, %v2899_v50  ;;  %v2274_v45 = vmul.f32 %v2228_v1, %v2228_v1  ;;  %v2258_v25 = vadd.f32 %v2228_v1, %v1953_v35 }
 0x377   : > { %3601 = vmatmul.msk.f32.gmra.mxu3 %vm610_vm1, %v2745_v30 }
 0x378   : > { %v2947_v26 = vmul.f32 0.5, %v2931_v10  ;;  %v2290_v0 = vadd.f32 %v2274_v45, %v1985_v62 }
 0x37a   : > { %3610 = vmatmul.msk.f32.gmra.mxu0 %vm2995_vm5, %v2947_v26  ;;  %v3061_v24 = vpop.f32.mrf.mxu0 }
 0x37b   : > { %v3062_v31 = vadd.f32 %v5584_v19, %v3061_v24 }
 0x37c   : > { %v2533_v28 = vpop.f32.mrf.mxu2 }
 0x37d   : > { %v2039_v27 = vpop.permute.xlu1 %2038  ;;  %v2579_v47 = vmul.f32 %v2533_v28, %v2533_v28  ;;  %v2563_v8 = vadd.f32 %v2533_v28, %v2258_v25  ;;  %v3109_v53 = vmax.f32 %v3062_v31, 0.0 }
 0x37e   : > { %vm2055_vm10 = vcmp.eq.s32.totalorder %v2039_v27, %v4200_v61 }
 0x37f   : > { %v2135_v32 = vsel %vm2055_vm10, %v2118_v3, 0.0  ;;  %v2595_v2 = vadd.f32 %v2579_v47, %v2290_v0 }
 0x380   : > { %3569 = vmatmul.msk.f32.gmra.mxu1 %vm610_vm1, %v2135_v32  ;;  %vm3364_vm1 = vcmask 64512  }
 0x383   : > { %v3064_v49 = vpop.f32.mrf.mxu0 }
 0x384   : > { %v2838_v38 = vpop.f32.mrf.mxu3  ;;  %v3065_v37 = vadd.f32 %v5584_v19, %v3064_v49  ;;  %v5921_v49 = vld [vmem:[#allocation8_spill] sm:$0xff] }
 0x385   : > { %v2868_v39 = vadd.f32 %v2838_v38, %v2563_v8  ;;  %v2884_v61 = vmul.f32 %v2838_v38, %v2838_v38 }
 0x386   : > { %v3110_v54 = vmax.f32 %v3065_v37, 0.0 }
 0x387   : > { %v2900_v42 = vadd.f32 %v2884_v61, %v2595_v2  ;;  %v2916_v18 = vmul.f32 %v2868_v39, %v2868_v39 }
 0x388   : > { %3618 = vmatmul.msk.f32.vlgmr.msra.gmra.mxu1 %vm2995_vm5, %v3109_v53 }
 0x389   : > { %v2932_v12 = vsub.f32 %v2916_v18, %v2900_v42 }
 0x38b   : > { %v2948_v40 = vmul.f32 0.5, %v2932_v12  ;;  %v3067_v51 = vpop.f32.mrf.mxu0 }
 0x38c   : > { %v3068_v59 = vadd.f32 %v5584_v19, %v3067_v51 }
 0x38d   : > { %3611 = vmatmul.msk.f32.gmra.mxu0 %vm2995_vm5, %v2948_v40 }
 0x38e   : > { %v3111_v56 = vmax.f32 %v3068_v59, 0.0  ;;  %v2536_v20 = vpop.f32.mrf.mxu2 }
 0x38f   : > { %v2580_v60 = vmul.f32 %v2536_v20, %v2536_v20 }
 0x390   : > { %3619 = vmatmul.msk.f32.gmra.mxu1 %vm2995_vm5, %v3110_v54 }
 0x395   : > { %v3070_v34 = vpop.f32.mrf.mxu0 }
 0x396   : > { %v3071_v5 = vadd.f32 %v5584_v19, %v3070_v34  ;;  %v2539_v1 = vpop.f32.mrf.mxu2 }
 0x397   : > { %v2841_v29 = vpop.f32.mrf.mxu3  ;;  %v2581_v28 = vmul.f32 %v2539_v1, %v2539_v1 }
 0x398   : > { %3620 = vmatmul.msk.f32.gmra.mxu1 %vm2995_vm5, %v3111_v56  ;;  %v3112_v33 = vmax.f32 %v3071_v5, 0.0  ;;  %v2885_v7 = vmul.f32 %v2841_v29, %v2841_v29 }
 0x399   : > { %v2231_v55 = vpop.f32.mrf.mxu1 }
 0x39a   : > { %v2259_v36 = vadd.f32 %v2231_v55, %v5919_v44  ;;  %v2275_v43 = vmul.f32 %v2231_v55, %v2231_v55 }
 0x39c   : > { %v2291_v46 = vadd.f32 %v2275_v43, %v5920_v21  ;;  %v2564_v22 = vadd.f32 %v2536_v20, %v2259_v36 }
 0x39e   : > { %v2596_v57 = vadd.f32 %v2580_v60, %v2291_v46  ;;  %v2869_v15 = vadd.f32 %v2841_v29, %v2564_v22 }
 0x3a0   : > { %v2901_v50 = vadd.f32 %v2885_v7, %v2596_v57  ;;  %v2917_v6 = vmul.f32 %v2869_v15, %v2869_v15  ;;  %3621 = vmatmul.msk.f32.gmra.mxu1 %vm2995_vm5, %v3112_v33 }
 0x3a2   : > { %v2933_v16 = vsub.f32 %v2917_v6, %v2901_v50 }
 0x3a4   : > { %v2949_v30 = vmul.f32 0.5, %v2933_v16 }
 0x3a6   : > { %3612 = vmatmul.msk.f32.gmra.mxu0 %vm2995_vm5, %v2949_v30 }
 0x3a7   : > { %v3073_v10 = vpop.f32.mrf.mxu0 }
 0x3a8   : > { %v3074_v26 = vadd.f32 %v5584_v19, %v3073_v10 }
 0x3a9   : > { %v2844_v27 = vpop.f32.mrf.mxu3 }
 0x3aa   : > { %v3113_v24 = vmax.f32 %v3074_v26, 0.0  ;;  %v2886_v45 = vmul.f32 %v2844_v27, %v2844_v27 }
 0x3ac   : > { %v2234_v3 = vpop.f32.mrf.mxu1  ;;  %3622 = vmatmul.msk.f32.gmra.mxu1 %vm2995_vm5, %v3113_v24 }
 0x3ad   : > { %v2260_v23 = vadd.f32 %v2234_v3, %v5347_v11  ;;  %v2276_v52 = vmul.f32 %v2234_v3, %v2234_v3 }
 0x3af   : > { %v2292_v14 = vadd.f32 %v2276_v52, %v5353_v4  ;;  %v2565_v35 = vadd.f32 %v2539_v1, %v2260_v23 }
 0x3b1   : > { %v2597_v32 = vadd.f32 %v2581_v28, %v2292_v14  ;;  %v2870_v41 = vadd.f32 %v2844_v27, %v2565_v35  ;;  %v2847_v61 = vpop.f32.mrf.mxu3 }
 0x3b2   : > { %v2887_v12 = vmul.f32 %v2847_v61, %v2847_v61 }
 0x3b3   : > { %v2902_v62 = vadd.f32 %v2886_v45, %v2597_v32  ;;  %v2918_v25 = vmul.f32 %v2870_v41, %v2870_v41  ;;  %v5922_v32 = vld [vmem:[#allocation4_spill] sm:$0xff] }
 0x3b4   : > { %v1060_v41 = vmul.f32 %v5922_v32, %v5922_v32 }
 0x3b5   : > { %v2934_v47 = vsub.f32 %v2918_v25, %v2902_v62  ;;  %v5923_v25 = vld [vmem:[#allocation3_spill] sm:$0xff] }
 0x3b7   : > { %v2950_v31 = vmul.f32 0.5, %v2934_v47  ;;  %v755_v47 = vmul.f32 %v5923_v25, %v5923_v25 }
 0x3b9   : > { %v3076_v0 = vpop.f32.mrf.mxu0  ;;  %3613 = vmatmul.msk.f32.gmra.mxu0 %vm2995_vm5, %v2950_v31  ;;  %v5924_v31 = vld [vmem:[#allocation26_spill] sm:$0xff] }
 0x3ba   : > { %v3077_v8 = vadd.f32 %v5584_v19, %v3076_v0  ;;  %v2542_v11 = vpop.f32.mrf.mxu2 }
 0x3bb   : > { %v2582_v53 = vmul.f32 %v2542_v11, %v2542_v11 }
 0x3bc   : > { %v3114_v38 = vmax.f32 %v3077_v8, 0.0  ;;  %v1076_v8 = vadd.f32 %v1060_v41, %v755_v47 }
 0x3be   : > { %v2237_v2 = vpop.f32.mrf.mxu1  ;;  %3623 = vmatmul.msk.f32.gmra.mxu1 %vm2995_vm5, %v3114_v38 }
 0x3bf   : > { %v2261_v4 = vadd.f32 %v2237_v2, %v5921_v49  ;;  %v2277_v39 = vmul.f32 %v2237_v2, %v2237_v2 }
 0x3c1   : > { %v2293_v42 = vadd.f32 %v2277_v39, %v5385_v63  ;;  %v2566_v18 = vadd.f32 %v2542_v11, %v2261_v4  ;;  %v5925_v11 = vld [vmem:[#allocation25_spill] sm:$0xff] }
 0x3c2   : > { %v1670_v2 = vmul.f32 %v5925_v11, %v5925_v11 }
 0x3c3   : > { %v2598_v37 = vadd.f32 %v2582_v53, %v2293_v42  ;;  %v2871_v40 = vadd.f32 %v2847_v61, %v2566_v18  ;;  %v1975_v61 = vmul.f32 %v5574_v13, %v5574_v13 }
 0x3c5   : > { %v2903_v54 = vadd.f32 %v2887_v12, %v2598_v37  ;;  %v2919_v51 = vmul.f32 %v2871_v40, %v2871_v40 }
 0x3c6   : > { %v2240_v34 = vpop.f32.mrf.mxu1 }
 0x3c7   : > { %v2935_v59 = vsub.f32 %v2919_v51, %v2903_v54  ;;  %v2278_v55 = vmul.f32 %v2240_v34, %v2240_v34  ;;  %v2262_v5 = vadd.f32 %v2240_v34, %v5406_v58 }
 0x3c9   : > { %v2951_v56 = vmul.f32 0.5, %v2935_v59  ;;  %v2294_v63 = vadd.f32 %v2278_v55, %v5418_v9 }
 0x3cb   : > { %3614 = vmatmul.msk.f32.gmra.mxu0 %vm2995_vm5, %v2951_v56 }
 0x3cd   : > { %v2545_v20 = vpop.f32.mrf.mxu2 }
 0x3ce   : > { %v2583_v44 = vmul.f32 %v2545_v20, %v2545_v20  ;;  %v2567_v29 = vadd.f32 %v2545_v20, %v2262_v5 }
 0x3d0   : > { %v2599_v46 = vadd.f32 %v2583_v44, %v2294_v63 }
 0x3d2   : > { %v3079_v36 = vpop.f32.mrf.mxu0 }
 0x3d3   : > { %v3080_v43 = vadd.f32 %v5584_v19, %v3079_v36  ;;  %v5643_v36 = vld [vmem:[%s5817_s7] ss:$0 sm:$0xff] }
 0x3d5   : > { %v3115_v60 = vmax.f32 %v3080_v43, 0.0  ;;  %v2850_v21 = vpop.f32.mrf.mxu3 }
 0x3d6   : > { %v2872_v22 = vadd.f32 %v2850_v21, %v2567_v29  ;;  %v2888_v33 = vmul.f32 %v2850_v21, %v2850_v21 }
 0x3d7   : > { %3624 = vmatmul.msk.f32.gmra.mxu1 %vm2995_vm5, %v3115_v60  ;;  %v5649_v60 = vld [vmem:[%s5818_s8] ss:$0 sm:$0xff] }
 0x3d8   : > { %v2904_v7 = vadd.f32 %v2888_v33, %v2599_v46  ;;  %v2920_v57 = vmul.f32 %v2872_v22, %v2872_v22 }
 0x3da   : > { %v2936_v15 = vsub.f32 %v2920_v57, %v2904_v7 }
 0x3dc   : > { %v2952_v50 = vmul.f32 0.5, %v2936_v15 }
 0x3de   : > { %3615 = vmatmul.msk.f32.gmra.mxu0 %vm2995_vm5, %v2952_v50 }
 0x3df   : > { %v2548_v30 = vpop.f32.mrf.mxu2 }
 0x3e0   : > { %v2584_v1 = vmul.f32 %v2548_v30, %v2548_v30 }
 0x3e5   : > { %v3082_v58 = vpop.f32.mrf.mxu0 }
 0x3e6   : > { %v3083_v6 = vadd.f32 %v5584_v19, %v3082_v58 }
 0x3e7   : > { %v2551_v12 = vpop.f32.mrf.mxu2 }
 0x3e8   : > { %v3116_v16 = vmax.f32 %v3083_v6, 0.0  ;;  %v2853_v24 = vpop.f32.mrf.mxu3  ;;  %v2585_v56 = vmul.f32 %v2551_v12, %v2551_v12 }
 0x3e9   : > { %v2889_v52 = vmul.f32 %v2853_v24, %v2853_v24 }
 0x3ea   : > { %v2243_v9 = vpop.f32.mrf.mxu1  ;;  %3625 = vmatmul.msk.f32.gmra.mxu1 %vm2995_vm5, %v3116_v16 }
 0x3eb   : > { %v2263_v10 = vadd.f32 %v2243_v9, %v5429_v48  ;;  %v2279_v26 = vmul.f32 %v2243_v9, %v2243_v9  ;;  %v1044_v48 = vadd.f32 %v5922_v32, %v5923_v25 }
 0x3ed   : > { %v2295_v3 = vadd.f32 %v2279_v26, %v5440_v17  ;;  %v2568_v23 = vadd.f32 %v2548_v30, %v2263_v10  ;;  %v1365_v17 = vmul.f32 %v5924_v31, %v5924_v31  ;;  %v1349_v38 = vadd.f32 %v5924_v31, %v1044_v48 }
 0x3ef   : > { %v2600_v27 = vadd.f32 %v2584_v1, %v2295_v3  ;;  %v2873_v28 = vadd.f32 %v2853_v24, %v2568_v23  ;;  %v1381_v4 = vadd.f32 %v1365_v17, %v1076_v8  ;;  %v1654_v39 = vadd.f32 %v5925_v11, %v1349_v38 }
 0x3f1   : > { %v2905_v14 = vadd.f32 %v2889_v52, %v2600_v27  ;;  %v2921_v35 = vmul.f32 %v2873_v28, %v2873_v28  ;;  %v1686_v42 = vadd.f32 %v1670_v2, %v1381_v4  ;;  %v1959_v18 = vadd.f32 %v5574_v13, %v1654_v39 }
 0x3f3   : > { %v2937_v45 = vsub.f32 %v2921_v35, %v2905_v14  ;;  %v1991_v40 = vadd.f32 %v1975_v61, %v1686_v42 }
 0x3f5   : > { %v2953_v62 = vmul.f32 0.5, %v2937_v45 }
 0x3f7   : > { %v3085_v0 = vpop.f32.mrf.mxu0  ;;  %3616 = vmatmul.msk.f32.gmra.mxu0 %vm2995_vm5, %v2953_v62 }
 0x3f8   : > { %v3086_v49 = vadd.f32 %v5584_v19, %v3085_v0 }
 0x3fa   : > { %v3117_v53 = vmax.f32 %v3086_v49, 0.0  ;;  %v2856_v59 = vpop.f32.mrf.mxu3 }
 0x3fb   : > { %v2890_v55 = vmul.f32 %v2856_v59, %v2856_v59 }
 0x3fc   : > { %3626 = vmatmul.msk.f32.gmra.mxu1 %vm2995_vm5, %v3117_v53 }
 0x3fd   : > { %v2246_v37 = vpop.f32.mrf.mxu1 }
 0x3fe   : > { %v2264_v54 = vadd.f32 %v2246_v37, %v1959_v18  ;;  %v2280_v51 = vmul.f32 %v2246_v37, %v2246_v37 }
 0x400   : > { %v2296_v34 = vadd.f32 %v2280_v51, %v1991_v40  ;;  %v2569_v20 = vadd.f32 %v2551_v12, %v2264_v54 }
 0x402   : > { %v2601_v5 = vadd.f32 %v2585_v56, %v2296_v34  ;;  %v2874_v44 = vadd.f32 %v2856_v59, %v2569_v20 }
 0x404   : > { %v2906_v13 = vadd.f32 %v2890_v55, %v2601_v5  ;;  %v2922_v43 = vmul.f32 %v2874_v44, %v2874_v44 }
 0x405   : > { %v3198_v63 = vpop.f32.mrf.mxu1 }
 0x406   : > { %v3199_v29 = vadd.f32 %v5643_v36, %v3198_v63  ;;  %v2938_v21 = vsub.f32 %v2922_v43, %v2906_v13 }
 0x408   : > { %v3246_v46 = vmax.f32 %v3199_v29, 0.0  ;;  %v2954_v22 = vmul.f32 0.5, %v2938_v21  ;;  %v2955_v29 = vld [vmem:[%s5690_s29] sm:$0xff] }
 0x40a   : > { %v3266_v33 = vmul.f32 %v5649_v60, %v3246_v46  ;;  %v3088_v7 = vpop.f32.mrf.mxu0  ;;  %3617 = vmatmul.msk.f32.gmra.mxu0 %vm2995_vm5, %v2954_v22  ;;  %v3796_v46 = vld [vmem:[%s3966_s23] sm:$0xff] }
 0x40b   : > { %v3089_v57 = vadd.f32 %v5584_v19, %v3088_v7  ;;  %v2971_v22 = vmul.f32 %v3796_v46, %v2955_v29  ;;  %v5697_v7 = vstv %s3346_s30 }
 0x40c   : > { %v3282_v15 = vsel %vm2995_vm5, %v3266_v33, 0.0 }
 0x40d   : > { %v3118_v50 = vmax.f32 %v3089_v57, 0.0  ;;  %v3201_v58 = vpop.f32.mrf.mxu1  ;;  %3283 = vadd.xlane.f32.xlu0 %v3282_v15 }
 0x40e   : > { %v3202_v6 = vadd.f32 %v5643_v36, %v3201_v58  ;;  %v2956_v58 = vld [vmem:[%s5690_s29 + $0x8] sm:$0xff] }
 0x40f   : > { %3627 = vmatmul.msk.f32.gmra.mxu1 %vm2995_vm5, %v3118_v50 }
 0x410   : > { %v3247_v16 = vmax.f32 %v3202_v6, 0.0 }
 0x412   : > { %v3267_v30 = vmul.f32 %v5649_v60, %v3247_v16  ;;  %v3797_v16 = vld [vmem:[%s3966_s23 + $0x8] sm:$0xff] }
 0x414   : > { %v3285_v9 = vsel %vm2995_vm5, %v3267_v30, 0.0  ;;  %v2972_v30 = vmul.f32 %v3797_v16, %v2956_v58  ;;  %v3803_v16 = vld [vmem:[%s3966_s23 + $0x38] sm:$0xff] }
 0x415   : > { %v3204_v10 = vpop.f32.mrf.mxu1  ;;  %3286 = vadd.xlane.f32.xlu1 %v3285_v9 }
 0x416   : > { %v3205_v26 = vadd.f32 %v5643_v36, %v3204_v10 }
 0x418   : > { %v3248_v24 = vmax.f32 %v3205_v26, 0.0 }
 0x41a   : > { %v3268_v1 = vmul.f32 %v5649_v60, %v3248_v24 }
 0x41c   : > { %v3288_v3 = vsel %vm2995_vm5, %v3268_v1, 0.0 }
 0x41d   : > { %v3207_v23 = vpop.f32.mrf.mxu1  ;;  %3289 = vadd.xlane.f32.xlu2 %v3288_v3  ;;  %v2957_v3 = vld [vmem:[%s5690_s29 + $0x10] sm:$0xff] }
 0x41e   : > { %v3208_v52 = vadd.f32 %v5643_v36, %v3207_v23 }
 0x420   : > { %v3249_v27 = vmax.f32 %v3208_v52, 0.0 }
 0x422   : > { %v3269_v28 = vmul.f32 %v5649_v60, %v3249_v27 }
 0x423   : > { %v3091_v14 = vpop.f32.mrf.mxu0 }
 0x424   : > { %v3092_v35 = vadd.f32 %v5584_v19, %v3091_v14  ;;  %v3291_v45 = vsel %vm2995_vm5, %v3269_v28, 0.0  ;;  %v3798_v28 = vld [vmem:[%s3966_s23 + $0x10] sm:$0xff] }
 0x425   : > { %3292 = vadd.xlane.f32.xlu2 %v3291_v45  ;;  %v2973_v14 = vmul.f32 %v3798_v28, %v2957_v3 }
 0x426   : > { %v3119_v32 = vmax.f32 %v3092_v35, 0.0 }
 0x428   : > { %3628 = vmatmul.msk.f32.gmra.mxu1 %vm2995_vm5, %v3119_v32 }
 0x429   : > { %v3210_v41 = vpop.f32.mrf.mxu1 }
 0x42a   : > { %v3211_v62 = vadd.f32 %v5643_v36, %v3210_v41  ;;  %v2958_v41 = vld [vmem:[%s5690_s29 + $0x18] sm:$0xff] }
 0x42c   : > { %v3250_v25 = vmax.f32 %v3211_v62, 0.0 }
 0x42e   : > { %v3270_v47 = vmul.f32 %v5649_v60, %v3250_v25 }
 0x430   : > { %v3294_v48 = vsel %vm2995_vm5, %v3270_v47, 0.0  ;;  %v3799_v47 = vld [vmem:[%s3966_s23 + $0x18] sm:$0xff] }
 0x431   : > { %3295 = vadd.xlane.f32.xlu0 %v3294_v48  ;;  %v2974_v48 = vmul.f32 %v3799_v47, %v2958_v41  ;;  %v3805_v47 = vld [vmem:[%s3966_s23 + $0x48] sm:$0xff] }
 0x436   : > { %v3094_v31 = vpop.f32.mrf.mxu0 }
 0x437   : > { %v3095_v17 = vadd.f32 %v5584_v19, %v3094_v31 }
 0x439   : > { %v3120_v0 = vmax.f32 %v3095_v17, 0.0 }
 0x43b   : > { %v3213_v8 = vpop.f32.mrf.mxu1  ;;  %3629 = vmatmul.msk.f32.gmra.mxu1 %vm2995_vm5, %v3120_v0 }
 0x43c   : > { %v3214_v38 = vadd.f32 %v5643_v36, %v3213_v8  ;;  %v2959_v8 = vld [vmem:[%s5690_s29 + $0x20] sm:$0xff] }
 0x43e   : > { %v3251_v11 = vmax.f32 %v3214_v38, 0.0  ;;  %v3800_v38 = vld [vmem:[%s3966_s23 + $0x20] sm:$0xff] }
 0x440   : > { %v3271_v2 = vmul.f32 %v5649_v60, %v3251_v11  ;;  %v2975_v11 = vmul.f32 %v3800_v38, %v2959_v8 }
 0x442   : > { %v3297_v49 = vsel %vm2995_vm5, %v3271_v2, 0.0 }
 0x443   : > { %3298 = vadd.xlane.f32.xlu1 %v3297_v49 }
 0x448   : > { %v3097_v4 = vpop.f32.mrf.mxu0 }
 0x449   : > { %v3098_v39 = vadd.f32 %v5584_v19, %v3097_v4 }
 0x44b   : > { %v3121_v61 = vmax.f32 %v3098_v39, 0.0 }
 0x44d   : > { %3630 = vmatmul.msk.f32.gmra.mxu1 %vm2995_vm5, %v3121_v61 }
 0x454   : > { %v3216_v53 = vpop.f32.mrf.mxu1 }
 0x455   : > { %v3217_v42 = vadd.f32 %v5643_v36, %v3216_v53 }
 0x457   : > { %v3252_v18 = vmax.f32 %v3217_v42, 0.0 }
 0x459   : > { %v3272_v12 = vmul.f32 %v5649_v60, %v3252_v18 }
 0x45b   : > { %v3100_v37 = vpop.f32.mrf.mxu0  ;;  %v3300_v40 = vsel %vm2995_vm5, %v3272_v12, 0.0  ;;  %v2960_v12 = vld [vmem:[%s5690_s29 + $0x28] sm:$0xff] }
 0x45c   : > { %v3101_v54 = vadd.f32 %v5584_v19, %v3100_v37  ;;  %3301 = vadd.xlane.f32.xlu2 %v3300_v40  ;;  %v3801_v37 = vld [vmem:[%s3966_s23 + $0x28] sm:$0xff] }
 0x45d   : > { %v2976_v40 = vmul.f32 %v3801_v37, %v2960_v12 }
 0x45e   : > { %v3122_v51 = vmax.f32 %v3101_v54, 0.0 }
 0x460   : > { %3631 = vmatmul.msk.f32.gmra.mxu1 %vm2995_vm5, %v3122_v51 }
 0x467   : > { %v3219_v59 = vpop.f32.mrf.mxu1 }
 0x468   : > { %v3220_v56 = vadd.f32 %v5643_v36, %v3219_v59 }
 0x46a   : > { %v3253_v34 = vmax.f32 %v3220_v56, 0.0 }
 0x46c   : > { %v3273_v20 = vmul.f32 %v5649_v60, %v3253_v34 }
 0x46e   : > { %v3303_v55 = vsel %vm2995_vm5, %v3273_v20, 0.0 }
 0x46f   : > { %3304 = vadd.xlane.f32.xlu0 %v3303_v55 }
 0x474   : > { %v3103_v5 = vpop.f32.mrf.mxu0 }
 0x475   : > { %v3104_v44 = vadd.f32 %v5584_v19, %v3103_v5 }
 0x477   : > { %v3123_v13 = vmax.f32 %v3104_v44, 0.0  ;;  %v2961_v44 = vld [vmem:[%s5690_s29 + $0x30] sm:$0xff] }
 0x479   : > { %v3222_v43 = vpop.f32.mrf.mxu1  ;;  %3632 = vmatmul.msk.f32.gmra.mxu1 %vm2995_vm5, %v3123_v13 }
 0x47a   : > { %v3223_v63 = vadd.f32 %v5643_v36, %v3222_v43 }
 0x47c   : > { %v3254_v21 = vmax.f32 %v3223_v63, 0.0  ;;  %v3802_v63 = vld [vmem:[%s3966_s23 + $0x30] sm:$0xff] }
 0x47d   : > { %v2977_v29 = vmul.f32 %v3802_v63, %v2961_v44  ;;  %v3809_v44 = vld [vmem:[%s3966_s23 + $0x68] sm:$0xff] }
 0x47e   : > { %v3274_v33 = vmul.f32 %v5649_v60, %v3254_v21 }
 0x480   : > { %v3284_v57 = vpop.xlane.xlu0 %3283  ;;  %v3306_v15 = vsel %vm2995_vm5, %v3274_v33, 0.0 }
 0x481   : > { %v3330_v50 = vadd.f32 %v3284_v57, %v2971_v22  ;;  %3307 = vadd.xlane.f32.xlu1 %v3306_v15 }
 0x483   : > { %v3348_v6 = vadd.f32 %v5697_v7, %v3330_v50  ;;  %v2962_v50 = vld [vmem:[%s5690_s29 + $0x38] sm:$0xff] }
 0x485   : > { %3365 = vst.msk [vmem:[%s5704_s12] sm:$0xff] %vm3364_vm1, %v3348_v6 }
 0x487   : > { %v3106_v9 = vpop.f32.mrf.mxu0 }
 0x488   : > { %v3107_v10 = vadd.f32 %v5584_v19, %v3106_v9  ;;  %v3287_v26 = vpop.xlane.xlu1 %3286 }
 0x489   : > { %v3331_v24 = vadd.f32 %v3287_v26, %v2972_v30  ;;  %v2978_v30 = vmul.f32 %v3803_v16, %v2962_v50  ;;  %v2970_v50 = vld [vmem:[%s5690_s29 + $0x78] sm:$0xff] }
 0x48a   : > { %v3124_v1 = vmax.f32 %v3107_v10, 0.0 }
 0x48b   : > { %v3349_v23 = vadd.f32 %v5697_v7, %v3331_v24 }
 0x48c   : > { %v3225_v52 = vpop.f32.mrf.mxu1  ;;  %3633 = vmatmul.msk.f32.gmra.mxu1 %vm2995_vm5, %v3124_v1 }
 0x48d   : > { %3366 = vst.msk [vmem:[%s5704_s12 + $0x8] sm:$0xff] %vm3364_vm1, %v3349_v23  ;;  %v3226_v27 = vadd.f32 %v5643_v36, %v3225_v52  ;;  %v2963_v23 = vld [vmem:[%s5690_s29 + $0x40] sm:$0xff] }
 0x48e   : > { %v3804_v52 = vld [vmem:[%s3966_s23 + $0x40] sm:$0xff] }
 0x48f   : > { %v3255_v19 = vmax.f32 %v3226_v27, 0.0  ;;  %v2979_v27 = vmul.f32 %v3804_v52, %v2963_v23 }
 0x490   : > { %v3290_v35 = vpop.xlane.xlu2 %3289 }
 0x491   : > { %v3275_v45 = vmul.f32 %v5649_v60, %v3255_v19  ;;  %v3332_v32 = vadd.f32 %v3290_v35, %v2973_v14 }
 0x493   : > { %v3350_v62 = vadd.f32 %v5697_v7, %v3332_v32  ;;  %v3309_v25 = vsel %vm2995_vm5, %v3275_v45, 0.0 }
 0x494   : > { %3310 = vadd.xlane.f32.xlu2 %v3309_v25  ;;  %v2964_v25 = vld [vmem:[%s5690_s29 + $0x48] sm:$0xff] }
 0x495   : > { %3367 = vst.msk [vmem:[%s5704_s12 + $0x10] sm:$0xff] %vm3364_vm1, %v3350_v62 }
 0x498   : > { %v3293_v31 = vpop.xlane.xlu2 %3292 }
 0x499   : > { %v3333_v17 = vadd.f32 %v3293_v31, %v2974_v48  ;;  %v2980_v48 = vmul.f32 %v3805_v47, %v2964_v25 }
 0x49b   : > { %v3351_v0 = vadd.f32 %v5697_v7, %v3333_v17 }
 0x49d   : > { %3368 = vst.msk [vmem:[%s5704_s12 + $0x18] sm:$0xff] %vm3364_vm1, %v3351_v0 }
 0x4a4   : > { %v3296_v2 = vpop.xlane.xlu0 %3295 }
 0x4a5   : > { %v3334_v49 = vadd.f32 %v3296_v2, %v2975_v11  ;;  %v3228_v4 = vpop.f32.mrf.mxu1 }
 0x4a6   : > { %v3229_v39 = vadd.f32 %v5643_v36, %v3228_v4  ;;  %v2965_v4 = vld [vmem:[%s5690_s29 + $0x50] sm:$0xff] }
 0x4a7   : > { %v3352_v61 = vadd.f32 %v5697_v7, %v3334_v49 }
 0x4a8   : > { %v3256_v53 = vmax.f32 %v3229_v39, 0.0  ;;  %v3806_v39 = vld [vmem:[%s3966_s23 + $0x50] sm:$0xff] }
 0x4a9   : > { %3369 = vst.msk [vmem:[%s5704_s12 + $0x20] sm:$0xff] %vm3364_vm1, %v3352_v61  ;;  %v2981_v61 = vmul.f32 %v3806_v39, %v2965_v4 }
 0x4aa   : > { %v3276_v42 = vmul.f32 %v5649_v60, %v3256_v53 }
 0x4ac   : > { %v3312_v18 = vsel %vm2995_vm5, %v3276_v42, 0.0 }
 0x4ad   : > { %3313 = vadd.xlane.f32.xlu0 %v3312_v18 }
 0x4b6   : > { %v3299_v54 = vpop.xlane.xlu1 %3298 }
 0x4b7   : > { %v3335_v51 = vadd.f32 %v3299_v54, %v2976_v40 }
 0x4b8   : > { %v3231_v59 = vpop.f32.mrf.mxu1 }
 0x4b9   : > { %v3353_v56 = vadd.f32 %v5697_v7, %v3335_v51  ;;  %v3232_v34 = vadd.f32 %v5643_v36, %v3231_v59  ;;  %v2967_v51 = vld [vmem:[%s5690_s29 + $0x60] sm:$0xff] }
 0x4ba   : > { %v3808_v59 = vld [vmem:[%s3966_s23 + $0x60] sm:$0xff] }
 0x4bb   : > { %3370 = vst.msk [vmem:[%s5704_s12 + $0x28] sm:$0xff] %vm3364_vm1, %v3353_v56  ;;  %v3257_v20 = vmax.f32 %v3232_v34, 0.0  ;;  %v2983_v56 = vmul.f32 %v3808_v59, %v2967_v51 }
 0x4bd   : > { %v3277_v55 = vmul.f32 %v5649_v60, %v3257_v20 }
 0x4bf   : > { %v3315_v5 = vsel %vm2995_vm5, %v3277_v55, 0.0 }
 0x4c0   : > { %3316 = vadd.xlane.f32.xlu1 %v3315_v5  ;;  %v2968_v5 = vld [vmem:[%s5690_s29 + $0x68] sm:$0xff] }
 0x4ca   : > { %v3234_v13 = vpop.f32.mrf.mxu1 }
 0x4cb   : > { %v3235_v43 = vadd.f32 %v5643_v36, %v3234_v13  ;;  %v2984_v13 = vmul.f32 %v3809_v44, %v2968_v5 }
 0x4cd   : > { %v3258_v21 = vmax.f32 %v3235_v43, 0.0 }
 0x4cf   : > { %v3278_v46 = vmul.f32 %v5649_v60, %v3258_v21  ;;  %v3302_v22 = vpop.xlane.xlu2 %3301  ;;  %v2969_v21 = vld [vmem:[%s5690_s29 + $0x70] sm:$0xff] }
 0x4d0   : > { %v3336_v33 = vadd.f32 %v3302_v22, %v2977_v29 }
 0x4d1   : > { %v3318_v57 = vsel %vm2995_vm5, %v3278_v46, 0.0  ;;  %v3810_v46 = vld [vmem:[%s3966_s23 + $0x70] sm:$0xff] }
 0x4d2   : > { %v3354_v15 = vadd.f32 %v5697_v7, %v3336_v33  ;;  %3319 = vadd.xlane.f32.xlu2 %v3318_v57  ;;  %v2985_v22 = vmul.f32 %v3810_v46, %v2969_v21 }
 0x4d4   : > { %3371 = vst.msk [vmem:[%s5704_s12 + $0x30] sm:$0xff] %vm3364_vm1, %v3354_v15 }
 0x4dd   : > { %v3237_v58 = vpop.f32.mrf.mxu1 }
 0x4de   : > { %v3238_v6 = vadd.f32 %v5643_v36, %v3237_v58  ;;  %v3811_v58 = vld [vmem:[%s3966_s23 + $0x78] sm:$0xff] }
 0x4e0   : > { %v3259_v9 = vmax.f32 %v3238_v6, 0.0  ;;  %v2986_v6 = vmul.f32 %v3811_v58, %v2970_v50 }
 0x4e2   : > { %v3279_v10 = vmul.f32 %v5649_v60, %v3259_v9  ;;  %v3305_v26 = vpop.xlane.xlu0 %3304 }
 0x4e3   : > { %v3337_v24 = vadd.f32 %v3305_v26, %v2978_v30 }
 0x4e4   : > { %v3321_v1 = vsel %vm2995_vm5, %v3279_v10, 0.0 }
 0x4e5   : > { %v3355_v3 = vadd.f32 %v5697_v7, %v3337_v24  ;;  %3322 = vadd.xlane.f32.xlu0 %v3321_v1 }
 0x4e7   : > { %3372 = vst.msk [vmem:[%s5704_s12 + $0x38] sm:$0xff] %vm3364_vm1, %v3355_v3 }
 0x4f4   : > { %v3308_v28 = vpop.xlane.xlu1 %3307 }
 0x4f5   : > { %v3338_v14 = vadd.f32 %v3308_v28, %v2979_v27 }
 0x4f6   : > { %v3240_v19 = vpop.f32.mrf.mxu1 }
 0x4f7   : > { %v3356_v35 = vadd.f32 %v5697_v7, %v3338_v14  ;;  %v3241_v45 = vadd.f32 %v5643_v36, %v3240_v19 }
 0x4f9   : > { %3373 = vst.msk [vmem:[%s5704_s12 + $0x40] sm:$0xff] %vm3364_vm1, %v3356_v35  ;;  %v3260_v32 = vmax.f32 %v3241_v45, 0.0 }
 0x4fb   : > { %v3280_v41 = vmul.f32 %v5649_v60, %v3260_v32 }
 0x4fd   : > { %v3324_v62 = vsel %vm2995_vm5, %v3280_v41, 0.0 }
 0x4fe   : > { %3325 = vadd.xlane.f32.xlu1 %v3324_v62 }
 0x507   : > { %v3311_v31 = vpop.xlane.xlu2 %3310 }
 0x508   : > { %v3339_v17 = vadd.f32 %v3311_v31, %v2980_v48 }
 0x509   : > { %v3243_v0 = vpop.f32.mrf.mxu1 }
 0x50a   : > { %v3357_v8 = vadd.f32 %v5697_v7, %v3339_v17  ;;  %v3244_v38 = vadd.f32 %v5643_v36, %v3243_v0  ;;  %v2966_v36 = vld [vmem:[%s5690_s29 + $0x58] sm:$0xff] }
 0x50c   : > { %3374 = vst.msk [vmem:[%s5704_s12 + $0x48] sm:$0xff] %vm3364_vm1, %v3357_v8  ;;  %v3261_v11 = vmax.f32 %v3244_v38, 0.0 }
 0x50e   : > { %v3281_v2 = vmul.f32 %v5649_v60, %v3261_v11  ;;  %v3807_v60 = vld [vmem:[%s3966_s23 + $0x58] sm:$0xff] }
 0x50f   : > { %v2982_v12 = vmul.f32 %v3807_v60, %v2966_v36 }
 0x510   : > { %v3327_v49 = vsel %vm2995_vm5, %v3281_v2, 0.0 }
 0x511   : > { %3328 = vadd.xlane.f32.xlu2 %v3327_v49 }
 0x520   : > { %v3314_v53 = vpop.xlane.xlu0 %3313 }
 0x521   : > { %v3340_v42 = vadd.f32 %v3314_v53, %v2981_v61 }
 0x523   : > { %v3358_v18 = vadd.f32 %v5697_v7, %v3340_v42 }
 0x525   : > { %3375 = vst.msk [vmem:[%s5704_s12 + $0x50] sm:$0xff] %vm3364_vm1, %v3358_v18 }
 0x533   : > { %v3317_v37 = vpop.xlane.xlu1 %3316 }
 0x534   : > { %v3341_v40 = vadd.f32 %v3317_v37, %v2982_v12 }
 0x536   : > { %v3359_v54 = vadd.f32 %v5697_v7, %v3341_v40 }
 0x538   : > { %3376 = vst.msk [vmem:[%s5704_s12 + $0x58] sm:$0xff] %vm3364_vm1, %v3359_v54 }
 0x545   : > { %v3320_v34 = vpop.xlane.xlu2 %3319 }
 0x546   : > { %v3342_v20 = vadd.f32 %v3320_v34, %v2983_v56 }
 0x548   : > { %v3360_v55 = vadd.f32 %v5697_v7, %v3342_v20 }
 0x54a   : > { %3377 = vst.msk [vmem:[%s5704_s12 + $0x60] sm:$0xff] %vm3364_vm1, %v3360_v55 }
 0x558   : > { %v3323_v43 = vpop.xlane.xlu0 %3322 }
 0x559   : > { %v3343_v63 = vadd.f32 %v3323_v43, %v2984_v13 }
 0x55b   : > { %v3361_v29 = vadd.f32 %v5697_v7, %v3343_v63 }
 0x55d   : > { %3378 = vst.msk [vmem:[%s5704_s12 + $0x68] sm:$0xff] %vm3364_vm1, %v3361_v29 }
 0x571   : > { %v3326_v33 = vpop.xlane.xlu1 %3325 }
 0x572   : > { %v3344_v57 = vadd.f32 %v3326_v33, %v2985_v22 }
 0x574   : > { %v3362_v15 = vadd.f32 %v5697_v7, %v3344_v57 }
 0x576   : > { %3379 = vst.msk [vmem:[%s5704_s12 + $0x70] sm:$0xff] %vm3364_vm1, %v3362_v15 }
 0x584   : > { %v3329_v16 = vpop.xlane.xlu2 %3328 }
 0x585   : > { %v3345_v30 = vadd.f32 %v3329_v16, %v2986_v6 }
 0x587   : > { %v3363_v9 = vadd.f32 %v5697_v7, %v3345_v30 }
 0x589   : > { %3380 = vst.msk [vmem:[%s5704_s12 + $0x78] sm:$0xff] %vm3364_vm1, %v3363_v9 }
 0x58a PF: > { %s21_s15 = sadd.s32 1, %s3818_s15  }
 0x58b   : > { %p18_p4 = scmp.ge.s32.totalorder %s21_s15, 4  }
 0x58d   :  { %20 = sbr.rel (!%p18_p4) target bundleno = 2 (0x2), region = 96 }

</bundles_post_ra>
